<compile_context>
chip_gen: v7x
topology: tpu7x:2x2x1
jax: 0.10.0
libtpu: 0.0.40
codegen_flags: <defaults>
</compile_context>

<pallas_src>
import functools
import math

import jax
import jax.numpy as jnp
from jax.experimental import pallas as pl
from jax.experimental.pallas import tpu as pltpu

_LN_EPS = 1e-5  # PyTorch nn.LayerNorm default eps


def _layernorm(x, gamma, beta):
    mu = jnp.mean(x, axis=-1, keepdims=True)
    var = jnp.mean((x - mu) ** 2, axis=-1, keepdims=True)
    return (x - mu) * jax.lax.rsqrt(var + _LN_EPS) * gamma + beta


def _slot_attention_kernel(
    x_ref, s0_ref, pvec_ref, wd_ref, wg_ref,
    slots_out, attn_out,
    *, heads, dim_head, iters, epsilon, hidden,
):
    B_tile, N, D = x_ref.shape
    S = s0_ref.shape[1]
    H, dh = heads, dim_head
    HD = H * dh

    # Fold the batch tile into the token/slot row axis so every projection /
    # GRU / MLP matmul runs over B_tile*N (or B_tile*S) rows at once.
    x = jnp.concatenate([x_ref[b] for b in range(B_tile)], axis=0)        # (B*N, D)
    slots = jnp.concatenate([s0_ref[b] for b in range(B_tile)], axis=0)   # (B*S, D)

    # Packed small params: one row per vector, left-aligned, zero-padded (f32).
    def p(row, width):
        return pvec_ref[row:row + 1, :width]

    ln_in_g, ln_in_b = p(0, D), p(1, D)
    ln_s_g, ln_s_b = p(2, D), p(3, D)
    ln_p_g, ln_p_b = p(4, D), p(5, D)
    bq = p(6, HD)            # already scaled by `scale` in the wrapper
    bkv = p(7, 2 * HD)
    bcih = p(8, 3 * D)       # = bc @ wih + bih (combine_heads folded into GRU)
    bhh = p(9, 3 * D)
    b1 = p(10, hidden)
    b2 = p(11, D)

    # Packed bf16 weights:  wd = [wkv | w1 | w2^T | wq]  (all with D rows).
    wd = wd_ref[...]
    off = 0
    wkv = wd[:, off:off + 2 * HD]; off += 2 * HD
    w1 = wd[:, off:off + hidden]; off += hidden
    w2t = wd[:, off:off + hidden]; off += hidden
    wq = wd[:, off:off + HD]                                # pre-scaled by `scale`
    wg = wg_ref[...]                                        # (HD+D, 6D) fused gates

    # inputs = norm_input(inputs); fused K|V projection, done once.
    xn = _layernorm(x, ln_in_g, ln_in_b)
    kv = jnp.dot(xn.astype(wkv.dtype), wkv,
                 preferred_element_type=jnp.float32) + bkv               # (B*N, 2HD)
    k = kv[:, :HD]
    v = kv[:, HD:]

    # Hoist per-(batch, head) K/V views out of the iteration loop.
    k_bh = [[k[b * N:(b + 1) * N, h * dh:(h + 1) * dh] for h in range(H)]
            for b in range(B_tile)]
    v_bh = [[v[b * N:(b + 1) * N, h * dh:(h + 1) * dh] for h in range(H)]
            for b in range(B_tile)]

    attn_bh = [[None] * H for _ in range(B_tile)]
    for _ in range(iters):  # static unroll (iters = 3)
        slots_prev = slots
        sn = _layernorm(slots, ln_s_g, ln_s_b)
        # scale folded into (wq, bq) -> no explicit logits scaling needed.
        q = jnp.dot(sn.astype(wq.dtype), wq,
                    preferred_element_type=jnp.float32) + bq             # (B*S, HD)

        u_rows = []
        for b in range(B_tile):
            qb = q[b * S:(b + 1) * S, :]
            uh = []
            for h in range(H):
                qh = qb[:, h * dh:(h + 1) * dh]                          # (S, dh)
                # transposed-RHS matmul: qh @ k_h^T without an XLU transpose.
                dots = jax.lax.dot_general(
                    qh, k_bh[b][h], (((1,), (1,)), ((), ())),
                    preferred_element_type=jnp.float32)                  # (S, N)
                # softmax over the slot axis (dim=-2); exact denominator.
                m = jnp.max(dots, axis=0, keepdims=True)
                e = jnp.exp(dots - m)
                attn = e / jnp.sum(e, axis=0, keepdims=True)
                # F.normalize(attn + eps, p=1, dim=-1)
                attn = attn + epsilon
                attn = attn * pl.reciprocal(
                    jnp.sum(attn, axis=-1, keepdims=True), approx=True)
                attn_bh[b][h] = attn
                uh.append(jnp.dot(attn, v_bh[b][h],
                                  preferred_element_type=jnp.float32))   # (S, dh)
            u_rows.append(jnp.concatenate(uh, axis=-1))                  # (S, HD)
        u_cat = jnp.concatenate(u_rows, axis=0)                          # (B*S, HD)

        # GRUCell with combine_heads folded in and gi/gh fused into ONE matmul:
        #   [u_cat | slots_prev] @ [[wc@wih, 0], [0, whh]] = [gi_raw | gh_raw]
        gate_in = jnp.concatenate([u_cat, slots_prev], axis=-1)          # (B*S, HD+D)
        gates = jnp.dot(gate_in.astype(wg.dtype), wg,
                        preferred_element_type=jnp.float32)              # (B*S, 6D)
        gi = gates[:, :3 * D] + bcih
        gh = gates[:, 3 * D:] + bhh
        r = jax.nn.sigmoid(gi[:, 0:D] + gh[:, 0:D])
        z = jax.nn.sigmoid(gi[:, D:2 * D] + gh[:, D:2 * D])
        n = jnp.tanh(gi[:, 2 * D:] + r * gh[:, 2 * D:])
        slots = (1.0 - z) * n + z * slots_prev

        # Residual MLP (second matmul uses w2^T as a transposed RHS).
        pre = _layernorm(slots, ln_p_g, ln_p_b)
        hid = jax.nn.relu(jnp.dot(pre.astype(w1.dtype), w1,
                                  preferred_element_type=jnp.float32) + b1)
        slots = slots + jax.lax.dot_general(
            hid.astype(w2t.dtype), w2t, (((1,), (1,)), ((), ())),
            preferred_element_type=jnp.float32) + b2

    # Lane-dense stores: one wide row per batch element (S*D / H*S*N lanes).
    slots_out[0] = jnp.concatenate(
        [jnp.concatenate([slots[b * S + s:b * S + s + 1, :] for s in range(S)],
                         axis=-1)
         for b in range(B_tile)], axis=0)                                # (B_tile, S*D)
    attn_out[0] = jnp.concatenate(
        [jnp.concatenate([attn_bh[b][h][s:s + 1, :]
                          for h in range(H) for s in range(S)], axis=-1)
         for b in range(B_tile)], axis=0)                                # (B_tile, H*S*N)


def _num_batch_blocks(batch):
    """Two core-parallel batch blocks on dual-TensorCore chips (v7x), else one."""
    try:
        kind = jax.devices()[0].device_kind.lower()
    except Exception:
        kind = ""
    if "7" in kind and batch >= 2 and batch % 2 == 0:
        return 2
    return 1


def multi_head_slot_attention(inputs, slots_init, params, *, heads, dim_head,
                              iters, epsilon, scale):
    B, N, D = inputs.shape
    S = slots_init.shape[1]
    H = heads
    HD = H * dim_head
    hidden = params["w1"].shape[1]

    # Fold the attention scale into the Q projection.
    wq = params["wq"] * scale
    bq = params["bq"] * scale

    # Fuse K and V projections into one matmul.
    wkv = jnp.concatenate([params["wk"], params["wv"]], axis=1)          # (D, 2HD)
    bkv = jnp.concatenate([params["bk"], params["bv"]], axis=1)          # (1, 2HD)

    # combine_heads feeds only the GRU input gates -> fold wc/bc into wih/bih.
    wcih = params["wc"] @ params["wih"]                                  # (HD, 3D)
    bcih = params["bc"] @ params["wih"] + params["bih"]                  # (1, 3D)

    # Fused GRU gate matmul: [u | slots_prev] @ [[wcih, 0], [0, whh]].
    wgate = jnp.zeros((HD + D, 6 * D), jnp.float32)
    wgate = wgate.at[:HD, :3 * D].set(wcih)
    wgate = wgate.at[HD:, 3 * D:].set(params["whh"])

    # All D-row weights packed into one bf16 operand; fused gates in a second.
    wd = jnp.concatenate([wkv, params["w1"], params["w2"].T, wq],
                         axis=1).astype(jnp.bfloat16)                    # (D, 3HD+2*hidden)
    wg = wgate.astype(jnp.bfloat16)                                      # (HD+D, 6D)

    # Pack all tiny (1, K) vectors into a single f32 (rows, >=128) operand.
    small = [
        params["ln_in_g"], params["ln_in_b"],
        params["ln_s_g"], params["ln_s_b"],
        params["ln_p_g"], params["ln_p_b"],
        bq, bkv, bcih, params["bhh"], params["b1"], params["b2"],
    ]
    widths = [int(t.size) for t in small]
    pack_w = max(128, ((max(widths) + 127) // 128) * 128)
    rows = [jnp.pad(t.reshape(-1), (0, pack_w - int(t.size))) for t in small]
    pvec = jnp.stack(rows, axis=0).astype(jnp.float32)                   # (12, pack_w)

    blocks = _num_batch_blocks(B)
    bt = B // blocks
    dim_sems = (pltpu.CORE_PARALLEL,) if blocks > 1 else ("arbitrary",)

    in_specs = [
        pl.BlockSpec((bt, N, D), lambda g: (g, 0, 0)),
        pl.BlockSpec((bt, S, D), lambda g: (g, 0, 0)),
        pl.BlockSpec(pvec.shape, lambda g: (0, 0)),
        pl.BlockSpec(wd.shape, lambda g: (0, 0)),
        pl.BlockSpec(wg.shape, lambda g: (0, 0)),
    ]
    out_specs = [
        pl.BlockSpec((1, bt, S * D), lambda g: (g, 0, 0)),
        pl.BlockSpec((1, bt, H * S * N), lambda g: (g, 0, 0)),
    ]
    out_shape = [
        jax.ShapeDtypeStruct((blocks, bt, S * D), jnp.float32),
        jax.ShapeDtypeStruct((blocks, bt, H * S * N), jnp.float32),
    ]

    kernel = functools.partial(
        _slot_attention_kernel, heads=heads, dim_head=dim_head,
        iters=iters, epsilon=epsilon, hidden=hidden)

    slots_flat, attn_flat = pl.pallas_call(
        kernel,
        grid_spec=pltpu.PrefetchScalarGridSpec(
            num_scalar_prefetch=0, grid=(blocks,),
            in_specs=in_specs, out_specs=out_specs),
        out_shape=out_shape,
        compiler_params=pltpu.CompilerParams(dimension_semantics=dim_sems),
    )(inputs, slots_init, pvec, wd, wg)

    slots = slots_flat.reshape(B, S, D)
    attn = attn_flat.reshape(B, H, S, N)
    return slots, attn


def init_params(key, dim, heads, dim_head, hidden_dim):
    dim_inner = heads * dim_head
    hidden_dim = max(dim, hidden_dim)
    ks = jax.random.split(key, 12)

    def linear(k, fan_in, fan_out):
        kw, kb = jax.random.split(k)
        bound = 1.0 / math.sqrt(fan_in)
        w = jax.random.uniform(kw, (fan_in, fan_out), jnp.float32, -bound, bound)
        b = jax.random.uniform(kb, (1, fan_out), jnp.float32, -bound, bound)
        return w, b

    p = {}
    p["slots_mean"] = jax.random.normal(ks[0], (1, 1, dim), jnp.float32)
    a = math.sqrt(6.0 / (1 + dim))  # xavier_uniform on (1, 1, dim)
    p["slots_logvar"] = jax.random.uniform(ks[1], (1, 1, dim), jnp.float32, -a, a)

    for nm in ("ln_in", "ln_s", "ln_p"):
        p[nm + "_g"] = jnp.ones((1, dim), jnp.float32)
        p[nm + "_b"] = jnp.zeros((1, dim), jnp.float32)

    p["wq"], p["bq"] = linear(ks[2], dim, dim_inner)
    p["wk"], p["bk"] = linear(ks[3], dim, dim_inner)
    p["wv"], p["bv"] = linear(ks[4], dim, dim_inner)
    p["wc"], p["bc"] = linear(ks[5], dim_inner, dim)

    # GRUCell weights (stored transposed: (in, 3*hidden)), gate order [r, z, n]
    bound = 1.0 / math.sqrt(dim)
    p["wih"] = jax.random.uniform(ks[6], (dim, 3 * dim), jnp.float32, -bound, bound)
    p["bih"] = jax.random.uniform(ks[7], (1, 3 * dim), jnp.float32, -bound, bound)
    p["whh"] = jax.random.uniform(ks[8], (dim, 3 * dim), jnp.float32, -bound, bound)
    p["bhh"] = jax.random.uniform(ks[9], (1, 3 * dim), jnp.float32, -bound, bound)

    p["w1"], p["b1"] = linear(ks[10], dim, hidden_dim)
    p["w2"], p["b2"] = linear(ks[11], hidden_dim, dim)
    return p


def _reference(x, slots0, p, *, heads, dim_head, iters, epsilon, scale):
    def ln(t, g, b):
        mu = jnp.mean(t, -1, keepdims=True)
        var = jnp.mean((t - mu) ** 2, -1, keepdims=True)
        return (t - mu) / jnp.sqrt(var + _LN_EPS) * g + b

    B, N, D = x.shape
    S = slots0.shape[1]
    xn = ln(x, p["ln_in_g"][0], p["ln_in_b"][0])
    k = xn @ p["wk"] + p["bk"][0]
    v = xn @ p["wv"] + p["bv"][0]

    def split(t):
        return t.reshape(B, -1, heads, dim_head).transpose(0, 2, 1, 3)

    kh, vh = split(k), split(v)
    slots = slots0
    attn = None
    for _ in range(iters):
        sp = slots
        sn = ln(slots, p["ln_s_g"][0], p["ln_s_b"][0])
        q = split(sn @ p["wq"] + p["bq"][0])
        dots = jnp.einsum("bhid,bhjd->bhij", q, kh) * scale
        attn = jax.nn.softmax(dots, axis=-2)
        attn = attn + epsilon
        attn = attn / jnp.sum(attn, -1, keepdims=True)
        upd = jnp.einsum("bhjd,bhij->bhid", vh, attn)
        upd = upd.transpose(0, 2, 1, 3).reshape(B, S, heads * dim_head)
        upd = upd @ p["wc"] + p["bc"][0]
        gi = upd @ p["wih"] + p["bih"][0]
        gh = sp @ p["whh"] + p["bhh"][0]
        r = jax.nn.sigmoid(gi[..., :D] + gh[..., :D])
        z = jax.nn.sigmoid(gi[..., D:2 * D] + gh[..., D:2 * D])
        n = jnp.tanh(gi[..., 2 * D:] + r * gh[..., 2 * D:])
        slots = (1 - z) * n + z * sp
        pre = ln(slots, p["ln_p_g"][0], p["ln_p_b"][0])
        slots = slots + jax.nn.relu(pre @ p["w1"] + p["b1"][0]) @ p["w2"] + p["b2"][0]
    return slots, attn


if __name__ == "__main__":
    B, N, D = 2, 16, 32            # batch, input tokens, feature dim
    heads, dim_head = 2, 32
    num_slots, iters = 4, 3
    epsilon = 1e-8
    hidden_dim = 128
    scale = D ** -0.5              # module uses dim**-0.5, not dim_head**-0.5

    key = jax.random.PRNGKey(0)
    k_param, k_x, k_noise = jax.random.split(key, 3)
    params = init_params(k_param, D, heads, dim_head, hidden_dim)

    x = jax.random.normal(k_x, (B, N, D), jnp.float32)
    # slot sampling (mean + exp(logvar) * noise) done in plain JAX, outside the kernel
    noise = jax.random.normal(k_noise, (B, num_slots, D), jnp.float32)
    slots_init = params["slots_mean"][0] + jnp.exp(params["slots_logvar"][0]) * noise

    slots, attn = multi_head_slot_attention(
        x, slots_init, params, heads=heads, dim_head=dim_head,
        iters=iters, epsilon=epsilon, scale=scale)
    jax.block_until_ready((slots, attn))

    assert slots.shape == (B, num_slots, D)
    assert attn.shape == (B, heads, num_slots, N)

    ref_slots, ref_attn = _reference(
        x, slots_init, params, heads=heads, dim_head=dim_head,
        iters=iters, epsilon=epsilon, scale=scale)
    assert jnp.allclose(slots, ref_slots, rtol=1e-2, atol=1e-2)
    assert jnp.allclose(attn, ref_attn, rtol=1e-2, atol=1e-2)

    print("KERNEL_OK")
</pallas_src>

<mosaic_0001>
module attributes {stable_mosaic.version = 11 : i64} {
  func.func @_slot_attention_kernel(%arg0: i32, %arg1: memref<2x16x32xf32, #tpu.memory_space<vmem>>, %arg2: memref<2x4x32xf32, #tpu.memory_space<vmem>>, %arg3: memref<12x128xf32, #tpu.memory_space<vmem>>, %arg4: memref<32x448xbf16, #tpu.memory_space<vmem>>, %arg5: memref<96x192xbf16, #tpu.memory_space<vmem>>, %arg6: memref<1x2x128xf32, #tpu.memory_space<vmem>>, %arg7: memref<1x2x128xf32, #tpu.memory_space<vmem>>) attributes {dimension_semantics = [#tpu.dimension_semantics<arbitrary>], iteration_bounds = array<i64: 1>, scalar_prefetch = 0 : i64, scratch_operands = 0 : i64, tpu.core_type = #tpu.core_type<tc>, window_params = [{transform_indices = @transform_0, window_bounds = array<i64: 2, 16, 32>}, {transform_indices = @transform_1, window_bounds = array<i64: 2, 4, 32>}, {pipeline_mode = #tpu.pipeline_mode<synchronous>, transform_indices = @transform_2, window_bounds = array<i64: 12, 128>}, {pipeline_mode = #tpu.pipeline_mode<synchronous>, transform_indices = @transform_3, window_bounds = array<i64: 32, 448>}, {pipeline_mode = #tpu.pipeline_mode<synchronous>, transform_indices = @transform_4, window_bounds = array<i64: 96, 192>}, {transform_indices = @transform_5, window_bounds = array<i64: 1, 2, 128>}, {transform_indices = @transform_6, window_bounds = array<i64: 1, 2, 128>}]} {
    %c0 = arith.constant 0 : index
    %c0_0 = arith.constant 0 : index
    %c0_1 = arith.constant 0 : index
    %0 = vector.load %arg1[%c0, %c0_0, %c0_1] : memref<2x16x32xf32, #tpu.memory_space<vmem>>, vector<1x16x32xf32>
    %1 = vector.shape_cast %0 : vector<1x16x32xf32> to vector<16x32xf32>
    %c1 = arith.constant 1 : index
    %c0_2 = arith.constant 0 : index
    %c0_3 = arith.constant 0 : index
    %2 = vector.load %arg1[%c1, %c0_2, %c0_3] : memref<2x16x32xf32, #tpu.memory_space<vmem>>, vector<1x16x32xf32>
    %3 = vector.shape_cast %2 : vector<1x16x32xf32> to vector<16x32xf32>
    %4 = tpu.concatenate %1, %3 in 0 : vector<16x32xf32>, vector<16x32xf32> -> vector<32x32xf32>
    %c0_4 = arith.constant 0 : index
    %c0_5 = arith.constant 0 : index
    %c0_6 = arith.constant 0 : index
    %5 = vector.load %arg2[%c0_4, %c0_5, %c0_6] : memref<2x4x32xf32, #tpu.memory_space<vmem>>, vector<1x4x32xf32>
    %6 = vector.shape_cast %5 : vector<1x4x32xf32> to vector<4x32xf32>
    %c1_7 = arith.constant 1 : index
    %c0_8 = arith.constant 0 : index
    %c0_9 = arith.constant 0 : index
    %7 = vector.load %arg2[%c1_7, %c0_8, %c0_9] : memref<2x4x32xf32, #tpu.memory_space<vmem>>, vector<1x4x32xf32>
    %8 = vector.shape_cast %7 : vector<1x4x32xf32> to vector<4x32xf32>
    %9 = tpu.concatenate %6, %8 in 0 : vector<4x32xf32>, vector<4x32xf32> -> vector<8x32xf32>
    %c0_10 = arith.constant 0 : index
    %c0_11 = arith.constant 0 : index
    %10 = vector.load %arg3[%c0_10, %c0_11] : memref<12x128xf32, #tpu.memory_space<vmem>>, vector<1x32xf32>
    %c1_12 = arith.constant 1 : index
    %c0_13 = arith.constant 0 : index
    %11 = vector.load %arg3[%c1_12, %c0_13] : memref<12x128xf32, #tpu.memory_space<vmem>>, vector<1x32xf32>
    %c2 = arith.constant 2 : index
    %c0_14 = arith.constant 0 : index
    %12 = vector.load %arg3[%c2, %c0_14] : memref<12x128xf32, #tpu.memory_space<vmem>>, vector<1x32xf32>
    %c3 = arith.constant 3 : index
    %c0_15 = arith.constant 0 : index
    %13 = vector.load %arg3[%c3, %c0_15] : memref<12x128xf32, #tpu.memory_space<vmem>>, vector<1x32xf32>
    %c4 = arith.constant 4 : index
    %c0_16 = arith.constant 0 : index
    %14 = vector.load %arg3[%c4, %c0_16] : memref<12x128xf32, #tpu.memory_space<vmem>>, vector<1x32xf32>
    %c5 = arith.constant 5 : index
    %c0_17 = arith.constant 0 : index
    %15 = vector.load %arg3[%c5, %c0_17] : memref<12x128xf32, #tpu.memory_space<vmem>>, vector<1x32xf32>
    %c6 = arith.constant 6 : index
    %c0_18 = arith.constant 0 : index
    %16 = vector.load %arg3[%c6, %c0_18] : memref<12x128xf32, #tpu.memory_space<vmem>>, vector<1x64xf32>
    %c7 = arith.constant 7 : index
    %c0_19 = arith.constant 0 : index
    %17 = vector.load %arg3[%c7, %c0_19] : memref<12x128xf32, #tpu.memory_space<vmem>>, vector<1x128xf32>
    %c8 = arith.constant 8 : index
    %c0_20 = arith.constant 0 : index
    %18 = vector.load %arg3[%c8, %c0_20] : memref<12x128xf32, #tpu.memory_space<vmem>>, vector<1x96xf32>
    %c9 = arith.constant 9 : index
    %c0_21 = arith.constant 0 : index
    %19 = vector.load %arg3[%c9, %c0_21] : memref<12x128xf32, #tpu.memory_space<vmem>>, vector<1x96xf32>
    %c10 = arith.constant 10 : index
    %c0_22 = arith.constant 0 : index
    %20 = vector.load %arg3[%c10, %c0_22] : memref<12x128xf32, #tpu.memory_space<vmem>>, vector<1x128xf32>
    %c11 = arith.constant 11 : index
    %c0_23 = arith.constant 0 : index
    %21 = vector.load %arg3[%c11, %c0_23] : memref<12x128xf32, #tpu.memory_space<vmem>>, vector<1x32xf32>
    %c0_24 = arith.constant 0 : index
    %c0_25 = arith.constant 0 : index
    %22 = vector.load %arg4[%c0_24, %c0_25] : memref<32x448xbf16, #tpu.memory_space<vmem>>, vector<32x448xbf16>
    %23 = vector.extract_strided_slice %22 {offsets = [0, 0], sizes = [32, 128], strides = [1, 1]} : vector<32x448xbf16> to vector<32x128xbf16>
    %24 = vector.extract_strided_slice %22 {offsets = [0, 128], sizes = [32, 128], strides = [1, 1]} : vector<32x448xbf16> to vector<32x128xbf16>
    %25 = vector.extract_strided_slice %22 {offsets = [0, 256], sizes = [32, 128], strides = [1, 1]} : vector<32x448xbf16> to vector<32x128xbf16>
    %26 = vector.extract_strided_slice %22 {offsets = [0, 384], sizes = [32, 64], strides = [1, 1]} : vector<32x448xbf16> to vector<32x64xbf16>
    %c0_26 = arith.constant 0 : index
    %c0_27 = arith.constant 0 : index
    %27 = vector.load %arg5[%c0_26, %c0_27] : memref<96x192xbf16, #tpu.memory_space<vmem>>, vector<96x192xbf16>
    %cst = arith.constant dense<0.000000e+00> : vector<32xf32>
    %28 = vector.multi_reduction <add>, %4, %cst [1] : vector<32x32xf32> to vector<32xf32>
    %29 = vector.shape_cast %28 : vector<32xf32> to vector<32x1xf32>
    %cst_28 = arith.constant 3.200000e+01 : f32
    %30 = vector.broadcast %cst_28 : f32 to vector<32x1xf32>
    %31 = arith.divf %29, %30 : vector<32x1xf32>
    %32 = vector.broadcast %31 : vector<32x1xf32> to vector<32x32xf32>
    %33 = arith.subf %4, %32 : vector<32x32xf32>
    %34 = arith.mulf %33, %33 : vector<32x32xf32>
    %cst_29 = arith.constant dense<0.000000e+00> : vector<32xf32>
    %35 = vector.multi_reduction <add>, %34, %cst_29 [1] : vector<32x32xf32> to vector<32xf32>
    %36 = vector.shape_cast %35 : vector<32xf32> to vector<32x1xf32>
    %cst_30 = arith.constant 3.200000e+01 : f32
    %37 = vector.broadcast %cst_30 : f32 to vector<32x1xf32>
    %38 = arith.divf %36, %37 : vector<32x1xf32>
    %39 = vector.broadcast %31 : vector<32x1xf32> to vector<32x32xf32>
    %40 = arith.subf %4, %39 : vector<32x32xf32>
    %cst_31 = arith.constant 9.99999974E-6 : f32
    %41 = vector.broadcast %cst_31 : f32 to vector<32x1xf32>
    %42 = arith.addf %38, %41 : vector<32x1xf32>
    %43 = math.rsqrt %42 : vector<32x1xf32>
    %44 = vector.broadcast %43 : vector<32x1xf32> to vector<32x32xf32>
    %45 = arith.mulf %40, %44 : vector<32x32xf32>
    %46 = vector.broadcast %10 : vector<1x32xf32> to vector<32x32xf32>
    %47 = arith.mulf %45, %46 : vector<32x32xf32>
    %48 = vector.broadcast %11 : vector<1x32xf32> to vector<32x32xf32>
    %49 = arith.addf %47, %48 : vector<32x32xf32>
    %50 = arith.truncf %49 : vector<32x32xf32> to vector<32x32xbf16>
    %cst_32 = arith.constant dense<0.000000e+00> : vector<32x128xf32>
    %51 = tpu.matmul %50, %23, %cst_32 {dimension_numbers = #tpu.dot_dimension_numbers<[1], [0], [0], [1], [0, 0, 1, 1], [], []>} : vector<32x32xbf16>, vector<32x128xbf16>, vector<32x128xf32> -> vector<32x128xf32>
    %52 = vector.broadcast %17 : vector<1x128xf32> to vector<32x128xf32>
    %53 = arith.addf %51, %52 : vector<32x128xf32>
    %54 = vector.extract_strided_slice %53 {offsets = [0, 0], sizes = [32, 64], strides = [1, 1]} : vector<32x128xf32> to vector<32x64xf32>
    %55 = vector.extract_strided_slice %53 {offsets = [0, 64], sizes = [32, 64], strides = [1, 1]} : vector<32x128xf32> to vector<32x64xf32>
    %56 = vector.extract_strided_slice %54 {offsets = [0, 0], sizes = [16, 32], strides = [1, 1]} : vector<32x64xf32> to vector<16x32xf32>
    %57 = vector.extract_strided_slice %54 {offsets = [0, 32], sizes = [16, 32], strides = [1, 1]} : vector<32x64xf32> to vector<16x32xf32>
    %58 = vector.extract_strided_slice %54 {offsets = [16, 0], sizes = [16, 32], strides = [1, 1]} : vector<32x64xf32> to vector<16x32xf32>
    %59 = vector.extract_strided_slice %54 {offsets = [16, 32], sizes = [16, 32], strides = [1, 1]} : vector<32x64xf32> to vector<16x32xf32>
    %60 = vector.extract_strided_slice %55 {offsets = [0, 0], sizes = [16, 32], strides = [1, 1]} : vector<32x64xf32> to vector<16x32xf32>
    %61 = vector.extract_strided_slice %55 {offsets = [0, 32], sizes = [16, 32], strides = [1, 1]} : vector<32x64xf32> to vector<16x32xf32>
    %62 = vector.extract_strided_slice %55 {offsets = [16, 0], sizes = [16, 32], strides = [1, 1]} : vector<32x64xf32> to vector<16x32xf32>
    %63 = vector.extract_strided_slice %55 {offsets = [16, 32], sizes = [16, 32], strides = [1, 1]} : vector<32x64xf32> to vector<16x32xf32>
    %cst_33 = arith.constant dense<0.000000e+00> : vector<8xf32>
    %64 = vector.multi_reduction <add>, %9, %cst_33 [1] : vector<8x32xf32> to vector<8xf32>
    %65 = vector.shape_cast %64 : vector<8xf32> to vector<8x1xf32>
    %cst_34 = arith.constant 3.200000e+01 : f32
    %66 = vector.broadcast %cst_34 : f32 to vector<8x1xf32>
    %67 = arith.divf %65, %66 : vector<8x1xf32>
    %68 = vector.broadcast %67 : vector<8x1xf32> to vector<8x32xf32>
    %69 = arith.subf %9, %68 : vector<8x32xf32>
    %70 = arith.mulf %69, %69 : vector<8x32xf32>
    %cst_35 = arith.constant dense<0.000000e+00> : vector<8xf32>
    %71 = vector.multi_reduction <add>, %70, %cst_35 [1] : vector<8x32xf32> to vector<8xf32>
    %72 = vector.shape_cast %71 : vector<8xf32> to vector<8x1xf32>
    %cst_36 = arith.constant 3.200000e+01 : f32
    %73 = vector.broadcast %cst_36 : f32 to vector<8x1xf32>
    %74 = arith.divf %72, %73 : vector<8x1xf32>
    %75 = vector.broadcast %67 : vector<8x1xf32> to vector<8x32xf32>
    %76 = arith.subf %9, %75 : vector<8x32xf32>
    %cst_37 = arith.constant 9.99999974E-6 : f32
    %77 = vector.broadcast %cst_37 : f32 to vector<8x1xf32>
    %78 = arith.addf %74, %77 : vector<8x1xf32>
    %79 = math.rsqrt %78 : vector<8x1xf32>
    %80 = vector.broadcast %79 : vector<8x1xf32> to vector<8x32xf32>
    %81 = arith.mulf %76, %80 : vector<8x32xf32>
    %82 = vector.broadcast %12 : vector<1x32xf32> to vector<8x32xf32>
    %83 = arith.mulf %81, %82 : vector<8x32xf32>
    %84 = vector.broadcast %13 : vector<1x32xf32> to vector<8x32xf32>
    %85 = arith.addf %83, %84 : vector<8x32xf32>
    %86 = arith.truncf %85 : vector<8x32xf32> to vector<8x32xbf16>
    %cst_38 = arith.constant dense<0.000000e+00> : vector<8x64xf32>
    %87 = tpu.matmul %86, %26, %cst_38 {dimension_numbers = #tpu.dot_dimension_numbers<[1], [0], [0], [1], [0, 0, 1, 1], [], []>} : vector<8x32xbf16>, vector<32x64xbf16>, vector<8x64xf32> -> vector<8x64xf32>
    %88 = vector.broadcast %16 : vector<1x64xf32> to vector<8x64xf32>
    %89 = arith.addf %87, %88 : vector<8x64xf32>
    %90 = vector.extract_strided_slice %89 {offsets = [0, 0], sizes = [4, 64], strides = [1, 1]} : vector<8x64xf32> to vector<4x64xf32>
    %91 = vector.extract_strided_slice %90 {offsets = [0, 0], sizes = [4, 32], strides = [1, 1]} : vector<4x64xf32> to vector<4x32xf32>
    %cst_39 = arith.constant dense<0.000000e+00> : vector<4x16xf32>
    %92 = tpu.matmul %91, %56, %cst_39 {dimension_numbers = #tpu.dot_dimension_numbers<[1], [1], [0], [0], [0, 0, 1, 0], [], []>} : vector<4x32xf32>, vector<16x32xf32>, vector<4x16xf32> -> vector<4x16xf32>
    %cst_40 = arith.constant dense<0xFF800000> : vector<16xf32>
    %93 = vector.multi_reduction <maximumf>, %92, %cst_40 [0] : vector<4x16xf32> to vector<16xf32>
    %94 = vector.shape_cast %93 : vector<16xf32> to vector<1x16xf32>
    %95 = vector.broadcast %94 : vector<1x16xf32> to vector<4x16xf32>
    %96 = arith.subf %92, %95 : vector<4x16xf32>
    %97 = math.exp %96 : vector<4x16xf32>
    %cst_41 = arith.constant dense<0.000000e+00> : vector<16xf32>
    %98 = vector.multi_reduction <add>, %97, %cst_41 [0] : vector<4x16xf32> to vector<16xf32>
    %99 = vector.shape_cast %98 : vector<16xf32> to vector<1x16xf32>
    %100 = vector.broadcast %99 : vector<1x16xf32> to vector<4x16xf32>
    %101 = arith.divf %97, %100 : vector<4x16xf32>
    %cst_42 = arith.constant 9.99999993E-9 : f32
    %102 = vector.broadcast %cst_42 : f32 to vector<4x16xf32>
    %103 = arith.addf %101, %102 : vector<4x16xf32>
    %cst_43 = arith.constant dense<0.000000e+00> : vector<4xf32>
    %104 = vector.multi_reduction <add>, %103, %cst_43 [1] : vector<4x16xf32> to vector<4xf32>
    %105 = vector.shape_cast %104 : vector<4xf32> to vector<4x1xf32>
    %106 = tpu.reciprocal %105 {approx = true} : vector<4x1xf32> -> vector<4x1xf32>
    %107 = vector.broadcast %106 : vector<4x1xf32> to vector<4x16xf32>
    %108 = arith.mulf %103, %107 : vector<4x16xf32>
    %cst_44 = arith.constant dense<0.000000e+00> : vector<4x32xf32>
    %109 = tpu.matmul %108, %60, %cst_44 {dimension_numbers = #tpu.dot_dimension_numbers<[1], [0], [0], [1], [0, 0, 1, 1], [], []>} : vector<4x16xf32>, vector<16x32xf32>, vector<4x32xf32> -> vector<4x32xf32>
    %110 = vector.extract_strided_slice %90 {offsets = [0, 32], sizes = [4, 32], strides = [1, 1]} : vector<4x64xf32> to vector<4x32xf32>
    %cst_45 = arith.constant dense<0.000000e+00> : vector<4x16xf32>
    %111 = tpu.matmul %110, %57, %cst_45 {dimension_numbers = #tpu.dot_dimension_numbers<[1], [1], [0], [0], [0, 0, 1, 0], [], []>} : vector<4x32xf32>, vector<16x32xf32>, vector<4x16xf32> -> vector<4x16xf32>
    %cst_46 = arith.constant dense<0xFF800000> : vector<16xf32>
    %112 = vector.multi_reduction <maximumf>, %111, %cst_46 [0] : vector<4x16xf32> to vector<16xf32>
    %113 = vector.shape_cast %112 : vector<16xf32> to vector<1x16xf32>
    %114 = vector.broadcast %113 : vector<1x16xf32> to vector<4x16xf32>
    %115 = arith.subf %111, %114 : vector<4x16xf32>
    %116 = math.exp %115 : vector<4x16xf32>
    %cst_47 = arith.constant dense<0.000000e+00> : vector<16xf32>
    %117 = vector.multi_reduction <add>, %116, %cst_47 [0] : vector<4x16xf32> to vector<16xf32>
    %118 = vector.shape_cast %117 : vector<16xf32> to vector<1x16xf32>
    %119 = vector.broadcast %118 : vector<1x16xf32> to vector<4x16xf32>
    %120 = arith.divf %116, %119 : vector<4x16xf32>
    %cst_48 = arith.constant 9.99999993E-9 : f32
    %121 = vector.broadcast %cst_48 : f32 to vector<4x16xf32>
    %122 = arith.addf %120, %121 : vector<4x16xf32>
    %cst_49 = arith.constant dense<0.000000e+00> : vector<4xf32>
    %123 = vector.multi_reduction <add>, %122, %cst_49 [1] : vector<4x16xf32> to vector<4xf32>
    %124 = vector.shape_cast %123 : vector<4xf32> to vector<4x1xf32>
    %125 = tpu.reciprocal %124 {approx = true} : vector<4x1xf32> -> vector<4x1xf32>
    %126 = vector.broadcast %125 : vector<4x1xf32> to vector<4x16xf32>
    %127 = arith.mulf %122, %126 : vector<4x16xf32>
    %cst_50 = arith.constant dense<0.000000e+00> : vector<4x32xf32>
    %128 = tpu.matmul %127, %61, %cst_50 {dimension_numbers = #tpu.dot_dimension_numbers<[1], [0], [0], [1], [0, 0, 1, 1], [], []>} : vector<4x16xf32>, vector<16x32xf32>, vector<4x32xf32> -> vector<4x32xf32>
    %129 = tpu.concatenate %109, %128 in 1 : vector<4x32xf32>, vector<4x32xf32> -> vector<4x64xf32>
    %130 = vector.extract_strided_slice %89 {offsets = [4, 0], sizes = [4, 64], strides = [1, 1]} : vector<8x64xf32> to vector<4x64xf32>
    %131 = vector.extract_strided_slice %130 {offsets = [0, 0], sizes = [4, 32], strides = [1, 1]} : vector<4x64xf32> to vector<4x32xf32>
    %cst_51 = arith.constant dense<0.000000e+00> : vector<4x16xf32>
    %132 = tpu.matmul %131, %58, %cst_51 {dimension_numbers = #tpu.dot_dimension_numbers<[1], [1], [0], [0], [0, 0, 1, 0], [], []>} : vector<4x32xf32>, vector<16x32xf32>, vector<4x16xf32> -> vector<4x16xf32>
    %cst_52 = arith.constant dense<0xFF800000> : vector<16xf32>
    %133 = vector.multi_reduction <maximumf>, %132, %cst_52 [0] : vector<4x16xf32> to vector<16xf32>
    %134 = vector.shape_cast %133 : vector<16xf32> to vector<1x16xf32>
    %135 = vector.broadcast %134 : vector<1x16xf32> to vector<4x16xf32>
    %136 = arith.subf %132, %135 : vector<4x16xf32>
    %137 = math.exp %136 : vector<4x16xf32>
    %cst_53 = arith.constant dense<0.000000e+00> : vector<16xf32>
    %138 = vector.multi_reduction <add>, %137, %cst_53 [0] : vector<4x16xf32> to vector<16xf32>
    %139 = vector.shape_cast %138 : vector<16xf32> to vector<1x16xf32>
    %140 = vector.broadcast %139 : vector<1x16xf32> to vector<4x16xf32>
    %141 = arith.divf %137, %140 : vector<4x16xf32>
    %cst_54 = arith.constant 9.99999993E-9 : f32
    %142 = vector.broadcast %cst_54 : f32 to vector<4x16xf32>
    %143 = arith.addf %141, %142 : vector<4x16xf32>
    %cst_55 = arith.constant dense<0.000000e+00> : vector<4xf32>
    %144 = vector.multi_reduction <add>, %143, %cst_55 [1] : vector<4x16xf32> to vector<4xf32>
    %145 = vector.shape_cast %144 : vector<4xf32> to vector<4x1xf32>
    %146 = tpu.reciprocal %145 {approx = true} : vector<4x1xf32> -> vector<4x1xf32>
    %147 = vector.broadcast %146 : vector<4x1xf32> to vector<4x16xf32>
    %148 = arith.mulf %143, %147 : vector<4x16xf32>
    %cst_56 = arith.constant dense<0.000000e+00> : vector<4x32xf32>
    %149 = tpu.matmul %148, %62, %cst_56 {dimension_numbers = #tpu.dot_dimension_numbers<[1], [0], [0], [1], [0, 0, 1, 1], [], []>} : vector<4x16xf32>, vector<16x32xf32>, vector<4x32xf32> -> vector<4x32xf32>
    %150 = vector.extract_strided_slice %130 {offsets = [0, 32], sizes = [4, 32], strides = [1, 1]} : vector<4x64xf32> to vector<4x32xf32>
    %cst_57 = arith.constant dense<0.000000e+00> : vector<4x16xf32>
    %151 = tpu.matmul %150, %59, %cst_57 {dimension_numbers = #tpu.dot_dimension_numbers<[1], [1], [0], [0], [0, 0, 1, 0], [], []>} : vector<4x32xf32>, vector<16x32xf32>, vector<4x16xf32> -> vector<4x16xf32>
    %cst_58 = arith.constant dense<0xFF800000> : vector<16xf32>
    %152 = vector.multi_reduction <maximumf>, %151, %cst_58 [0] : vector<4x16xf32> to vector<16xf32>
    %153 = vector.shape_cast %152 : vector<16xf32> to vector<1x16xf32>
    %154 = vector.broadcast %153 : vector<1x16xf32> to vector<4x16xf32>
    %155 = arith.subf %151, %154 : vector<4x16xf32>
    %156 = math.exp %155 : vector<4x16xf32>
    %cst_59 = arith.constant dense<0.000000e+00> : vector<16xf32>
    %157 = vector.multi_reduction <add>, %156, %cst_59 [0] : vector<4x16xf32> to vector<16xf32>
    %158 = vector.shape_cast %157 : vector<16xf32> to vector<1x16xf32>
    %159 = vector.broadcast %158 : vector<1x16xf32> to vector<4x16xf32>
    %160 = arith.divf %156, %159 : vector<4x16xf32>
    %cst_60 = arith.constant 9.99999993E-9 : f32
    %161 = vector.broadcast %cst_60 : f32 to vector<4x16xf32>
    %162 = arith.addf %160, %161 : vector<4x16xf32>
    %cst_61 = arith.constant dense<0.000000e+00> : vector<4xf32>
    %163 = vector.multi_reduction <add>, %162, %cst_61 [1] : vector<4x16xf32> to vector<4xf32>
    %164 = vector.shape_cast %163 : vector<4xf32> to vector<4x1xf32>
    %165 = tpu.reciprocal %164 {approx = true} : vector<4x1xf32> -> vector<4x1xf32>
    %166 = vector.broadcast %165 : vector<4x1xf32> to vector<4x16xf32>
    %167 = arith.mulf %162, %166 : vector<4x16xf32>
    %cst_62 = arith.constant dense<0.000000e+00> : vector<4x32xf32>
    %168 = tpu.matmul %167, %63, %cst_62 {dimension_numbers = #tpu.dot_dimension_numbers<[1], [0], [0], [1], [0, 0, 1, 1], [], []>} : vector<4x16xf32>, vector<16x32xf32>, vector<4x32xf32> -> vector<4x32xf32>
    %169 = tpu.concatenate %149, %168 in 1 : vector<4x32xf32>, vector<4x32xf32> -> vector<4x64xf32>
    %170 = tpu.concatenate %129, %169 in 0 : vector<4x64xf32>, vector<4x64xf32> -> vector<8x64xf32>
    %171 = tpu.concatenate %170, %9 in 1 : vector<8x64xf32>, vector<8x32xf32> -> vector<8x96xf32>
    %172 = arith.truncf %171 : vector<8x96xf32> to vector<8x96xbf16>
    %cst_63 = arith.constant dense<0.000000e+00> : vector<8x192xf32>
    %173 = tpu.matmul %172, %27, %cst_63 {dimension_numbers = #tpu.dot_dimension_numbers<[1], [0], [0], [1], [0, 0, 1, 1], [], []>} : vector<8x96xbf16>, vector<96x192xbf16>, vector<8x192xf32> -> vector<8x192xf32>
    %174 = vector.extract_strided_slice %173 {offsets = [0, 0], sizes = [8, 96], strides = [1, 1]} : vector<8x192xf32> to vector<8x96xf32>
    %175 = vector.broadcast %18 : vector<1x96xf32> to vector<8x96xf32>
    %176 = arith.addf %174, %175 : vector<8x96xf32>
    %177 = vector.extract_strided_slice %173 {offsets = [0, 96], sizes = [8, 96], strides = [1, 1]} : vector<8x192xf32> to vector<8x96xf32>
    %178 = vector.broadcast %19 : vector<1x96xf32> to vector<8x96xf32>
    %179 = arith.addf %177, %178 : vector<8x96xf32>
    %180 = vector.extract_strided_slice %176 {offsets = [0, 0], sizes = [8, 32], strides = [1, 1]} : vector<8x96xf32> to vector<8x32xf32>
    %181 = vector.extract_strided_slice %179 {offsets = [0, 0], sizes = [8, 32], strides = [1, 1]} : vector<8x96xf32> to vector<8x32xf32>
    %182 = arith.addf %180, %181 : vector<8x32xf32>
    %183 = arith.negf %182 : vector<8x32xf32>
    %184 = math.exp %183 : vector<8x32xf32>
    %cst_64 = arith.constant 1.000000e+00 : f32
    %185 = vector.broadcast %cst_64 : f32 to vector<8x32xf32>
    %186 = arith.addf %185, %184 : vector<8x32xf32>
    %187 = arith.divf %185, %186 : vector<8x32xf32>
    %188 = vector.extract_strided_slice %176 {offsets = [0, 32], sizes = [8, 32], strides = [1, 1]} : vector<8x96xf32> to vector<8x32xf32>
    %189 = vector.extract_strided_slice %179 {offsets = [0, 32], sizes = [8, 32], strides = [1, 1]} : vector<8x96xf32> to vector<8x32xf32>
    %190 = arith.addf %188, %189 : vector<8x32xf32>
    %191 = arith.negf %190 : vector<8x32xf32>
    %192 = math.exp %191 : vector<8x32xf32>
    %cst_65 = arith.constant 1.000000e+00 : f32
    %193 = vector.broadcast %cst_65 : f32 to vector<8x32xf32>
    %194 = arith.addf %193, %192 : vector<8x32xf32>
    %195 = arith.divf %193, %194 : vector<8x32xf32>
    %196 = vector.extract_strided_slice %176 {offsets = [0, 64], sizes = [8, 32], strides = [1, 1]} : vector<8x96xf32> to vector<8x32xf32>
    %197 = vector.extract_strided_slice %179 {offsets = [0, 64], sizes = [8, 32], strides = [1, 1]} : vector<8x96xf32> to vector<8x32xf32>
    %198 = arith.mulf %187, %197 : vector<8x32xf32>
    %199 = arith.addf %196, %198 : vector<8x32xf32>
    %200 = math.tanh %199 : vector<8x32xf32>
    %cst_66 = arith.constant 1.000000e+00 : f32
    %201 = vector.broadcast %cst_66 : f32 to vector<8x32xf32>
    %202 = arith.subf %201, %195 : vector<8x32xf32>
    %203 = arith.mulf %202, %200 : vector<8x32xf32>
    %204 = arith.mulf %195, %9 : vector<8x32xf32>
    %205 = arith.addf %203, %204 : vector<8x32xf32>
    %cst_67 = arith.constant dense<0.000000e+00> : vector<8xf32>
    %206 = vector.multi_reduction <add>, %205, %cst_67 [1] : vector<8x32xf32> to vector<8xf32>
    %207 = vector.shape_cast %206 : vector<8xf32> to vector<8x1xf32>
    %cst_68 = arith.constant 3.200000e+01 : f32
    %208 = vector.broadcast %cst_68 : f32 to vector<8x1xf32>
    %209 = arith.divf %207, %208 : vector<8x1xf32>
    %210 = vector.broadcast %209 : vector<8x1xf32> to vector<8x32xf32>
    %211 = arith.subf %205, %210 : vector<8x32xf32>
    %212 = arith.mulf %211, %211 : vector<8x32xf32>
    %cst_69 = arith.constant dense<0.000000e+00> : vector<8xf32>
    %213 = vector.multi_reduction <add>, %212, %cst_69 [1] : vector<8x32xf32> to vector<8xf32>
    %214 = vector.shape_cast %213 : vector<8xf32> to vector<8x1xf32>
    %cst_70 = arith.constant 3.200000e+01 : f32
    %215 = vector.broadcast %cst_70 : f32 to vector<8x1xf32>
    %216 = arith.divf %214, %215 : vector<8x1xf32>
    %217 = vector.broadcast %209 : vector<8x1xf32> to vector<8x32xf32>
    %218 = arith.subf %205, %217 : vector<8x32xf32>
    %cst_71 = arith.constant 9.99999974E-6 : f32
    %219 = vector.broadcast %cst_71 : f32 to vector<8x1xf32>
    %220 = arith.addf %216, %219 : vector<8x1xf32>
    %221 = math.rsqrt %220 : vector<8x1xf32>
    %222 = vector.broadcast %221 : vector<8x1xf32> to vector<8x32xf32>
    %223 = arith.mulf %218, %222 : vector<8x32xf32>
    %224 = vector.broadcast %14 : vector<1x32xf32> to vector<8x32xf32>
    %225 = arith.mulf %223, %224 : vector<8x32xf32>
    %226 = vector.broadcast %15 : vector<1x32xf32> to vector<8x32xf32>
    %227 = arith.addf %225, %226 : vector<8x32xf32>
    %228 = arith.truncf %227 : vector<8x32xf32> to vector<8x32xbf16>
    %cst_72 = arith.constant dense<0.000000e+00> : vector<8x128xf32>
    %229 = tpu.matmul %228, %24, %cst_72 {dimension_numbers = #tpu.dot_dimension_numbers<[1], [0], [0], [1], [0, 0, 1, 1], [], []>} : vector<8x32xbf16>, vector<32x128xbf16>, vector<8x128xf32> -> vector<8x128xf32>
    %230 = vector.broadcast %20 : vector<1x128xf32> to vector<8x128xf32>
    %231 = arith.addf %229, %230 : vector<8x128xf32>
    %cst_73 = arith.constant 0.000000e+00 : f32
    %232 = vector.broadcast %cst_73 : f32 to vector<8x128xf32>
    %233 = arith.maximumf %231, %232 : vector<8x128xf32>
    %234 = arith.truncf %233 : vector<8x128xf32> to vector<8x128xbf16>
    %cst_74 = arith.constant dense<0.000000e+00> : vector<8x32xf32>
    %235 = tpu.matmul %234, %25, %cst_74 {dimension_numbers = #tpu.dot_dimension_numbers<[1], [1], [0], [0], [0, 0, 1, 0], [], []>} : vector<8x128xbf16>, vector<32x128xbf16>, vector<8x32xf32> -> vector<8x32xf32>
    %236 = arith.addf %205, %235 : vector<8x32xf32>
    %237 = vector.broadcast %21 : vector<1x32xf32> to vector<8x32xf32>
    %238 = arith.addf %236, %237 : vector<8x32xf32>
    %cst_75 = arith.constant dense<0.000000e+00> : vector<8xf32>
    %239 = vector.multi_reduction <add>, %238, %cst_75 [1] : vector<8x32xf32> to vector<8xf32>
    %240 = vector.shape_cast %239 : vector<8xf32> to vector<8x1xf32>
    %cst_76 = arith.constant 3.200000e+01 : f32
    %241 = vector.broadcast %cst_76 : f32 to vector<8x1xf32>
    %242 = arith.divf %240, %241 : vector<8x1xf32>
    %243 = vector.broadcast %242 : vector<8x1xf32> to vector<8x32xf32>
    %244 = arith.subf %238, %243 : vector<8x32xf32>
    %245 = arith.mulf %244, %244 : vector<8x32xf32>
    %cst_77 = arith.constant dense<0.000000e+00> : vector<8xf32>
    %246 = vector.multi_reduction <add>, %245, %cst_77 [1] : vector<8x32xf32> to vector<8xf32>
    %247 = vector.shape_cast %246 : vector<8xf32> to vector<8x1xf32>
    %cst_78 = arith.constant 3.200000e+01 : f32
    %248 = vector.broadcast %cst_78 : f32 to vector<8x1xf32>
    %249 = arith.divf %247, %248 : vector<8x1xf32>
    %250 = vector.broadcast %242 : vector<8x1xf32> to vector<8x32xf32>
    %251 = arith.subf %238, %250 : vector<8x32xf32>
    %cst_79 = arith.constant 9.99999974E-6 : f32
    %252 = vector.broadcast %cst_79 : f32 to vector<8x1xf32>
    %253 = arith.addf %249, %252 : vector<8x1xf32>
    %254 = math.rsqrt %253 : vector<8x1xf32>
    %255 = vector.broadcast %254 : vector<8x1xf32> to vector<8x32xf32>
    %256 = arith.mulf %251, %255 : vector<8x32xf32>
    %257 = vector.broadcast %12 : vector<1x32xf32> to vector<8x32xf32>
    %258 = arith.mulf %256, %257 : vector<8x32xf32>
    %259 = vector.broadcast %13 : vector<1x32xf32> to vector<8x32xf32>
    %260 = arith.addf %258, %259 : vector<8x32xf32>
    %261 = arith.truncf %260 : vector<8x32xf32> to vector<8x32xbf16>
    %cst_80 = arith.constant dense<0.000000e+00> : vector<8x64xf32>
    %262 = tpu.matmul %261, %26, %cst_80 {dimension_numbers = #tpu.dot_dimension_numbers<[1], [0], [0], [1], [0, 0, 1, 1], [], []>} : vector<8x32xbf16>, vector<32x64xbf16>, vector<8x64xf32> -> vector<8x64xf32>
    %263 = vector.broadcast %16 : vector<1x64xf32> to vector<8x64xf32>
    %264 = arith.addf %262, %263 : vector<8x64xf32>
    %265 = vector.extract_strided_slice %264 {offsets = [0, 0], sizes = [4, 64], strides = [1, 1]} : vector<8x64xf32> to vector<4x64xf32>
    %266 = vector.extract_strided_slice %265 {offsets = [0, 0], sizes = [4, 32], strides = [1, 1]} : vector<4x64xf32> to vector<4x32xf32>
    %cst_81 = arith.constant dense<0.000000e+00> : vector<4x16xf32>
    %267 = tpu.matmul %266, %56, %cst_81 {dimension_numbers = #tpu.dot_dimension_numbers<[1], [1], [0], [0], [0, 0, 1, 0], [], []>} : vector<4x32xf32>, vector<16x32xf32>, vector<4x16xf32> -> vector<4x16xf32>
    %cst_82 = arith.constant dense<0xFF800000> : vector<16xf32>
    %268 = vector.multi_reduction <maximumf>, %267, %cst_82 [0] : vector<4x16xf32> to vector<16xf32>
    %269 = vector.shape_cast %268 : vector<16xf32> to vector<1x16xf32>
    %270 = vector.broadcast %269 : vector<1x16xf32> to vector<4x16xf32>
    %271 = arith.subf %267, %270 : vector<4x16xf32>
    %272 = math.exp %271 : vector<4x16xf32>
    %cst_83 = arith.constant dense<0.000000e+00> : vector<16xf32>
    %273 = vector.multi_reduction <add>, %272, %cst_83 [0] : vector<4x16xf32> to vector<16xf32>
    %274 = vector.shape_cast %273 : vector<16xf32> to vector<1x16xf32>
    %275 = vector.broadcast %274 : vector<1x16xf32> to vector<4x16xf32>
    %276 = arith.divf %272, %275 : vector<4x16xf32>
    %cst_84 = arith.constant 9.99999993E-9 : f32
    %277 = vector.broadcast %cst_84 : f32 to vector<4x16xf32>
    %278 = arith.addf %276, %277 : vector<4x16xf32>
    %cst_85 = arith.constant dense<0.000000e+00> : vector<4xf32>
    %279 = vector.multi_reduction <add>, %278, %cst_85 [1] : vector<4x16xf32> to vector<4xf32>
    %280 = vector.shape_cast %279 : vector<4xf32> to vector<4x1xf32>
    %281 = tpu.reciprocal %280 {approx = true} : vector<4x1xf32> -> vector<4x1xf32>
    %282 = vector.broadcast %281 : vector<4x1xf32> to vector<4x16xf32>
    %283 = arith.mulf %278, %282 : vector<4x16xf32>
    %cst_86 = arith.constant dense<0.000000e+00> : vector<4x32xf32>
    %284 = tpu.matmul %283, %60, %cst_86 {dimension_numbers = #tpu.dot_dimension_numbers<[1], [0], [0], [1], [0, 0, 1, 1], [], []>} : vector<4x16xf32>, vector<16x32xf32>, vector<4x32xf32> -> vector<4x32xf32>
    %285 = vector.extract_strided_slice %265 {offsets = [0, 32], sizes = [4, 32], strides = [1, 1]} : vector<4x64xf32> to vector<4x32xf32>
    %cst_87 = arith.constant dense<0.000000e+00> : vector<4x16xf32>
    %286 = tpu.matmul %285, %57, %cst_87 {dimension_numbers = #tpu.dot_dimension_numbers<[1], [1], [0], [0], [0, 0, 1, 0], [], []>} : vector<4x32xf32>, vector<16x32xf32>, vector<4x16xf32> -> vector<4x16xf32>
    %cst_88 = arith.constant dense<0xFF800000> : vector<16xf32>
    %287 = vector.multi_reduction <maximumf>, %286, %cst_88 [0] : vector<4x16xf32> to vector<16xf32>
    %288 = vector.shape_cast %287 : vector<16xf32> to vector<1x16xf32>
    %289 = vector.broadcast %288 : vector<1x16xf32> to vector<4x16xf32>
    %290 = arith.subf %286, %289 : vector<4x16xf32>
    %291 = math.exp %290 : vector<4x16xf32>
    %cst_89 = arith.constant dense<0.000000e+00> : vector<16xf32>
    %292 = vector.multi_reduction <add>, %291, %cst_89 [0] : vector<4x16xf32> to vector<16xf32>
    %293 = vector.shape_cast %292 : vector<16xf32> to vector<1x16xf32>
    %294 = vector.broadcast %293 : vector<1x16xf32> to vector<4x16xf32>
    %295 = arith.divf %291, %294 : vector<4x16xf32>
    %cst_90 = arith.constant 9.99999993E-9 : f32
    %296 = vector.broadcast %cst_90 : f32 to vector<4x16xf32>
    %297 = arith.addf %295, %296 : vector<4x16xf32>
    %cst_91 = arith.constant dense<0.000000e+00> : vector<4xf32>
    %298 = vector.multi_reduction <add>, %297, %cst_91 [1] : vector<4x16xf32> to vector<4xf32>
    %299 = vector.shape_cast %298 : vector<4xf32> to vector<4x1xf32>
    %300 = tpu.reciprocal %299 {approx = true} : vector<4x1xf32> -> vector<4x1xf32>
    %301 = vector.broadcast %300 : vector<4x1xf32> to vector<4x16xf32>
    %302 = arith.mulf %297, %301 : vector<4x16xf32>
    %cst_92 = arith.constant dense<0.000000e+00> : vector<4x32xf32>
    %303 = tpu.matmul %302, %61, %cst_92 {dimension_numbers = #tpu.dot_dimension_numbers<[1], [0], [0], [1], [0, 0, 1, 1], [], []>} : vector<4x16xf32>, vector<16x32xf32>, vector<4x32xf32> -> vector<4x32xf32>
    %304 = tpu.concatenate %284, %303 in 1 : vector<4x32xf32>, vector<4x32xf32> -> vector<4x64xf32>
    %305 = vector.extract_strided_slice %264 {offsets = [4, 0], sizes = [4, 64], strides = [1, 1]} : vector<8x64xf32> to vector<4x64xf32>
    %306 = vector.extract_strided_slice %305 {offsets = [0, 0], sizes = [4, 32], strides = [1, 1]} : vector<4x64xf32> to vector<4x32xf32>
    %cst_93 = arith.constant dense<0.000000e+00> : vector<4x16xf32>
    %307 = tpu.matmul %306, %58, %cst_93 {dimension_numbers = #tpu.dot_dimension_numbers<[1], [1], [0], [0], [0, 0, 1, 0], [], []>} : vector<4x32xf32>, vector<16x32xf32>, vector<4x16xf32> -> vector<4x16xf32>
    %cst_94 = arith.constant dense<0xFF800000> : vector<16xf32>
    %308 = vector.multi_reduction <maximumf>, %307, %cst_94 [0] : vector<4x16xf32> to vector<16xf32>
    %309 = vector.shape_cast %308 : vector<16xf32> to vector<1x16xf32>
    %310 = vector.broadcast %309 : vector<1x16xf32> to vector<4x16xf32>
    %311 = arith.subf %307, %310 : vector<4x16xf32>
    %312 = math.exp %311 : vector<4x16xf32>
    %cst_95 = arith.constant dense<0.000000e+00> : vector<16xf32>
    %313 = vector.multi_reduction <add>, %312, %cst_95 [0] : vector<4x16xf32> to vector<16xf32>
    %314 = vector.shape_cast %313 : vector<16xf32> to vector<1x16xf32>
    %315 = vector.broadcast %314 : vector<1x16xf32> to vector<4x16xf32>
    %316 = arith.divf %312, %315 : vector<4x16xf32>
    %cst_96 = arith.constant 9.99999993E-9 : f32
    %317 = vector.broadcast %cst_96 : f32 to vector<4x16xf32>
    %318 = arith.addf %316, %317 : vector<4x16xf32>
    %cst_97 = arith.constant dense<0.000000e+00> : vector<4xf32>
    %319 = vector.multi_reduction <add>, %318, %cst_97 [1] : vector<4x16xf32> to vector<4xf32>
    %320 = vector.shape_cast %319 : vector<4xf32> to vector<4x1xf32>
    %321 = tpu.reciprocal %320 {approx = true} : vector<4x1xf32> -> vector<4x1xf32>
    %322 = vector.broadcast %321 : vector<4x1xf32> to vector<4x16xf32>
    %323 = arith.mulf %318, %322 : vector<4x16xf32>
    %cst_98 = arith.constant dense<0.000000e+00> : vector<4x32xf32>
    %324 = tpu.matmul %323, %62, %cst_98 {dimension_numbers = #tpu.dot_dimension_numbers<[1], [0], [0], [1], [0, 0, 1, 1], [], []>} : vector<4x16xf32>, vector<16x32xf32>, vector<4x32xf32> -> vector<4x32xf32>
    %325 = vector.extract_strided_slice %305 {offsets = [0, 32], sizes = [4, 32], strides = [1, 1]} : vector<4x64xf32> to vector<4x32xf32>
    %cst_99 = arith.constant dense<0.000000e+00> : vector<4x16xf32>
    %326 = tpu.matmul %325, %59, %cst_99 {dimension_numbers = #tpu.dot_dimension_numbers<[1], [1], [0], [0], [0, 0, 1, 0], [], []>} : vector<4x32xf32>, vector<16x32xf32>, vector<4x16xf32> -> vector<4x16xf32>
    %cst_100 = arith.constant dense<0xFF800000> : vector<16xf32>
    %327 = vector.multi_reduction <maximumf>, %326, %cst_100 [0] : vector<4x16xf32> to vector<16xf32>
    %328 = vector.shape_cast %327 : vector<16xf32> to vector<1x16xf32>
    %329 = vector.broadcast %328 : vector<1x16xf32> to vector<4x16xf32>
    %330 = arith.subf %326, %329 : vector<4x16xf32>
    %331 = math.exp %330 : vector<4x16xf32>
    %cst_101 = arith.constant dense<0.000000e+00> : vector<16xf32>
    %332 = vector.multi_reduction <add>, %331, %cst_101 [0] : vector<4x16xf32> to vector<16xf32>
    %333 = vector.shape_cast %332 : vector<16xf32> to vector<1x16xf32>
    %334 = vector.broadcast %333 : vector<1x16xf32> to vector<4x16xf32>
    %335 = arith.divf %331, %334 : vector<4x16xf32>
    %cst_102 = arith.constant 9.99999993E-9 : f32
    %336 = vector.broadcast %cst_102 : f32 to vector<4x16xf32>
    %337 = arith.addf %335, %336 : vector<4x16xf32>
    %cst_103 = arith.constant dense<0.000000e+00> : vector<4xf32>
    %338 = vector.multi_reduction <add>, %337, %cst_103 [1] : vector<4x16xf32> to vector<4xf32>
    %339 = vector.shape_cast %338 : vector<4xf32> to vector<4x1xf32>
    %340 = tpu.reciprocal %339 {approx = true} : vector<4x1xf32> -> vector<4x1xf32>
    %341 = vector.broadcast %340 : vector<4x1xf32> to vector<4x16xf32>
    %342 = arith.mulf %337, %341 : vector<4x16xf32>
    %cst_104 = arith.constant dense<0.000000e+00> : vector<4x32xf32>
    %343 = tpu.matmul %342, %63, %cst_104 {dimension_numbers = #tpu.dot_dimension_numbers<[1], [0], [0], [1], [0, 0, 1, 1], [], []>} : vector<4x16xf32>, vector<16x32xf32>, vector<4x32xf32> -> vector<4x32xf32>
    %344 = tpu.concatenate %324, %343 in 1 : vector<4x32xf32>, vector<4x32xf32> -> vector<4x64xf32>
    %345 = tpu.concatenate %304, %344 in 0 : vector<4x64xf32>, vector<4x64xf32> -> vector<8x64xf32>
    %346 = tpu.concatenate %345, %238 in 1 : vector<8x64xf32>, vector<8x32xf32> -> vector<8x96xf32>
    %347 = arith.truncf %346 : vector<8x96xf32> to vector<8x96xbf16>
    %cst_105 = arith.constant dense<0.000000e+00> : vector<8x192xf32>
    %348 = tpu.matmul %347, %27, %cst_105 {dimension_numbers = #tpu.dot_dimension_numbers<[1], [0], [0], [1], [0, 0, 1, 1], [], []>} : vector<8x96xbf16>, vector<96x192xbf16>, vector<8x192xf32> -> vector<8x192xf32>
    %349 = vector.extract_strided_slice %348 {offsets = [0, 0], sizes = [8, 96], strides = [1, 1]} : vector<8x192xf32> to vector<8x96xf32>
    %350 = vector.broadcast %18 : vector<1x96xf32> to vector<8x96xf32>
    %351 = arith.addf %349, %350 : vector<8x96xf32>
    %352 = vector.extract_strided_slice %348 {offsets = [0, 96], sizes = [8, 96], strides = [1, 1]} : vector<8x192xf32> to vector<8x96xf32>
    %353 = vector.broadcast %19 : vector<1x96xf32> to vector<8x96xf32>
    %354 = arith.addf %352, %353 : vector<8x96xf32>
    %355 = vector.extract_strided_slice %351 {offsets = [0, 0], sizes = [8, 32], strides = [1, 1]} : vector<8x96xf32> to vector<8x32xf32>
    %356 = vector.extract_strided_slice %354 {offsets = [0, 0], sizes = [8, 32], strides = [1, 1]} : vector<8x96xf32> to vector<8x32xf32>
    %357 = arith.addf %355, %356 : vector<8x32xf32>
    %358 = arith.negf %357 : vector<8x32xf32>
    %359 = math.exp %358 : vector<8x32xf32>
    %cst_106 = arith.constant 1.000000e+00 : f32
    %360 = vector.broadcast %cst_106 : f32 to vector<8x32xf32>
    %361 = arith.addf %360, %359 : vector<8x32xf32>
    %362 = arith.divf %360, %361 : vector<8x32xf32>
    %363 = vector.extract_strided_slice %351 {offsets = [0, 32], sizes = [8, 32], strides = [1, 1]} : vector<8x96xf32> to vector<8x32xf32>
    %364 = vector.extract_strided_slice %354 {offsets = [0, 32], sizes = [8, 32], strides = [1, 1]} : vector<8x96xf32> to vector<8x32xf32>
    %365 = arith.addf %363, %364 : vector<8x32xf32>
    %366 = arith.negf %365 : vector<8x32xf32>
    %367 = math.exp %366 : vector<8x32xf32>
    %cst_107 = arith.constant 1.000000e+00 : f32
    %368 = vector.broadcast %cst_107 : f32 to vector<8x32xf32>
    %369 = arith.addf %368, %367 : vector<8x32xf32>
    %370 = arith.divf %368, %369 : vector<8x32xf32>
    %371 = vector.extract_strided_slice %351 {offsets = [0, 64], sizes = [8, 32], strides = [1, 1]} : vector<8x96xf32> to vector<8x32xf32>
    %372 = vector.extract_strided_slice %354 {offsets = [0, 64], sizes = [8, 32], strides = [1, 1]} : vector<8x96xf32> to vector<8x32xf32>
    %373 = arith.mulf %362, %372 : vector<8x32xf32>
    %374 = arith.addf %371, %373 : vector<8x32xf32>
    %375 = math.tanh %374 : vector<8x32xf32>
    %cst_108 = arith.constant 1.000000e+00 : f32
    %376 = vector.broadcast %cst_108 : f32 to vector<8x32xf32>
    %377 = arith.subf %376, %370 : vector<8x32xf32>
    %378 = arith.mulf %377, %375 : vector<8x32xf32>
    %379 = arith.mulf %370, %238 : vector<8x32xf32>
    %380 = arith.addf %378, %379 : vector<8x32xf32>
    %cst_109 = arith.constant dense<0.000000e+00> : vector<8xf32>
    %381 = vector.multi_reduction <add>, %380, %cst_109 [1] : vector<8x32xf32> to vector<8xf32>
    %382 = vector.shape_cast %381 : vector<8xf32> to vector<8x1xf32>
    %cst_110 = arith.constant 3.200000e+01 : f32
    %383 = vector.broadcast %cst_110 : f32 to vector<8x1xf32>
    %384 = arith.divf %382, %383 : vector<8x1xf32>
    %385 = vector.broadcast %384 : vector<8x1xf32> to vector<8x32xf32>
    %386 = arith.subf %380, %385 : vector<8x32xf32>
    %387 = arith.mulf %386, %386 : vector<8x32xf32>
    %cst_111 = arith.constant dense<0.000000e+00> : vector<8xf32>
    %388 = vector.multi_reduction <add>, %387, %cst_111 [1] : vector<8x32xf32> to vector<8xf32>
    %389 = vector.shape_cast %388 : vector<8xf32> to vector<8x1xf32>
    %cst_112 = arith.constant 3.200000e+01 : f32
    %390 = vector.broadcast %cst_112 : f32 to vector<8x1xf32>
    %391 = arith.divf %389, %390 : vector<8x1xf32>
    %392 = vector.broadcast %384 : vector<8x1xf32> to vector<8x32xf32>
    %393 = arith.subf %380, %392 : vector<8x32xf32>
    %cst_113 = arith.constant 9.99999974E-6 : f32
    %394 = vector.broadcast %cst_113 : f32 to vector<8x1xf32>
    %395 = arith.addf %391, %394 : vector<8x1xf32>
    %396 = math.rsqrt %395 : vector<8x1xf32>
    %397 = vector.broadcast %396 : vector<8x1xf32> to vector<8x32xf32>
    %398 = arith.mulf %393, %397 : vector<8x32xf32>
    %399 = vector.broadcast %14 : vector<1x32xf32> to vector<8x32xf32>
    %400 = arith.mulf %398, %399 : vector<8x32xf32>
    %401 = vector.broadcast %15 : vector<1x32xf32> to vector<8x32xf32>
    %402 = arith.addf %400, %401 : vector<8x32xf32>
    %403 = arith.truncf %402 : vector<8x32xf32> to vector<8x32xbf16>
    %cst_114 = arith.constant dense<0.000000e+00> : vector<8x128xf32>
    %404 = tpu.matmul %403, %24, %cst_114 {dimension_numbers = #tpu.dot_dimension_numbers<[1], [0], [0], [1], [0, 0, 1, 1], [], []>} : vector<8x32xbf16>, vector<32x128xbf16>, vector<8x128xf32> -> vector<8x128xf32>
    %405 = vector.broadcast %20 : vector<1x128xf32> to vector<8x128xf32>
    %406 = arith.addf %404, %405 : vector<8x128xf32>
    %cst_115 = arith.constant 0.000000e+00 : f32
    %407 = vector.broadcast %cst_115 : f32 to vector<8x128xf32>
    %408 = arith.maximumf %406, %407 : vector<8x128xf32>
    %409 = arith.truncf %408 : vector<8x128xf32> to vector<8x128xbf16>
    %cst_116 = arith.constant dense<0.000000e+00> : vector<8x32xf32>
    %410 = tpu.matmul %409, %25, %cst_116 {dimension_numbers = #tpu.dot_dimension_numbers<[1], [1], [0], [0], [0, 0, 1, 0], [], []>} : vector<8x128xbf16>, vector<32x128xbf16>, vector<8x32xf32> -> vector<8x32xf32>
    %411 = arith.addf %380, %410 : vector<8x32xf32>
    %412 = vector.broadcast %21 : vector<1x32xf32> to vector<8x32xf32>
    %413 = arith.addf %411, %412 : vector<8x32xf32>
    %cst_117 = arith.constant dense<0.000000e+00> : vector<8xf32>
    %414 = vector.multi_reduction <add>, %413, %cst_117 [1] : vector<8x32xf32> to vector<8xf32>
    %415 = vector.shape_cast %414 : vector<8xf32> to vector<8x1xf32>
    %cst_118 = arith.constant 3.200000e+01 : f32
    %416 = vector.broadcast %cst_118 : f32 to vector<8x1xf32>
    %417 = arith.divf %415, %416 : vector<8x1xf32>
    %418 = vector.broadcast %417 : vector<8x1xf32> to vector<8x32xf32>
    %419 = arith.subf %413, %418 : vector<8x32xf32>
    %420 = arith.mulf %419, %419 : vector<8x32xf32>
    %cst_119 = arith.constant dense<0.000000e+00> : vector<8xf32>
    %421 = vector.multi_reduction <add>, %420, %cst_119 [1] : vector<8x32xf32> to vector<8xf32>
    %422 = vector.shape_cast %421 : vector<8xf32> to vector<8x1xf32>
    %cst_120 = arith.constant 3.200000e+01 : f32
    %423 = vector.broadcast %cst_120 : f32 to vector<8x1xf32>
    %424 = arith.divf %422, %423 : vector<8x1xf32>
    %425 = vector.broadcast %417 : vector<8x1xf32> to vector<8x32xf32>
    %426 = arith.subf %413, %425 : vector<8x32xf32>
    %cst_121 = arith.constant 9.99999974E-6 : f32
    %427 = vector.broadcast %cst_121 : f32 to vector<8x1xf32>
    %428 = arith.addf %424, %427 : vector<8x1xf32>
    %429 = math.rsqrt %428 : vector<8x1xf32>
    %430 = vector.broadcast %429 : vector<8x1xf32> to vector<8x32xf32>
    %431 = arith.mulf %426, %430 : vector<8x32xf32>
    %432 = vector.broadcast %12 : vector<1x32xf32> to vector<8x32xf32>
    %433 = arith.mulf %431, %432 : vector<8x32xf32>
    %434 = vector.broadcast %13 : vector<1x32xf32> to vector<8x32xf32>
    %435 = arith.addf %433, %434 : vector<8x32xf32>
    %436 = arith.truncf %435 : vector<8x32xf32> to vector<8x32xbf16>
    %cst_122 = arith.constant dense<0.000000e+00> : vector<8x64xf32>
    %437 = tpu.matmul %436, %26, %cst_122 {dimension_numbers = #tpu.dot_dimension_numbers<[1], [0], [0], [1], [0, 0, 1, 1], [], []>} : vector<8x32xbf16>, vector<32x64xbf16>, vector<8x64xf32> -> vector<8x64xf32>
    %438 = vector.broadcast %16 : vector<1x64xf32> to vector<8x64xf32>
    %439 = arith.addf %437, %438 : vector<8x64xf32>
    %440 = vector.extract_strided_slice %439 {offsets = [0, 0], sizes = [4, 64], strides = [1, 1]} : vector<8x64xf32> to vector<4x64xf32>
    %441 = vector.extract_strided_slice %440 {offsets = [0, 0], sizes = [4, 32], strides = [1, 1]} : vector<4x64xf32> to vector<4x32xf32>
    %cst_123 = arith.constant dense<0.000000e+00> : vector<4x16xf32>
    %442 = tpu.matmul %441, %56, %cst_123 {dimension_numbers = #tpu.dot_dimension_numbers<[1], [1], [0], [0], [0, 0, 1, 0], [], []>} : vector<4x32xf32>, vector<16x32xf32>, vector<4x16xf32> -> vector<4x16xf32>
    %cst_124 = arith.constant dense<0xFF800000> : vector<16xf32>
    %443 = vector.multi_reduction <maximumf>, %442, %cst_124 [0] : vector<4x16xf32> to vector<16xf32>
    %444 = vector.shape_cast %443 : vector<16xf32> to vector<1x16xf32>
    %445 = vector.broadcast %444 : vector<1x16xf32> to vector<4x16xf32>
    %446 = arith.subf %442, %445 : vector<4x16xf32>
    %447 = math.exp %446 : vector<4x16xf32>
    %cst_125 = arith.constant dense<0.000000e+00> : vector<16xf32>
    %448 = vector.multi_reduction <add>, %447, %cst_125 [0] : vector<4x16xf32> to vector<16xf32>
    %449 = vector.shape_cast %448 : vector<16xf32> to vector<1x16xf32>
    %450 = vector.broadcast %449 : vector<1x16xf32> to vector<4x16xf32>
    %451 = arith.divf %447, %450 : vector<4x16xf32>
    %cst_126 = arith.constant 9.99999993E-9 : f32
    %452 = vector.broadcast %cst_126 : f32 to vector<4x16xf32>
    %453 = arith.addf %451, %452 : vector<4x16xf32>
    %cst_127 = arith.constant dense<0.000000e+00> : vector<4xf32>
    %454 = vector.multi_reduction <add>, %453, %cst_127 [1] : vector<4x16xf32> to vector<4xf32>
    %455 = vector.shape_cast %454 : vector<4xf32> to vector<4x1xf32>
    %456 = tpu.reciprocal %455 {approx = true} : vector<4x1xf32> -> vector<4x1xf32>
    %457 = vector.broadcast %456 : vector<4x1xf32> to vector<4x16xf32>
    %458 = arith.mulf %453, %457 : vector<4x16xf32>
    %cst_128 = arith.constant dense<0.000000e+00> : vector<4x32xf32>
    %459 = tpu.matmul %458, %60, %cst_128 {dimension_numbers = #tpu.dot_dimension_numbers<[1], [0], [0], [1], [0, 0, 1, 1], [], []>} : vector<4x16xf32>, vector<16x32xf32>, vector<4x32xf32> -> vector<4x32xf32>
    %460 = vector.extract_strided_slice %440 {offsets = [0, 32], sizes = [4, 32], strides = [1, 1]} : vector<4x64xf32> to vector<4x32xf32>
    %cst_129 = arith.constant dense<0.000000e+00> : vector<4x16xf32>
    %461 = tpu.matmul %460, %57, %cst_129 {dimension_numbers = #tpu.dot_dimension_numbers<[1], [1], [0], [0], [0, 0, 1, 0], [], []>} : vector<4x32xf32>, vector<16x32xf32>, vector<4x16xf32> -> vector<4x16xf32>
    %cst_130 = arith.constant dense<0xFF800000> : vector<16xf32>
    %462 = vector.multi_reduction <maximumf>, %461, %cst_130 [0] : vector<4x16xf32> to vector<16xf32>
    %463 = vector.shape_cast %462 : vector<16xf32> to vector<1x16xf32>
    %464 = vector.broadcast %463 : vector<1x16xf32> to vector<4x16xf32>
    %465 = arith.subf %461, %464 : vector<4x16xf32>
    %466 = math.exp %465 : vector<4x16xf32>
    %cst_131 = arith.constant dense<0.000000e+00> : vector<16xf32>
    %467 = vector.multi_reduction <add>, %466, %cst_131 [0] : vector<4x16xf32> to vector<16xf32>
    %468 = vector.shape_cast %467 : vector<16xf32> to vector<1x16xf32>
    %469 = vector.broadcast %468 : vector<1x16xf32> to vector<4x16xf32>
    %470 = arith.divf %466, %469 : vector<4x16xf32>
    %cst_132 = arith.constant 9.99999993E-9 : f32
    %471 = vector.broadcast %cst_132 : f32 to vector<4x16xf32>
    %472 = arith.addf %470, %471 : vector<4x16xf32>
    %cst_133 = arith.constant dense<0.000000e+00> : vector<4xf32>
    %473 = vector.multi_reduction <add>, %472, %cst_133 [1] : vector<4x16xf32> to vector<4xf32>
    %474 = vector.shape_cast %473 : vector<4xf32> to vector<4x1xf32>
    %475 = tpu.reciprocal %474 {approx = true} : vector<4x1xf32> -> vector<4x1xf32>
    %476 = vector.broadcast %475 : vector<4x1xf32> to vector<4x16xf32>
    %477 = arith.mulf %472, %476 : vector<4x16xf32>
    %cst_134 = arith.constant dense<0.000000e+00> : vector<4x32xf32>
    %478 = tpu.matmul %477, %61, %cst_134 {dimension_numbers = #tpu.dot_dimension_numbers<[1], [0], [0], [1], [0, 0, 1, 1], [], []>} : vector<4x16xf32>, vector<16x32xf32>, vector<4x32xf32> -> vector<4x32xf32>
    %479 = tpu.concatenate %459, %478 in 1 : vector<4x32xf32>, vector<4x32xf32> -> vector<4x64xf32>
    %480 = vector.extract_strided_slice %439 {offsets = [4, 0], sizes = [4, 64], strides = [1, 1]} : vector<8x64xf32> to vector<4x64xf32>
    %481 = vector.extract_strided_slice %480 {offsets = [0, 0], sizes = [4, 32], strides = [1, 1]} : vector<4x64xf32> to vector<4x32xf32>
    %cst_135 = arith.constant dense<0.000000e+00> : vector<4x16xf32>
    %482 = tpu.matmul %481, %58, %cst_135 {dimension_numbers = #tpu.dot_dimension_numbers<[1], [1], [0], [0], [0, 0, 1, 0], [], []>} : vector<4x32xf32>, vector<16x32xf32>, vector<4x16xf32> -> vector<4x16xf32>
    %cst_136 = arith.constant dense<0xFF800000> : vector<16xf32>
    %483 = vector.multi_reduction <maximumf>, %482, %cst_136 [0] : vector<4x16xf32> to vector<16xf32>
    %484 = vector.shape_cast %483 : vector<16xf32> to vector<1x16xf32>
    %485 = vector.broadcast %484 : vector<1x16xf32> to vector<4x16xf32>
    %486 = arith.subf %482, %485 : vector<4x16xf32>
    %487 = math.exp %486 : vector<4x16xf32>
    %cst_137 = arith.constant dense<0.000000e+00> : vector<16xf32>
    %488 = vector.multi_reduction <add>, %487, %cst_137 [0] : vector<4x16xf32> to vector<16xf32>
    %489 = vector.shape_cast %488 : vector<16xf32> to vector<1x16xf32>
    %490 = vector.broadcast %489 : vector<1x16xf32> to vector<4x16xf32>
    %491 = arith.divf %487, %490 : vector<4x16xf32>
    %cst_138 = arith.constant 9.99999993E-9 : f32
    %492 = vector.broadcast %cst_138 : f32 to vector<4x16xf32>
    %493 = arith.addf %491, %492 : vector<4x16xf32>
    %cst_139 = arith.constant dense<0.000000e+00> : vector<4xf32>
    %494 = vector.multi_reduction <add>, %493, %cst_139 [1] : vector<4x16xf32> to vector<4xf32>
    %495 = vector.shape_cast %494 : vector<4xf32> to vector<4x1xf32>
    %496 = tpu.reciprocal %495 {approx = true} : vector<4x1xf32> -> vector<4x1xf32>
    %497 = vector.broadcast %496 : vector<4x1xf32> to vector<4x16xf32>
    %498 = arith.mulf %493, %497 : vector<4x16xf32>
    %cst_140 = arith.constant dense<0.000000e+00> : vector<4x32xf32>
    %499 = tpu.matmul %498, %62, %cst_140 {dimension_numbers = #tpu.dot_dimension_numbers<[1], [0], [0], [1], [0, 0, 1, 1], [], []>} : vector<4x16xf32>, vector<16x32xf32>, vector<4x32xf32> -> vector<4x32xf32>
    %500 = vector.extract_strided_slice %480 {offsets = [0, 32], sizes = [4, 32], strides = [1, 1]} : vector<4x64xf32> to vector<4x32xf32>
    %cst_141 = arith.constant dense<0.000000e+00> : vector<4x16xf32>
    %501 = tpu.matmul %500, %59, %cst_141 {dimension_numbers = #tpu.dot_dimension_numbers<[1], [1], [0], [0], [0, 0, 1, 0], [], []>} : vector<4x32xf32>, vector<16x32xf32>, vector<4x16xf32> -> vector<4x16xf32>
    %cst_142 = arith.constant dense<0xFF800000> : vector<16xf32>
    %502 = vector.multi_reduction <maximumf>, %501, %cst_142 [0] : vector<4x16xf32> to vector<16xf32>
    %503 = vector.shape_cast %502 : vector<16xf32> to vector<1x16xf32>
    %504 = vector.broadcast %503 : vector<1x16xf32> to vector<4x16xf32>
    %505 = arith.subf %501, %504 : vector<4x16xf32>
    %506 = math.exp %505 : vector<4x16xf32>
    %cst_143 = arith.constant dense<0.000000e+00> : vector<16xf32>
    %507 = vector.multi_reduction <add>, %506, %cst_143 [0] : vector<4x16xf32> to vector<16xf32>
    %508 = vector.shape_cast %507 : vector<16xf32> to vector<1x16xf32>
    %509 = vector.broadcast %508 : vector<1x16xf32> to vector<4x16xf32>
    %510 = arith.divf %506, %509 : vector<4x16xf32>
    %cst_144 = arith.constant 9.99999993E-9 : f32
    %511 = vector.broadcast %cst_144 : f32 to vector<4x16xf32>
    %512 = arith.addf %510, %511 : vector<4x16xf32>
    %cst_145 = arith.constant dense<0.000000e+00> : vector<4xf32>
    %513 = vector.multi_reduction <add>, %512, %cst_145 [1] : vector<4x16xf32> to vector<4xf32>
    %514 = vector.shape_cast %513 : vector<4xf32> to vector<4x1xf32>
    %515 = tpu.reciprocal %514 {approx = true} : vector<4x1xf32> -> vector<4x1xf32>
    %516 = vector.broadcast %515 : vector<4x1xf32> to vector<4x16xf32>
    %517 = arith.mulf %512, %516 : vector<4x16xf32>
    %cst_146 = arith.constant dense<0.000000e+00> : vector<4x32xf32>
    %518 = tpu.matmul %517, %63, %cst_146 {dimension_numbers = #tpu.dot_dimension_numbers<[1], [0], [0], [1], [0, 0, 1, 1], [], []>} : vector<4x16xf32>, vector<16x32xf32>, vector<4x32xf32> -> vector<4x32xf32>
    %519 = tpu.concatenate %499, %518 in 1 : vector<4x32xf32>, vector<4x32xf32> -> vector<4x64xf32>
    %520 = tpu.concatenate %479, %519 in 0 : vector<4x64xf32>, vector<4x64xf32> -> vector<8x64xf32>
    %521 = tpu.concatenate %520, %413 in 1 : vector<8x64xf32>, vector<8x32xf32> -> vector<8x96xf32>
    %522 = arith.truncf %521 : vector<8x96xf32> to vector<8x96xbf16>
    %cst_147 = arith.constant dense<0.000000e+00> : vector<8x192xf32>
    %523 = tpu.matmul %522, %27, %cst_147 {dimension_numbers = #tpu.dot_dimension_numbers<[1], [0], [0], [1], [0, 0, 1, 1], [], []>} : vector<8x96xbf16>, vector<96x192xbf16>, vector<8x192xf32> -> vector<8x192xf32>
    %524 = vector.extract_strided_slice %523 {offsets = [0, 0], sizes = [8, 96], strides = [1, 1]} : vector<8x192xf32> to vector<8x96xf32>
    %525 = vector.broadcast %18 : vector<1x96xf32> to vector<8x96xf32>
    %526 = arith.addf %524, %525 : vector<8x96xf32>
    %527 = vector.extract_strided_slice %523 {offsets = [0, 96], sizes = [8, 96], strides = [1, 1]} : vector<8x192xf32> to vector<8x96xf32>
    %528 = vector.broadcast %19 : vector<1x96xf32> to vector<8x96xf32>
    %529 = arith.addf %527, %528 : vector<8x96xf32>
    %530 = vector.extract_strided_slice %526 {offsets = [0, 0], sizes = [8, 32], strides = [1, 1]} : vector<8x96xf32> to vector<8x32xf32>
    %531 = vector.extract_strided_slice %529 {offsets = [0, 0], sizes = [8, 32], strides = [1, 1]} : vector<8x96xf32> to vector<8x32xf32>
    %532 = arith.addf %530, %531 : vector<8x32xf32>
    %533 = arith.negf %532 : vector<8x32xf32>
    %534 = math.exp %533 : vector<8x32xf32>
    %cst_148 = arith.constant 1.000000e+00 : f32
    %535 = vector.broadcast %cst_148 : f32 to vector<8x32xf32>
    %536 = arith.addf %535, %534 : vector<8x32xf32>
    %537 = arith.divf %535, %536 : vector<8x32xf32>
    %538 = vector.extract_strided_slice %526 {offsets = [0, 32], sizes = [8, 32], strides = [1, 1]} : vector<8x96xf32> to vector<8x32xf32>
    %539 = vector.extract_strided_slice %529 {offsets = [0, 32], sizes = [8, 32], strides = [1, 1]} : vector<8x96xf32> to vector<8x32xf32>
    %540 = arith.addf %538, %539 : vector<8x32xf32>
    %541 = arith.negf %540 : vector<8x32xf32>
    %542 = math.exp %541 : vector<8x32xf32>
    %cst_149 = arith.constant 1.000000e+00 : f32
    %543 = vector.broadcast %cst_149 : f32 to vector<8x32xf32>
    %544 = arith.addf %543, %542 : vector<8x32xf32>
    %545 = arith.divf %543, %544 : vector<8x32xf32>
    %546 = vector.extract_strided_slice %526 {offsets = [0, 64], sizes = [8, 32], strides = [1, 1]} : vector<8x96xf32> to vector<8x32xf32>
    %547 = vector.extract_strided_slice %529 {offsets = [0, 64], sizes = [8, 32], strides = [1, 1]} : vector<8x96xf32> to vector<8x32xf32>
    %548 = arith.mulf %537, %547 : vector<8x32xf32>
    %549 = arith.addf %546, %548 : vector<8x32xf32>
    %550 = math.tanh %549 : vector<8x32xf32>
    %cst_150 = arith.constant 1.000000e+00 : f32
    %551 = vector.broadcast %cst_150 : f32 to vector<8x32xf32>
    %552 = arith.subf %551, %545 : vector<8x32xf32>
    %553 = arith.mulf %552, %550 : vector<8x32xf32>
    %554 = arith.mulf %545, %413 : vector<8x32xf32>
    %555 = arith.addf %553, %554 : vector<8x32xf32>
    %cst_151 = arith.constant dense<0.000000e+00> : vector<8xf32>
    %556 = vector.multi_reduction <add>, %555, %cst_151 [1] : vector<8x32xf32> to vector<8xf32>
    %557 = vector.shape_cast %556 : vector<8xf32> to vector<8x1xf32>
    %cst_152 = arith.constant 3.200000e+01 : f32
    %558 = vector.broadcast %cst_152 : f32 to vector<8x1xf32>
    %559 = arith.divf %557, %558 : vector<8x1xf32>
    %560 = vector.broadcast %559 : vector<8x1xf32> to vector<8x32xf32>
    %561 = arith.subf %555, %560 : vector<8x32xf32>
    %562 = arith.mulf %561, %561 : vector<8x32xf32>
    %cst_153 = arith.constant dense<0.000000e+00> : vector<8xf32>
    %563 = vector.multi_reduction <add>, %562, %cst_153 [1] : vector<8x32xf32> to vector<8xf32>
    %564 = vector.shape_cast %563 : vector<8xf32> to vector<8x1xf32>
    %cst_154 = arith.constant 3.200000e+01 : f32
    %565 = vector.broadcast %cst_154 : f32 to vector<8x1xf32>
    %566 = arith.divf %564, %565 : vector<8x1xf32>
    %567 = vector.broadcast %559 : vector<8x1xf32> to vector<8x32xf32>
    %568 = arith.subf %555, %567 : vector<8x32xf32>
    %cst_155 = arith.constant 9.99999974E-6 : f32
    %569 = vector.broadcast %cst_155 : f32 to vector<8x1xf32>
    %570 = arith.addf %566, %569 : vector<8x1xf32>
    %571 = math.rsqrt %570 : vector<8x1xf32>
    %572 = vector.broadcast %571 : vector<8x1xf32> to vector<8x32xf32>
    %573 = arith.mulf %568, %572 : vector<8x32xf32>
    %574 = vector.broadcast %14 : vector<1x32xf32> to vector<8x32xf32>
    %575 = arith.mulf %573, %574 : vector<8x32xf32>
    %576 = vector.broadcast %15 : vector<1x32xf32> to vector<8x32xf32>
    %577 = arith.addf %575, %576 : vector<8x32xf32>
    %578 = arith.truncf %577 : vector<8x32xf32> to vector<8x32xbf16>
    %cst_156 = arith.constant dense<0.000000e+00> : vector<8x128xf32>
    %579 = tpu.matmul %578, %24, %cst_156 {dimension_numbers = #tpu.dot_dimension_numbers<[1], [0], [0], [1], [0, 0, 1, 1], [], []>} : vector<8x32xbf16>, vector<32x128xbf16>, vector<8x128xf32> -> vector<8x128xf32>
    %580 = vector.broadcast %20 : vector<1x128xf32> to vector<8x128xf32>
    %581 = arith.addf %579, %580 : vector<8x128xf32>
    %cst_157 = arith.constant 0.000000e+00 : f32
    %582 = vector.broadcast %cst_157 : f32 to vector<8x128xf32>
    %583 = arith.maximumf %581, %582 : vector<8x128xf32>
    %584 = arith.truncf %583 : vector<8x128xf32> to vector<8x128xbf16>
    %cst_158 = arith.constant dense<0.000000e+00> : vector<8x32xf32>
    %585 = tpu.matmul %584, %25, %cst_158 {dimension_numbers = #tpu.dot_dimension_numbers<[1], [1], [0], [0], [0, 0, 1, 0], [], []>} : vector<8x128xbf16>, vector<32x128xbf16>, vector<8x32xf32> -> vector<8x32xf32>
    %586 = arith.addf %555, %585 : vector<8x32xf32>
    %587 = vector.broadcast %21 : vector<1x32xf32> to vector<8x32xf32>
    %588 = arith.addf %586, %587 : vector<8x32xf32>
    %589 = vector.extract_strided_slice %588 {offsets = [0, 0], sizes = [1, 32], strides = [1, 1]} : vector<8x32xf32> to vector<1x32xf32>
    %590 = vector.extract_strided_slice %588 {offsets = [1, 0], sizes = [1, 32], strides = [1, 1]} : vector<8x32xf32> to vector<1x32xf32>
    %591 = vector.extract_strided_slice %588 {offsets = [2, 0], sizes = [1, 32], strides = [1, 1]} : vector<8x32xf32> to vector<1x32xf32>
    %592 = vector.extract_strided_slice %588 {offsets = [3, 0], sizes = [1, 32], strides = [1, 1]} : vector<8x32xf32> to vector<1x32xf32>
    %593 = tpu.concatenate %589, %590, %591, %592 in 1 : vector<1x32xf32>, vector<1x32xf32>, vector<1x32xf32>, vector<1x32xf32> -> vector<1x128xf32>
    %594 = vector.extract_strided_slice %588 {offsets = [4, 0], sizes = [1, 32], strides = [1, 1]} : vector<8x32xf32> to vector<1x32xf32>
    %595 = vector.extract_strided_slice %588 {offsets = [5, 0], sizes = [1, 32], strides = [1, 1]} : vector<8x32xf32> to vector<1x32xf32>
    %596 = vector.extract_strided_slice %588 {offsets = [6, 0], sizes = [1, 32], strides = [1, 1]} : vector<8x32xf32> to vector<1x32xf32>
    %597 = vector.extract_strided_slice %588 {offsets = [7, 0], sizes = [1, 32], strides = [1, 1]} : vector<8x32xf32> to vector<1x32xf32>
    %598 = tpu.concatenate %594, %595, %596, %597 in 1 : vector<1x32xf32>, vector<1x32xf32>, vector<1x32xf32>, vector<1x32xf32> -> vector<1x128xf32>
    %599 = tpu.concatenate %593, %598 in 0 : vector<1x128xf32>, vector<1x128xf32> -> vector<2x128xf32>
    %c0_159 = arith.constant 0 : index
    %c0_160 = arith.constant 0 : index
    %c0_161 = arith.constant 0 : index
    %600 = vector.load %arg6[%c0_159, %c0_160, %c0_161] : memref<1x2x128xf32, #tpu.memory_space<vmem>>, vector<1x2x128xf32>
    %601 = vector.shape_cast %600 : vector<1x2x128xf32> to vector<2x128xf32>
    %602 = vector.shape_cast %599 : vector<2x128xf32> to vector<1x2x128xf32>
    tpu.vector_store %arg6[%c0_159, %c0_160, %c0_161], %602 {strides = array<i32>} : memref<1x2x128xf32, #tpu.memory_space<vmem>>, vector<1x2x128xf32>,
    %603 = vector.extract_strided_slice %458 {offsets = [0, 0], sizes = [1, 16], strides = [1, 1]} : vector<4x16xf32> to vector<1x16xf32>
    %604 = vector.extract_strided_slice %458 {offsets = [1, 0], sizes = [1, 16], strides = [1, 1]} : vector<4x16xf32> to vector<1x16xf32>
    %605 = vector.extract_strided_slice %458 {offsets = [2, 0], sizes = [1, 16], strides = [1, 1]} : vector<4x16xf32> to vector<1x16xf32>
    %606 = vector.extract_strided_slice %458 {offsets = [3, 0], sizes = [1, 16], strides = [1, 1]} : vector<4x16xf32> to vector<1x16xf32>
    %607 = vector.extract_strided_slice %477 {offsets = [0, 0], sizes = [1, 16], strides = [1, 1]} : vector<4x16xf32> to vector<1x16xf32>
    %608 = vector.extract_strided_slice %477 {offsets = [1, 0], sizes = [1, 16], strides = [1, 1]} : vector<4x16xf32> to vector<1x16xf32>
    %609 = vector.extract_strided_slice %477 {offsets = [2, 0], sizes = [1, 16], strides = [1, 1]} : vector<4x16xf32> to vector<1x16xf32>
    %610 = vector.extract_strided_slice %477 {offsets = [3, 0], sizes = [1, 16], strides = [1, 1]} : vector<4x16xf32> to vector<1x16xf32>
    %611 = tpu.concatenate %603, %604, %605, %606, %607, %608, %609, %610 in 1 : vector<1x16xf32>, vector<1x16xf32>, vector<1x16xf32>, vector<1x16xf32>, vector<1x16xf32>, vector<1x16xf32>, vector<1x16xf32>, vector<1x16xf32> -> vector<1x128xf32>
    %612 = vector.extract_strided_slice %498 {offsets = [0, 0], sizes = [1, 16], strides = [1, 1]} : vector<4x16xf32> to vector<1x16xf32>
    %613 = vector.extract_strided_slice %498 {offsets = [1, 0], sizes = [1, 16], strides = [1, 1]} : vector<4x16xf32> to vector<1x16xf32>
    %614 = vector.extract_strided_slice %498 {offsets = [2, 0], sizes = [1, 16], strides = [1, 1]} : vector<4x16xf32> to vector<1x16xf32>
    %615 = vector.extract_strided_slice %498 {offsets = [3, 0], sizes = [1, 16], strides = [1, 1]} : vector<4x16xf32> to vector<1x16xf32>
    %616 = vector.extract_strided_slice %517 {offsets = [0, 0], sizes = [1, 16], strides = [1, 1]} : vector<4x16xf32> to vector<1x16xf32>
    %617 = vector.extract_strided_slice %517 {offsets = [1, 0], sizes = [1, 16], strides = [1, 1]} : vector<4x16xf32> to vector<1x16xf32>
    %618 = vector.extract_strided_slice %517 {offsets = [2, 0], sizes = [1, 16], strides = [1, 1]} : vector<4x16xf32> to vector<1x16xf32>
    %619 = vector.extract_strided_slice %517 {offsets = [3, 0], sizes = [1, 16], strides = [1, 1]} : vector<4x16xf32> to vector<1x16xf32>
    %620 = tpu.concatenate %612, %613, %614, %615, %616, %617, %618, %619 in 1 : vector<1x16xf32>, vector<1x16xf32>, vector<1x16xf32>, vector<1x16xf32>, vector<1x16xf32>, vector<1x16xf32>, vector<1x16xf32>, vector<1x16xf32> -> vector<1x128xf32>
    %621 = tpu.concatenate %611, %620 in 0 : vector<1x128xf32>, vector<1x128xf32> -> vector<2x128xf32>
    %c0_162 = arith.constant 0 : index
    %c0_163 = arith.constant 0 : index
    %c0_164 = arith.constant 0 : index
    %622 = vector.load %arg7[%c0_162, %c0_163, %c0_164] : memref<1x2x128xf32, #tpu.memory_space<vmem>>, vector<1x2x128xf32>
    %623 = vector.shape_cast %622 : vector<1x2x128xf32> to vector<2x128xf32>
    %624 = vector.shape_cast %621 : vector<2x128xf32> to vector<1x2x128xf32>
    tpu.vector_store %arg7[%c0_162, %c0_163, %c0_164], %624 {strides = array<i32>} : memref<1x2x128xf32, #tpu.memory_space<vmem>>, vector<1x2x128xf32>,
    return
  }
  func.func @transform_0(%arg0: i32) -> (i32, i32, i32) {
    %c0_i32 = arith.constant 0 : i32
    %c0_i32_0 = arith.constant 0 : i32
    %c0_i32_1 = arith.constant 0 : i32
    return %arg0, %c0_i32, %c0_i32_0 : i32, i32, i32
  }
  func.func @transform_1(%arg0: i32) -> (i32, i32, i32) {
    %c0_i32 = arith.constant 0 : i32
    %c0_i32_0 = arith.constant 0 : i32
    %c0_i32_1 = arith.constant 0 : i32
    return %arg0, %c0_i32, %c0_i32_0 : i32, i32, i32
  }
  func.func @transform_2(%arg0: i32) -> (i32, i32) {
    %c0_i32 = arith.constant 0 : i32
    %c0_i32_0 = arith.constant 0 : i32
    %c0_i32_1 = arith.constant 0 : i32
    return %c0_i32, %c0_i32_0 : i32, i32
  }
  func.func @transform_3(%arg0: i32) -> (i32, i32) {
    %c0_i32 = arith.constant 0 : i32
    %c0_i32_0 = arith.constant 0 : i32
    %c0_i32_1 = arith.constant 0 : i32
    return %c0_i32, %c0_i32_0 : i32, i32
  }
  func.func @transform_4(%arg0: i32) -> (i32, i32) {
    %c0_i32 = arith.constant 0 : i32
    %c0_i32_0 = arith.constant 0 : i32
    %c0_i32_1 = arith.constant 0 : i32
    return %c0_i32, %c0_i32_0 : i32, i32
  }
  func.func @transform_5(%arg0: i32) -> (i32, i32, i32) {
    %c0_i32 = arith.constant 0 : i32
    %c0_i32_0 = arith.constant 0 : i32
    %c0_i32_1 = arith.constant 0 : i32
    return %arg0, %c0_i32, %c0_i32_0 : i32, i32, i32
  }
  func.func @transform_6(%arg0: i32) -> (i32, i32, i32) {
    %c0_i32 = arith.constant 0 : i32
    %c0_i32_0 = arith.constant 0 : i32
    %c0_i32_1 = arith.constant 0 : i32
    return %arg0, %c0_i32, %c0_i32_0 : i32, i32, i32
  }
}

</mosaic_0001>

<bundles_post_ra>
// kernel: tpu_custom_call.1
= control target key start
LH: loop header
LB: loop body
LE: loop exit
PB: predicated region body
PF: predicated region fallthrough
CT: control target
= control target key end

     0   :  { %12 = vsyncpa [#allocation3], 0  ;;  %s5217_s0 = inlined_call_operand.hbm [shape: f32[2,16,32], index: 0, kind: input, shape index: {}]   ;;  %s5218_s1 = inlined_call_operand.hbm [shape: f32[2,4,32], index: 1, kind: input, shape index: {}]   ;;  %s5219_s2 = inlined_call_operand.hbm [shape: f32[12,128], index: 2, kind: input, shape index: {}]   ;;  %s5220_s3 = inlined_call_operand.hbm [shape: bf16[32,448], index: 3, kind: input, shape index: {}]   ;;  %s5221_s4 = inlined_call_operand.hbm [shape: bf16[96,192], index: 4, kind: input, shape index: {}]   ;;  %s5222_s5 = inlined_call_operand.hbm [shape: f32[1,2,128], index: 5, kind: output, shape index: {0}]   ;;  %s5223_s6 = inlined_call_operand.hbm [shape: f32[1,2,128], index: 6, kind: output, shape index: {1}]  }
   0x1   :  { %13 = vsyncpa [#allocation6], 0 }
   0x2   :  { %14 = vsyncpa [#allocation9], 0 }
   0x3   :  { %15 = vsyncpa [#allocation4], 0 }
   0x4   :  { %16 = vsyncpa [#allocation13], 0  ;;  %s4469_s21 = smov [#allocation5]   ;;  %s4305_s25 = scalar_lea.hbm %s5218_s1, 128 }
   0x5   :  { %s34_s22 = sshll.u32 %s4469_s21, 4  ;;  %p4306_p0 = scmp.ne.s32.totalorder %s5218_s1, %s4305_s25  ;;  %s35_s22 = int_to_ptr.vmem [resolvable:$true] %s34_s22 }
   0x6   :  { %p4309_p1 = scmp.lt.u32.totalorder %s4305_s25, %s5218_s1 }
   0x8   :  { %p4311_p2 = pnand %p4309_p1, %p4306_p0 }
   0xa   :  { %4314 = shalt.err (!%p4311_p2)
}
   0xb   :  { %s4315_s30 = scalar_lea.vmem %s35_s22, 128  ;;  %p4320_p4 = scmp.lt.s32.totalorder %s35_s22, %s35_s22 }
   0xc   :  { %p4316_p3 = scmp.ne.s32.totalorder %s35_s22, %s4315_s30  ;;  %p4321_p5 = scmp.lt.s32.totalorder %s4315_s30, %s4315_s30 }
   0xe   :  { %p4322_p6 = por %p4321_p5, %p4320_p4 }
  0x10   :  { %p4323_p7 = pnand %p4322_p6, %p4316_p3 }
  0x12   :  { %4326 = shalt.err (!%p4323_p7)
}
  0x13   :  { %s4470_s7 = smov 64   ;;  %s4471_s8 = smov 4  }
  0x14   :  { %40 = dma.hbm_to_vmem [thread:$0]  %s5218_s1, 128, %s35_s22, [#allocation6], %s4470_s7, %s4470_s7, %s4471_s8  }
  0x15   :  { %s4472_s11 = smov [#allocation8]   ;;  %s4327_s15 = scalar_lea.hbm %s5220_s3, 1024 }
  0x16   :  { %s58_s12 = sshll.u32 %s4472_s11, 4  ;;  %p4328_p8 = scmp.ne.s32.totalorder %s5220_s3, %s4327_s15  ;;  %s59_s12 = int_to_ptr.vmem [resolvable:$true] %s58_s12 }
  0x17   :  { %p4331_p9 = scmp.lt.u32.totalorder %s4327_s15, %s5220_s3 }
  0x19   :  { %p4333_p10 = pnand %p4331_p9, %p4328_p8 }
  0x1b   :  { %4336 = shalt.err (!%p4333_p10)
}
  0x1c   :  { %s4337_s20 = scalar_lea.vmem %s59_s12, 1024  ;;  %p4342_p12 = scmp.lt.s32.totalorder %s59_s12, %s59_s12 }
  0x1d   :  { %p4338_p11 = scmp.ne.s32.totalorder %s59_s12, %s4337_s20  ;;  %p4343_p13 = scmp.lt.s32.totalorder %s4337_s20, %s4337_s20 }
  0x1f   :  { %p4344_p0 = por %p4343_p13, %p4342_p12 }
  0x21   :  { %p4345_p1 = pnand %p4344_p0, %p4338_p11 }
  0x23   :  { %4348 = shalt.err (!%p4345_p1)
}
  0x24   :  { %s4473_s1 = smov 256   ;;  %s4474_s21 = smov 16  }
  0x25   :  { %64 = dma.hbm_to_vmem [thread:$0]  %s5220_s3, 1024, %s59_s12, [#allocation9], %s4473_s1, %s4473_s1, %s4474_s21  }
  0x26   :  { %s4475_s24 = smov [#allocation2]   ;;  %s4349_s28 = scalar_lea.hbm %s5217_s0, 512 }
  0x27   :  { %s22_s25 = sshll.u32 %s4475_s24, 4  ;;  %p4350_p2 = scmp.ne.s32.totalorder %s5217_s0, %s4349_s28  ;;  %s23_s25 = int_to_ptr.vmem [resolvable:$true] %s22_s25 }
  0x28   :  { %p4353_p3 = scmp.lt.u32.totalorder %s4349_s28, %s5217_s0 }
  0x2a   :  { %p4355_p4 = pnand %p4353_p3, %p4350_p2 }
  0x2c   :  { %4358 = shalt.err (!%p4355_p4)
}
  0x2d   :  { %s4359_s10 = scalar_lea.vmem %s23_s25, 512  ;;  %p4364_p6 = scmp.lt.s32.totalorder %s23_s25, %s23_s25 }
  0x2e   :  { %p4360_p5 = scmp.ne.s32.totalorder %s23_s25, %s4359_s10  ;;  %p4365_p7 = scmp.lt.s32.totalorder %s4359_s10, %s4359_s10 }
  0x30   :  { %p4366_p8 = por %p4365_p7, %p4364_p6 }
  0x32   :  { %p4367_p9 = pnand %p4366_p8, %p4360_p5 }
  0x34   :  { %4370 = shalt.err (!%p4367_p9)
}
  0x35   :  { %s4476_s3 = smov 128   ;;  %s4477_s11 = smov 8  }
  0x36   :  { %28 = dma.hbm_to_vmem [thread:$0]  %s5217_s0, 512, %s23_s25, [#allocation3], %s4476_s3, %s4476_s3, %s4477_s11  }
  0x37   :  { %s4478_s14 = smov [#allocation7]   ;;  %s4479_s16 = smov [#allocation10]  }
  0x38   :  { %s46_s15 = sshll.u32 %s4478_s14, 4  ;;  %s70_s17 = sshll.u32 %s4479_s16, 4  ;;  %s47_s15 = int_to_ptr.vmem [resolvable:$true] %s46_s15  ;;  %s71_s17 = int_to_ptr.vmem [resolvable:$true] %s70_s17 }
  0x39   :  { %s4371_s20 = scalar_lea.hbm %s5219_s2, 256 }
  0x3a   :  { %p4372_p10 = scmp.ne.s32.totalorder %s5219_s2, %s4371_s20  ;;  %p4375_p11 = scmp.lt.u32.totalorder %s4371_s20, %s5219_s2 }
  0x3c   :  { %p4377_p12 = pnand %p4375_p11, %p4372_p10 }
  0x3e   :  { %4380 = shalt.err (!%p4377_p12)
}
  0x3f   :  { %s4381_s0 = scalar_lea.vmem %s47_s15, 256  ;;  %p4386_p0 = scmp.lt.s32.totalorder %s47_s15, %s47_s15 }
  0x40   :  { %p4382_p13 = scmp.ne.s32.totalorder %s47_s15, %s4381_s0  ;;  %p4387_p1 = scmp.lt.s32.totalorder %s4381_s0, %s4381_s0 }
  0x42   :  { %p4388_p2 = por %p4387_p1, %p4386_p0 }
  0x44   :  { %p4389_p3 = pnand %p4388_p2, %p4382_p13 }
  0x46   :  { %4392 = shalt.err (!%p4389_p3)
}
  0x47   :  { %52 = dma.hbm_to_vmem [thread:$0]  %s5219_s2, 256, %s47_s15, [#allocation6], %s4476_s3, %s4476_s3, %s4477_s11  }
  0x48   :  { %s4393_s29 = scalar_lea.hbm %s5221_s4, 1536 }
  0x49   :  { %p4394_p4 = scmp.ne.s32.totalorder %s5221_s4, %s4393_s29  ;;  %p4397_p5 = scmp.lt.u32.totalorder %s4393_s29, %s5221_s4 }
  0x4b   :  { %p4399_p6 = pnand %p4397_p5, %p4394_p4 }
  0x4d   :  { %4402 = shalt.err (!%p4399_p6)
}
  0x4e   :  { %s4403_s12 = scalar_lea.vmem %s71_s17, 1536  ;;  %p4408_p8 = scmp.lt.s32.totalorder %s71_s17, %s71_s17 }
  0x4f   :  { %p4404_p7 = scmp.ne.s32.totalorder %s71_s17, %s4403_s12  ;;  %p4409_p9 = scmp.lt.s32.totalorder %s4403_s12, %s4403_s12 }
  0x51   :  { %p4410_p10 = por %p4409_p9, %p4408_p8 }
  0x53   :  { %p4411_p11 = pnand %p4410_p10, %p4404_p7 }
  0x55   :  { %4414 = shalt.err (!%p4411_p11)
}
  0x56   :  { %76 = dma.hbm_to_vmem [thread:$0]  %s5221_s4, 1536, %s71_s17, [#allocation9], %s4476_s3, %s4476_s3, %s4477_s11  }
  0x57   :  { %4459 = dma.done.wait [#allocation3], 512  }
  0x58   :  { %4460 = vsyncadd [#allocation3], 4294966784 }
  0x59   :  { %4461 = dma.done.wait [#allocation6], 384  }
  0x5a   :  { %4462 = vsyncadd [#allocation6], 4294966912 }
  0x5b   :  { %4463 = dma.done.wait [#allocation9], 2560  }
  0x5c   :  { %4464 = vsyncadd [#allocation9], 4294964736  ;;  %vm138_vm0 = vcmask 261120   ;;  %v93_v0 = vld [vmem:[#allocation2] sm:$0xff]  ;;  %v96_v1 = vld [vmem:[#allocation2 + $0x10] sm:$0xff]  ;;  %vm104_vm1 = vcmask 1043456  }
  0x5d   :  { %v94_v2 = vld [vmem:[#allocation2 + $0x8] sm:$0xff]  ;;  %v139_v3 = vsel %vm138_vm0, %v93_v0, 0.0  ;;  %v145_v4 = vsel %vm138_vm0, %v96_v1, 0.0  ;;  %v97_v5 = vld [vmem:[#allocation2 + $0x18] sm:$0xff]  ;;  %v98_v6 = vld [vmem:[#allocation5] sm:$0xf] }
  0x5e   :  { %140 = vadd.xlane.f32.xlu0 %v139_v3  ;;  %146 = vadd.xlane.f32.xlu1 %v145_v4  ;;  %v100_v7 = vld [vmem:[#allocation5 + $0x4] sm:$0xf]  ;;  %v142_v8 = vsel %vm138_vm0, %v94_v2, 0.0  ;;  %v148_v9 = vsel %vm138_vm0, %v97_v5, 0.0  ;;  %v4132_v38 = vld [vmem:[#allocation8] ss:$16 sps:$4 sm:$0xff]   ;;  %vm4659_vm3 = vmpackc.low %vm138_vm0, %vm138_vm0 }
  0x5f   :  { %v102_v10 = vrot.slane %v100_v7, 4  ;;  %v4480_v39 = vmov 0.0   ;;  %v4622_v40 = vld [vmem:[#allocation8 + $0xc] ss:$16 sps:$4 sm:$0xff]   ;;  %v4138_v41 = vld [vmem:[#allocation8 + $0x20] ss:$16 sps:$4 sm:$0xff]   ;;  %3748 = vmatprep.subr.bf16.mxu0 %v4132_v38 }
  0x60   :  { %3756 = vmatprep.subr.bf16.mxu1 %v4480_v39  ;;  %3749 = vmatpush3.bf16.msra.mxu0 %v4132_v38  ;;  %v4626_v42 = vld [vmem:[#allocation8 + $0x2c] ss:$16 sps:$4 sm:$0xff]   ;;  %vm4481_vm2 = vmmov 0   ;;  %v3548_v60 = vld [vmem:[#allocation7] ss:$0 sm:$0xff]  ;;  %s4483_s4 = smov 96  }
  0x61   :  { %v4603_v11 = vsel %vm104_vm1, %v98_v6, %v102_v10  ;;  %3757 = vmatpush3.bf16.msra.mxu1 %v4622_v40  ;;  %3750 = vmatprep.subr.bf16.mxu0 %v4138_v41  ;;  %vm443_vm4 = vcmask 125952   ;;  %s4484_s3 = smov 32   ;;  %vm475_vm5 = vcmask 130048   ;;  %vm1122_vm6 = vcmask 523264   ;;  %s4486_s11 = smov 48  }
  0x62   :  { %143 = vadd.xlane.f32.xlu0 %v142_v8  ;;  %149 = vadd.xlane.f32.xlu1 %v148_v9  ;;  %v281_v12 = vsel %vm138_vm0, %v4603_v11, 0.0  ;;  %vm1185_vm7 = vcmask 785408   ;;  %s4487_s14 = smov 80   ;;  %s4488_s15 = smov 112   ;;  %vm3470_vm8 = vcmask 392192   ;;  %vm3473_vm9 = vcmask 654336  }
  0x63   :  { %3758 = vmatprep.subr.bf16.mxu1 %v4480_v39  ;;  %3760 = vmatprep.mubr.msk.bf16.mxu1 %vm4481_vm2, %v4480_v39  ;;  %vm3438_vm10 = vcmask 1040384   ;;  %vm3476_vm11 = vcmask 916480   ;;  %s4490_s16 = smov [#allocation12]  }
  0x64   :  { %3751 = vmatpush3.bf16.msra.mxu0 %v4138_v41  ;;  %s3533_s17 = sshll.u32 %s4490_s16, 4  ;;  %s3534_s17 = int_to_ptr.vmem [resolvable:$true] %s3533_s17 }
  0x65   :  { %3759 = vmatpush3.bf16.msra.mxu1 %v4626_v42 }
  0x66   :  { %282 = vadd.xlane.f32.xlu0 %v281_v12 }
  0xeb   :  { %v141_v13 = vpop.xlane.xlu0 %140  ;;  %v147_v14 = vpop.xlane.xlu1 %146 }
  0xec   :  { %v152_v15 = vmul.f32 0.03125, %v141_v13  ;;  %v154_v16 = vmul.f32 0.03125, %v147_v14  ;;  %v4635_v13 = vld [vmem:[#allocation7 + $0x3] ss:$0 sm:$0xff] }
  0xee   :  { %v156_v17 = vsub.f32 %v93_v0, %v152_v15  ;;  %v4607_v18 = vsub.f32 %v96_v1, %v154_v16 }
  0xef   :  { %v144_v19 = vpop.xlane.xlu0 %143  ;;  %v150_v20 = vpop.xlane.xlu1 %149 }
  0xf0   :  { %v153_v21 = vmul.f32 0.03125, %v144_v19  ;;  %v155_v22 = vmul.f32 0.03125, %v150_v20  ;;  %v160_v23 = vmul.f32 %v156_v17, %v156_v17  ;;  %v162_v24 = vmul.f32 %v4607_v18, %v4607_v18 }
  0xf2   :  { %v157_v25 = vsub.f32 %v94_v2, %v153_v21  ;;  %v4611_v26 = vsub.f32 %v97_v5, %v155_v22  ;;  %v164_v27 = vsel %vm138_vm0, %v160_v23, 0.0  ;;  %v170_v30 = vsel %vm138_vm0, %v162_v24, 0.0  ;;  %v3549_v2 = vld [vmem:[#allocation7 + $0x1] ss:$0 sm:$0xff]  ;;  %v4632_v5 = vld [vmem:[#allocation7 + $0x2] ss:$0 sm:$0xff] }
  0xf3   :  { %165 = vadd.xlane.f32.xlu1 %v164_v27  ;;  %v283_v28 = vpop.xlane.xlu0 %282  ;;  %v4482_v22 = vmov 0.0|0.0   ;;  %v4648_v23 = vld [vmem:[#allocation7 + $0x6] ss:$0 sm:$0xff]  ;;  %v3550_v24 = vld [vmem:[#allocation7 + $0x7] ss:$0 sm:$0xff] }
  0xf4   :  { %v284_v29 = vmul.f32 0.03125, %v283_v28  ;;  %v161_v31 = vmul.f32 %v157_v25, %v157_v25  ;;  %v163_v32 = vmul.f32 %v4611_v26, %v4611_v26  ;;  %3996 = vmatprep.subr.bf16.mxu0 %v4482_v22  ;;  %4000 = vmatprep.subr.bf16.mxu1 %v4482_v22 }
  0xf6   :  { %v285_v33 = vsub.f32 %v4603_v11, %v284_v29  ;;  %v167_v34 = vsel %vm138_vm0, %v161_v31, 0.0  ;;  %v173_v35 = vsel %vm138_vm0, %v163_v32, 0.0 }
  0xf7   :  { %171 = vadd.xlane.f32.xlu1 %v170_v30  ;;  %168 = vadd.xlane.f32.xlu0 %v167_v34 }
  0xf8   :  { %v286_v36 = vmul.f32 %v285_v33, %v285_v33 }
  0xfa   :  { %v287_v37 = vsel %vm138_vm0, %v286_v36, 0.0 }
  0xfb   :  { %174 = vadd.xlane.f32.xlu0 %v173_v35  ;;  %288 = vadd.xlane.f32.xlu1 %v287_v37 }
 0x180   :  { %v166_v43 = vpop.xlane.xlu1 %165 }
 0x181   :  { %v176_v44 = vmul.f32 0.03125, %v166_v43 }
 0x183   :  { %v180_v45 = vadd.f32 1e-05, %v176_v44 }
 0x184   :  { %v172_v46 = vpop.xlane.xlu1 %171  ;;  %v169_v47 = vpop.xlane.xlu0 %168 }
 0x185   :  { %4162 = vrsqrt.f32 %v180_v45  ;;  %v178_v48 = vmul.f32 0.03125, %v172_v46  ;;  %v177_v49 = vmul.f32 0.03125, %v169_v47 }
 0x187   :  { %v182_v50 = vadd.f32 1e-05, %v178_v48  ;;  %v181_v51 = vadd.f32 1e-05, %v177_v49 }
 0x188   :  { %v289_v52 = vpop.xlane.xlu1 %288  ;;  %v175_v53 = vpop.xlane.xlu0 %174 }
 0x189   :  { %4164 = vrsqrt.f32 %v182_v50  ;;  %v290_v54 = vmul.f32 0.03125, %v289_v52  ;;  %v179_v55 = vmul.f32 0.03125, %v175_v53 }
 0x18a   :  { %4166 = vrsqrt.f32 %v181_v51 }
 0x18b   :  { %v291_v56 = vadd.f32 1e-05, %v290_v54  ;;  %v183_v57 = vadd.f32 1e-05, %v179_v55 }
 0x18d   :  { %4168 = vrsqrt.f32 %v291_v56 }
 0x18e   :  { %4170 = vrsqrt.f32 %v183_v57 }
 0x18f   :  { %v4163_v58 = vpop.eup %4162 }
 0x190   :  { %v188_v59 = vmul.f32 %v4163_v58, %v156_v17 }
 0x192   :  { %v196_v0 = vmul.f32 %v3548_v60, %v188_v59 }
 0x193   :  { %v4165_v61 = vpop.eup %4164 }
 0x194   :  { %v4167_v62 = vpop.eup %4166  ;;  %v190_v1 = vmul.f32 %v4165_v61, %v4607_v18  ;;  %v204_v8 = vadd.f32 %v3549_v2, %v196_v0 }
 0x195   :  { %v189_v63 = vmul.f32 %v4167_v62, %v157_v25 }
 0x196   :  { %v198_v12 = vmul.f32 %v3548_v60, %v190_v1 }
 0x197   :  { %v4169_v3 = vpop.eup %4168  ;;  %v197_v4 = vmul.f32 %v3548_v60, %v189_v63 }
 0x198   :  { %v4171_v6 = vpop.eup %4170  ;;  %v293_v7 = vmul.f32 %v4169_v3, %v285_v33  ;;  %v206_v18 = vadd.f32 %v3549_v2, %v198_v12 }
 0x199   :  { %v205_v9 = vadd.f32 %v3549_v2, %v197_v4  ;;  %v191_v10 = vmul.f32 %v4171_v6, %v4611_v26 }
 0x19a   :  { %v298_v14 = vmul.f32 %v4632_v5, %v293_v7 }
 0x19b   :  { %v208_v15 = vpack.c.bf16 %v205_v9, %v204_v8  ;;  %v199_v16 = vmul.f32 %v3548_v60, %v191_v10 }
 0x19c   :  { %v303_v17 = vadd.f32 %v4635_v13, %v298_v14 }
 0x19d   :  { %3752 = vmatprep.mubr.msk.bf16.mxu0 %vm138_vm0, %v208_v15  ;;  %v207_v19 = vadd.f32 %v3549_v2, %v199_v16 }
 0x19e   :  { %v304_v20 = vpack.c.bf16 %v303_v17, %v303_v17 }
 0x19f   :  { %v209_v21 = vpack.c.bf16 %v207_v19, %v206_v18 }
 0x1a0   :  { %3761 = vmatmul.mubr.msk.bf16.vlgmr.msra.gmra.mrb[0].mxu1 %vm138_vm0, %v304_v20 }
 0x1a1   :  { %3753 = vmatmul.mubr.msk.bf16.vlgmr.msra.gmra.mrb[0].mxu0 %vm138_vm0, %v209_v21  ;;  %3775 = vmatprep.mubr.msk.f32.mxu1 %vm4481_vm2, %v4480_v39 }
 0x1a2   :  { %3768 = vmatprep.mubr.msk.f32.mxu0 %vm4481_vm2, %v4480_v39 }
 0x273   :  { %v358_v25 = vpop.f32.mrb[0].mxu1 }
 0x274   :  { %v3754_v26 = vpop.f32.mrb[0].mxu0  ;;  %v4651_v27 = vadd.f32 %v4648_v23, %v358_v25  ;;  %v3762_v28 = vpop.f32.mrb[1].mxu1 }
 0x275   :  { %v275_v29 = vadd.f32 %v3754_v26, %v3550_v24  ;;  %v266_v30 = vpop.f32.mrb[1].mxu0  ;;  %v361_v31 = vpop.f32.mrb[2].mxu1 }
 0x276   :  { %v3755_v32 = vpop.f32.mrb[2].mxu0  ;;  %549 = vrot.lane.b32.xlu1 %v4651_v27, %s4483_s4  ;;  %v3763_v33 = vpop.f32.mrb[3].mxu1  ;;  %v267_v36 = vadd.f32 %v3550_v24, %v266_v30 }
 0x277   :  { %v278_v34 = vadd.f32 %v3755_v32, %v3550_v24  ;;  %v269_v35 = vpop.f32.mrb[3].mxu0 }
 0x278   :  { %v270_v37 = vadd.f32 %v3550_v24, %v269_v35 }
 0x279   :  { %v4655_v38 = vpack.c.bf16 %v278_v34, %v275_v29  ;;  %v4663_v43 = vpack.i.bf16 %v278_v34, %v275_v29 }
 0x27a   :  { %v4665_v44 = vpack.c.bf16 %v270_v37, %v267_v36  ;;  %v4667_v45 = vpack.i.bf16 %v270_v37, %v267_v36 }
 0x27c   :  { %4103 = vrot.lane.b32.xlu0 %v4667_v45, %s4483_s4  ;;  %3999 = vmatpush3.bf16.xpose.msk.msra.mxu0 %vm4659_vm3, %v4665_v44 }
 0x27d   :  { %4003 = vmatprep.subr.bf16.mxu0 %v4482_v22 }
 0x283   :  { %3769 = vmatmul.mubr.msk.f32.vlgmr.msra.gmra.mrb[4].mxu0 %vm138_vm0, %v4651_v27 }
 0x284   :  { %3782 = vmatprep.mubr.msk.f32.mxu0 %vm4481_vm2, %v4480_v39 }
 0x2e8   :  { %v550_v50 = vpop.permute.xlu1 %549 }
 0x2ee   :  { %v4104_v46 = vpop.permute.xlu0 %4103 }
 0x2ef   :  { %v4106_v47 = vunpack.i.h.bf16 %v4104_v46  ;;  %v4105_v48 = vunpack.i.l.bf16 %v4104_v46 }
 0x2f1   :  { %v4679_v49 = vpack.c.bf16 %v4106_v47, %v4105_v48  ;;  %v740_v47 = vrot.slane %v4651_v27, 4 }
 0x2f3   :  { %4006 = vmatpush3.bf16.xpose.msk.msra.mxu0 %vm4659_vm3, %v4679_v49 }
 0x2f4   :  { %4014 = vmatprep.subr.bf16.mxu0 %v4482_v22 }
 0x2fa   :  { %3783 = vmatmul.mubr.msk.f32.vlgmr.msra.gmra.mrb[6].mxu0 %vm138_vm0, %v550_v50 }
 0x2fb   :  { %3803 = vmatprep.mubr.msk.f32.mxu0 %vm4481_vm2, %v4480_v39 }
 0x356   :  { %v439_v51 = vpop.f32.mrb[4].mxu0 }
 0x357   :  { %v444_v52 = vsel %vm443_vm4, %v439_v51, -inf  ;;  %v3770_v53 = vpop.f32.mrb[5].mxu0 }
 0x358   :  { %v445_v54 = vrot.slane %v444_v52, 4 }
 0x35a   :  { %v446_v55 = vmax.f32 %v444_v52, %v445_v54 }
 0x35c   :  { %v447_v56 = vrot.slane %v446_v55, 2 }
 0x35e   :  { %v448_v57 = vmax.f32 %v446_v55, %v447_v56 }
 0x360   :  { %v449_v58 = vrot.slane %v448_v57, 1 }
 0x362   :  { %v450_v59 = vmax.f32 %v448_v57, %v449_v58 }
 0x364   :  { %v451_v60 = vsub.f32 %v439_v51, %v450_v59 }
 0x366   :  { %v452_v61 = vmul.f32 1.442695, %v451_v60 }
 0x368   :  { %4172 = vpow2.f32 %v452_v61 }
 0x372   :  { %v4173_v62 = vpop.eup %4172 }
 0x373   :  { %v454_v63 = vsel %vm443_vm4, %v4173_v62, 0.0 }
 0x374   :  { %v455_v0 = vrot.slane %v454_v63, 4 }
 0x376   :  { %v456_v1 = vadd.f32 %v455_v0, %v454_v63 }
 0x378   :  { %v457_v2 = vrot.slane %v456_v1, 2 }
 0x37a   :  { %v458_v3 = vadd.f32 %v457_v2, %v456_v1 }
 0x37c   :  { %v459_v4 = vrot.slane %v458_v3, 1 }
 0x37e   :  { %v460_v6 = vadd.f32 %v459_v4, %v458_v3 }
 0x380   :  { %4174 = vrcp.f32 %v460_v6 }
 0x38a   :  { %v4175_v7 = vpop.eup %4174 }
 0x38b   :  { %v462_v8 = vmul.f32 %v4175_v7, %v4173_v62 }
 0x38d   :  { %v463_v9 = vadd.f32 1e-08, %v462_v8 }
 0x38f   :  { %v464_v10 = vsel %vm443_vm4, %v463_v9, 0.0 }
 0x390   :  { %465 = vadd.xlane.f32.xlu1 %v464_v10 }
 0x3a1   :  { %4113 = vrot.lane.b32.xlu1 %v4667_v45, %s4484_s3 }
 0x3cd   :  { %v627_v12 = vpop.f32.mrb[6].mxu0 }
 0x3ce   :  { %v631_v14 = vsel %vm443_vm4, %v627_v12, -inf  ;;  %v3784_v15 = vpop.f32.mrb[7].mxu0 }
 0x3cf   :  { %v632_v16 = vrot.slane %v631_v14, 4 }
 0x3d1   :  { %v633_v17 = vmax.f32 %v631_v14, %v632_v16 }
 0x3d3   :  { %v634_v18 = vrot.slane %v633_v17, 2 }
 0x3d5   :  { %v635_v19 = vmax.f32 %v633_v17, %v634_v18 }
 0x3d7   :  { %v636_v20 = vrot.slane %v635_v19, 1 }
 0x3d9   :  { %v637_v21 = vmax.f32 %v635_v19, %v636_v20 }
 0x3db   :  { %v638_v24 = vsub.f32 %v627_v12, %v637_v21 }
 0x3dd   :  { %v639_v25 = vmul.f32 1.442695, %v638_v24 }
 0x3df   :  { %4176 = vpow2.f32 %v639_v25 }
 0x3e9   :  { %v4177_v26 = vpop.eup %4176 }
 0x3ea   :  { %v641_v28 = vsel %vm443_vm4, %v4177_v26, 0.0 }
 0x3eb   :  { %v642_v29 = vrot.slane %v641_v28, 4 }
 0x3ed   :  { %v643_v30 = vadd.f32 %v642_v29, %v641_v28 }
 0x3ef   :  { %v644_v31 = vrot.slane %v643_v30, 2 }
 0x3f1   :  { %v645_v32 = vadd.f32 %v644_v31, %v643_v30 }
 0x3f3   :  { %v646_v33 = vrot.slane %v645_v32, 1 }
 0x3f5   :  { %v647_v34 = vadd.f32 %v646_v33, %v645_v32 }
 0x3f7   :  { %4178 = vrcp.f32 %v647_v34 }
 0x401   :  { %v4179_v35 = vpop.eup %4178 }
 0x402   :  { %v649_v36 = vmul.f32 %v4179_v35, %v4177_v26 }
 0x404   :  { %v650_v37 = vadd.f32 1e-08, %v649_v36 }
 0x406   :  { %v651_v46 = vsel %vm443_vm4, %v650_v37, 0.0 }
 0x407   :  { %652 = vadd.xlane.f32.xlu0 %v651_v46 }
 0x41d   :  { %4108 = vrot.lane.b32.xlu0 %v4667_v45, %s4470_s7  ;;  %v466_v48 = vpop.xlane.xlu1 %465 }
 0x41e   :  { %4180 = vrcp.f32 %v466_v48 }
 0x421   :  { %4118 = vrot.lane.b32.xlu0 %v4663_v43, %s4470_s7  ;;  %v4114_v51 = vpop.permute.xlu1 %4113 }
 0x422   :  { %v4116_v45 = vunpack.i.h.bf16 %v4114_v51  ;;  %v4115_v56 = vunpack.i.l.bf16 %v4114_v51 }
 0x424   :  { %v4708_v62 = vpack.c.bf16 %v4116_v45, %v4115_v56 }
 0x425   :  { %4123 = vrot.lane.b32.xlu0 %v4663_v43, %s4483_s4 }
 0x428   :  { %v4181_v55 = vpop.eup %4180 }
 0x429   :  { %923 = vrot.lane.b32.xlu0 %v740_v47, %s4483_s4  ;;  %v468_v27 = vmul.f32 %v4181_v55, %v463_v9  ;;  %v4754_v55 = vld [vmem:[#allocation8 + $0x24] ss:$16 sps:$4 sm:$0xff]  }
 0x494   :  { %v653_v50 = vpop.xlane.xlu0 %652 }
 0x495   :  { %4182 = vrcp.f32 %v653_v50 }
 0x498   :  { %v4109_v52 = vpop.permute.xlu0 %4108 }
 0x499   :  { %v4111_v53 = vunpack.i.h.bf16 %v4109_v52  ;;  %v4110_v54 = vunpack.i.l.bf16 %v4109_v52 }
 0x49b   :  { %v4704_v57 = vpack.c.bf16 %v4111_v53, %v4110_v54  ;;  %v4751_v53 = vld [vmem:[#allocation8 + $0x4] ss:$16 sps:$4 sm:$0xff]  }
 0x49c   :  { %v4119_v58 = vpop.permute.xlu0 %4118 }
 0x49d   :  { %v4121_v59 = vunpack.i.h.bf16 %v4119_v58  ;;  %v4120_v60 = vunpack.i.l.bf16 %v4119_v58  ;;  %4002 = vmatpush3.bf16.msra.mxu1 %v4704_v57 }
 0x49e   :  { %4007 = vmatprep.subr.bf16.mxu1 %v4482_v22 }
 0x49f   :  { %v4183_v61 = vpop.eup %4182  ;;  %v4710_v63 = vpack.c.bf16 %v4121_v59, %v4120_v60 }
 0x4a0   :  { %3776 = vmatmul.mubr.msk.f32.vlgmr.msra.gmra.mrb[4].mxu1 %vm475_vm5, %v468_v27  ;;  %v655_v0 = vmul.f32 %v4183_v61, %v650_v37  ;;  %v4124_v46 = vpop.permute.xlu0 %4123 }
 0x4a1   :  { %4009 = vmatpush3.bf16.msra.mxu1 %v4708_v62  ;;  %4016 = vmatpush3.bf16.msra.mxu0 %v4710_v63  ;;  %v4126_v48 = vunpack.i.h.bf16 %v4124_v46  ;;  %v4125_v50 = vunpack.i.l.bf16 %v4124_v46  ;;  %v4798_v46 = vld [vmem:[#allocation10 + $0x54] ss:$8 sps:$4 sm:$0xff]  }
 0x4a2   :  { %3789 = vmatprep.mubr.msk.f32.mxu1 %vm4481_vm2, %v4480_v39  ;;  %4010 = vmatprep.subr.bf16.mxu1 %v4482_v22 }
 0x4a3   :  { %4017 = vmatprep.subr.bf16.mxu0 %v4482_v22 }
 0x4a4   :  { %3790 = vmatmul.mubr.msk.f32.vlgmr.msra.gmra.mrb[6].mxu1 %vm475_vm5, %v655_v0  ;;  %v924_v54 = vpop.permute.xlu0 %923 }
 0x4a5   :  { %3796 = vmatprep.mubr.msk.f32.mxu1 %vm4481_vm2, %v4480_v39 }
 0x4aa   :  { %4013 = vmatpush3.bf16.xpose.msk.msra.mxu1 %vm4659_vm3, %v4655_v38 }
 0x4ab   :  { %4021 = vmatprep.subr.bf16.mxu1 %v4482_v22 }
 0x4b1   :  { %3797 = vmatmul.mubr.msk.f32.vlgmr.msra.gmra.mrb[8].mxu1 %vm138_vm0, %v740_v47 }
 0x4b2   :  { %3817 = vmatprep.mubr.msk.f32.mxu1 %vm4481_vm2, %v4480_v39 }
 0x573   :  { %v4729_v1 = vpop.f32.mrb[4].mxu1 }
 0x574   :  { %v3777_v2 = vpop.f32.mrb[5].mxu1 }
 0x577   :  { %v731_v3 = vpop.f32.mrb[6].mxu1 }
 0x578   :  { %v3791_v4 = vpop.f32.mrb[7].mxu1 }
 0x584   :  { %v815_v6 = vpop.f32.mrb[8].mxu1 }
 0x585   :  { %v819_v7 = vsel %vm443_vm4, %v815_v6, -inf  ;;  %v3798_v8 = vpop.f32.mrb[9].mxu1 }
 0x586   :  { %v820_v9 = vrot.slane %v819_v7, 4 }
 0x588   :  { %v821_v10 = vmax.f32 %v819_v7, %v820_v9 }
 0x58a   :  { %v822_v12 = vrot.slane %v821_v10, 2 }
 0x58c   :  { %v823_v14 = vmax.f32 %v821_v10, %v822_v12 }
 0x58e   :  { %v824_v15 = vrot.slane %v823_v14, 1 }
 0x590   :  { %v825_v16 = vmax.f32 %v823_v14, %v824_v15 }
 0x592   :  { %v826_v17 = vsub.f32 %v815_v6, %v825_v16 }
 0x594   :  { %v827_v18 = vmul.f32 1.442695, %v826_v17 }
 0x596   :  { %4184 = vpow2.f32 %v827_v18 }
 0x5a0   :  { %v4185_v19 = vpop.eup %4184 }
 0x5a1   :  { %v829_v20 = vsel %vm443_vm4, %v4185_v19, 0.0 }
 0x5a2   :  { %v830_v21 = vrot.slane %v829_v20, 4 }
 0x5a4   :  { %v831_v24 = vadd.f32 %v830_v21, %v829_v20 }
 0x5a6   :  { %v832_v25 = vrot.slane %v831_v24, 2 }
 0x5a8   :  { %v833_v26 = vadd.f32 %v832_v25, %v831_v24 }
 0x5aa   :  { %v834_v28 = vrot.slane %v833_v26, 1 }
 0x5ac   :  { %v835_v29 = vadd.f32 %v834_v28, %v833_v26  ;;  %v4768_v28 = vld [vmem:[#allocation10] ss:$8 sps:$4 sm:$0xff]  }
 0x5ae   :  { %4186 = vrcp.f32 %v835_v29  ;;  %v4770_v29 = vld [vmem:[#allocation10 + $0x4] ss:$8 sps:$4 sm:$0xff]  }
 0x5b8   :  { %v4187_v30 = vpop.eup %4186 }
 0x5b9   :  { %v837_v31 = vmul.f32 %v4187_v30, %v4185_v19  ;;  %v4772_v30 = vld [vmem:[#allocation10 + $0x14] ss:$8 sps:$4 sm:$0xff]  }
 0x5bb   :  { %v838_v32 = vadd.f32 1e-08, %v837_v31  ;;  %v4776_v31 = vld [vmem:[#allocation10 + $0x10] ss:$8 sps:$4 sm:$0xff]  }
 0x5bd   :  { %v839_v33 = vsel %vm443_vm4, %v838_v32, 0.0 }
 0x5be   :  { %840 = vadd.xlane.f32.xlu1 %v839_v33  ;;  %v4782_v33 = vld [vmem:[#allocation10 + $0x20] ss:$8 sps:$4 sm:$0xff]  }
 0x5cf   :  { %4128 = vrot.lane.b32.xlu1 %v4663_v43, %s4484_s3  ;;  %v4742_v43 = vpack.c.bf16 %v4126_v48, %v4125_v50  ;;  %v4800_v48 = vld [vmem:[#allocation10 + $0x50] ss:$8 sps:$4 sm:$0xff]   ;;  %v4485_v50 = vmov 0  }
 0x5d3   :  { %736 = vrot.lane.b32.xlu1 %v731_v3, %s4484_s3 }
 0x5d7   :  { %1119 = vrot.lane.b32.xlu1 %v4603_v11, %s4470_s7 }
 0x64b   :  { %v841_v34 = vpop.xlane.xlu1 %840 }
 0x64c   :  { %4188 = vrcp.f32 %v841_v34  ;;  %v4785_v34 = vld [vmem:[#allocation10 + $0x34] ss:$8 sps:$4 sm:$0xff]  }
 0x64f   :  { %v4129_v35 = vpop.permute.xlu1 %4128 }
 0x650   :  { %v4131_v36 = vunpack.i.h.bf16 %v4129_v35  ;;  %v4130_v37 = vunpack.i.l.bf16 %v4129_v35  ;;  %v4788_v35 = vld [vmem:[#allocation10 + $0x30] ss:$8 sps:$4 sm:$0xff]  }
 0x652   :  { %v4739_v47 = vpack.c.bf16 %v4131_v36, %v4130_v37  ;;  %v4791_v36 = vld [vmem:[#allocation10 + $0x44] ss:$8 sps:$4 sm:$0xff]   ;;  %v4794_v37 = vld [vmem:[#allocation10 + $0x40] ss:$8 sps:$4 sm:$0xff]  }
 0x654   :  { %4023 = vmatpush3.bf16.msra.mxu1 %v4739_v47 }
 0x655   :  { %1189 = vmatprep.subr.bf16.mxu1 %v4770_v29 }
 0x656   :  { %v4189_v51 = vpop.eup %4188 }
 0x657   :  { %v843_v52 = vmul.f32 %v4189_v51, %v838_v32  ;;  %v4779_v32 = vld [vmem:[#allocation10 + $0x24] ss:$8 sps:$4 sm:$0xff]   ;;  %v3591_v51 = vld [vmem:[#allocation7 + $0x9] ss:$0 sm:$0xff] }
 0x658   :  { %1240 = vrot.lane.b32.xlu1 %v3591_v51, %s4483_s4 }
 0x659   :  { %3804 = vmatmul.mubr.msk.f32.vlgmr.msra.gmra.mrb[8].mxu0 %vm475_vm5, %v843_v52 }
 0x65a   :  { %4020 = vmatpush3.bf16.xpose.msk.msra.mxu0 %vm4659_vm3, %v4742_v43  ;;  %3810 = vmatprep.mubr.msk.f32.mxu0 %vm4481_vm2, %v4480_v39 }
 0x65b   :  { %3820 = vmatprep.subr.bf16.mxu0 %v4480_v39 }
 0x661   :  { %3811 = vmatmul.mubr.msk.f32.vlgmr.msra.gmra.mrb[10].mxu0 %vm138_vm0, %v924_v54 }
 0x662   :  { %3821 = vmatpush3.bf16.msra.mxu0 %v4751_v53  ;;  %3824 = vmatprep.mubr.msk.bf16.mxu0 %vm4481_vm2, %v4480_v39 }
 0x663   :  { %3822 = vmatprep.subr.bf16.mxu0 %v4480_v39 }
 0x666   :  { %3823 = vmatpush3.bf16.msra.mxu0 %v4754_v55 }
 0x667   :  { %3828 = vmatprep.subr.bf16.mxu0 %v4480_v39 }
 0x72c   :  { %v4762_v45 = vpop.f32.mrb[8].mxu0 }
 0x72d   :  { %v3805_v56 = vpop.f32.mrb[9].mxu0 }
 0x72e   :  { %v737_v56 = vpop.permute.xlu1 %736 }
 0x734   :  { %v1001_v58 = vpop.f32.mrb[10].mxu0 }
 0x735   :  { %v1005_v59 = vsel %vm443_vm4, %v1001_v58, -inf  ;;  %v3812_v60 = vpop.f32.mrb[11].mxu0 }
 0x736   :  { %v1006_v27 = vrot.slane %v1005_v59, 4 }
 0x738   :  { %v1007_v61 = vmax.f32 %v1005_v59, %v1006_v27  ;;  %v1120_v27 = vpop.permute.xlu1 %1119 }
 0x73a   :  { %v1008_v0 = vrot.slane %v1007_v61, 2 }
 0x73c   :  { %v1009_v2 = vmax.f32 %v1007_v61, %v1008_v0  ;;  %v739_v61 = vsel %vm138_vm0, %v4729_v1, %v737_v56  ;;  %v4821_v1 = vpop.permute.xlu1 %1240 }
 0x73e   :  { %v1010_v3 = vrot.slane %v1009_v2, 1 }
 0x740   :  { %v1011_v4 = vmax.f32 %v1009_v2, %v1010_v3 }
 0x742   :  { %v1012_v6 = vsub.f32 %v1001_v58, %v1011_v4 }
 0x744   :  { %v1013_v7 = vmul.f32 1.442695, %v1012_v6 }
 0x746   :  { %4190 = vpow2.f32 %v1013_v7 }
 0x750   :  { %v4191_v8 = vpop.eup %4190 }
 0x751   :  { %v1015_v9 = vsel %vm443_vm4, %v4191_v8, 0.0 }
 0x752   :  { %v1016_v10 = vrot.slane %v1015_v9, 4 }
 0x754   :  { %v1017_v12 = vadd.f32 %v1016_v10, %v1015_v9 }
 0x756   :  { %v1018_v14 = vrot.slane %v1017_v12, 2 }
 0x758   :  { %v1019_v15 = vadd.f32 %v1018_v14, %v1017_v12 }
 0x75a   :  { %v1020_v16 = vrot.slane %v1019_v15, 1 }
 0x75c   :  { %v1021_v17 = vadd.f32 %v1020_v16, %v1019_v15 }
 0x75e   :  { %4192 = vrcp.f32 %v1021_v17 }
 0x768   :  { %v4193_v18 = vpop.eup %4192 }
 0x769   :  { %v1023_v19 = vmul.f32 %v4193_v18, %v4191_v8 }
 0x76b   :  { %v1024_v20 = vadd.f32 1e-08, %v1023_v19 }
 0x76d   :  { %v1025_v21 = vsel %vm443_vm4, %v1024_v20, 0.0 }
 0x76e   :  { %1026 = vadd.xlane.f32.xlu0 %v1025_v21 }
 0x7fb   :  { %v1027_v24 = vpop.xlane.xlu0 %1026 }
 0x7fc   :  { %4194 = vrcp.f32 %v1027_v24 }
 0x806   :  { %v4195_v25 = vpop.eup %4194 }
 0x807   :  { %v1029_v26 = vmul.f32 %v4195_v25, %v1024_v20 }
 0x809   :  { %3818 = vmatmul.mubr.msk.f32.vlgmr.msra.gmra.mrb[10].mxu1 %vm475_vm5, %v1029_v26 }
 0x80a   :  { %1190 = vmatpush1.bf16.msra.mxu1 %v4768_v28  ;;  %1221 = vmatprep.mubr.bf16.mxu1 %v4485_v50 }
 0x80b   :  { %1191 = vmatprep.subr.bf16.mxu1 %v4772_v30 }
 0x80e   :  { %1192 = vmatpush1.bf16.msra.mxu1 %v4776_v31 }
 0x80f   :  { %1193 = vmatprep.subr.bf16.mxu1 %v4779_v32 }
 0x812   :  { %1194 = vmatpush1.bf16.msra.mxu1 %v4782_v33 }
 0x813   :  { %1195 = vmatprep.subr.bf16.mxu1 %v4785_v34 }
 0x816   :  { %1196 = vmatpush1.bf16.msra.mxu1 %v4788_v35 }
 0x817   :  { %1197 = vmatprep.subr.bf16.mxu1 %v4791_v36 }
 0x81a   :  { %1198 = vmatpush1.bf16.msra.mxu1 %v4794_v37 }
 0x81b   :  { %1199 = vmatprep.subr.bf16.mxu1 %v4798_v46 }
 0x81e   :  { %1200 = vmatpush1.bf16.msra.mxu1 %v4800_v48 }
 0x81f   :  { %3836 = vmatprep.subr.bf16.mxu1 %v4480_v39 }
 0x8dc   :  { %v1105_v52 = vpop.f32.mrb[10].mxu1 }
 0x8dd   :  { %1110 = vrot.lane.b32.xlu0 %v1105_v52, %s4484_s3  ;;  %v3819_v54 = vpop.f32.mrb[11].mxu1 }
 0x94f   :  { %v1111_v58 = vpop.permute.xlu0 %1110 }
 0x950   :  { %v1113_v59 = vsel %vm138_vm0, %v4762_v45, %v1111_v58 }
 0x951   :  { %v1115_v60 = vrot.slane %v1113_v59, 4 }
 0x953   :  { %v1117_v0 = vsel %vm104_vm1, %v739_v61, %v1115_v60 }
 0x954   :  { %v1123_v2 = vsel %vm1122_vm6, %v1117_v0, %v1120_v27 }
 0x955   :  { %v1124_v3 = vpack.c.bf16 %v1123_v2, %v1123_v2 }
 0x957   :  { %3589 = vmatmul.mubr.msk.bf16.vlgmr.msra.gmra.mrb[12].mxu1 %vm1185_vm7, %v1124_v3 }
 0x958   :  { %3837 = vmatpush3.bf16.msra.mxu1 %v4622_v40  ;;  %3840 = vmatprep.mubr.msk.bf16.mxu1 %vm4481_vm2, %v4480_v39 }
 0x959   :  { %3838 = vmatprep.subr.bf16.mxu1 %v4480_v39 }
 0x95c   :  { %3839 = vmatpush3.bf16.msra.mxu1 %v4626_v42  ;;  %v4830_v42 = vld [vmem:[#allocation7 + $0x8] ss:$0 sm:$0xff] }
 0x95d   :  { %4031 = vmatprep.subr.bf16.mxu1 %v4482_v22 }
 0xa2a   :  { %v1223_v45 = vpop.f32.mrb[12].mxu1 }
 0xa2b   :  { %v1243_v4 = vadd.f32 %v4821_v1, %v1223_v45  ;;  %v1225_v6 = vpop.f32.mrb[13].mxu1  ;;  %v1234_v9 = vadd.f32 %v4830_v42, %v1223_v45 }
 0xa2c   :  { %v1227_v7 = vpop.f32.mrb[14].mxu1  ;;  %v1244_v40 = vadd.f32 %v4821_v1, %v1225_v6 }
 0xa2d   :  { %1246 = vrot.lane.b32.xlu1 %v1243_v4, %s4484_s3  ;;  %v1228_v8 = vpop.f32.mrb[15].mxu1  ;;  %v3595_v7 = vld [vmem:[#allocation7 + $0x5] ss:$0 sm:$0xff] }
 0xa31   :  { %1267 = vrot.lane.b32.xlu1 %v1244_v40, %s4483_s4 }
 0xa35   :  { %1257 = vrot.lane.b32.xlu1 %v1244_v40, %s4484_s3 }
 0xa39   :  { %1283 = vrot.lane.b32.xlu1 %v4603_v11, %s4484_s3 }
 0xa9f   :  { %v1247_v10 = vpop.permute.xlu1 %1246 }
 0xaa0   :  { %v1249_v12 = vadd.f32 %v1247_v10, %v1234_v9 }
 0xaa2   :  { %v3592_v14 = vmul.f32 -1.442695, %v1249_v12 }
 0xaa3   :  { %v1268_v18 = vpop.permute.xlu1 %1267 }
 0xaa4   :  { %4196 = vpow2.f32 %v3592_v14 }
 0xaa7   :  { %v1258_v24 = vpop.permute.xlu1 %1257 }
 0xaa8   :  { %v1260_v25 = vadd.f32 %v1258_v24, %v1234_v9 }
 0xaaa   :  { %v3593_v26 = vmul.f32 -1.442695, %v1260_v25  ;;  %v4855_v25 = vld [vmem:[#allocation8 + $0x28] ss:$16 sps:$4 sm:$0xff]  }
 0xaab   :  { %v1284_v56 = vpop.permute.xlu1 %1283 }
 0xaae   :  { %v4197_v15 = vpop.eup %4196 }
 0xaaf   :  { %v1253_v16 = vadd.f32 1.0, %v4197_v15 }
 0xab1   :  { %4198 = vrcp.f32 %v1253_v16 }
 0xabb   :  { %v4199_v17 = vpop.eup %4198 }
 0xabc   :  { %v1270_v19 = vmul.f32 %v4199_v17, %v1268_v18 }
 0xabe   :  { %1272 = vrot.lane.b32.xlu0 %v1270_v19, %s4470_s7 }
 0xb30   :  { %v1273_v20 = vpop.permute.xlu0 %1272 }
 0xb31   :  { %v1275_v21 = vadd.f32 %v1273_v20, %v1234_v9  ;;  %v3594_v9 = vld [vmem:[#allocation7 + $0x4] ss:$0 sm:$0xff] }
 0xb33   :  { %4200 = vtanh.f32 %v1275_v21 }
 0xb34   :  { %4202 = vpow2.f32 %v3593_v26  ;;  %v4859_v26 = vld [vmem:[#allocation7 + $0xa] ss:$0 sm:$0xff] }
 0xb3d   :  { %v4201_v11 = vpop.eup %4200 }
 0xb3e   :  { %1279 = vrot.lane.b32.xlu0 %v4201_v11, %s4483_s4  ;;  %v4203_v51 = vpop.eup %4202  ;;  %v4848_v11 = vld [vmem:[#allocation8 + $0x8] ss:$16 sps:$4 sm:$0xff]  }
 0xb3f   :  { %v1264_v52 = vadd.f32 1.0, %v4203_v51 }
 0xb41   :  { %4204 = vrcp.f32 %v1264_v52 }
 0xb4b   :  { %v4205_v54 = vpop.eup %4204 }
 0xb4c   :  { %v1277_v58 = vsub.f32 1.0, %v4205_v54  ;;  %v1286_v60 = vmul.f32 %v4205_v54, %v1284_v56 }
 0xbb0   :  { %v1280_v59 = vpop.permute.xlu0 %1279 }
 0xbb1   :  { %v1282_v27 = vmul.f32 %v1280_v59, %v1277_v58 }
 0xbb3   :  { %v1287_v61 = vadd.f32 %v1286_v60, %v1282_v27  ;;  %v3602_v27 = vld [vmem:[#allocation7 + $0xb] ss:$0 sm:$0xff] }
 0xbb5   :  { %1289 = vrot.lane.b32.xlu0 %v1287_v61, %s4483_s4 }
 0xc27   :  { %v1290_v0 = vpop.permute.xlu0 %1289 }
 0xc28   :  { %v1292_v2 = vsel %vm138_vm0, %v1290_v0, 0.0 }
 0xc29   :  { %1293 = vadd.xlane.f32.xlu1 %v1292_v2 }
 0xc3a   :  { %1323 = vrot.lane.b32.xlu1 %v3595_v7, %s4484_s3 }
 0xcb6   :  { %v1294_v3 = vpop.xlane.xlu1 %1293 }
 0xcb7   :  { %v1295_v45 = vmul.f32 0.03125, %v1294_v3 }
 0xcb9   :  { %v1296_v4 = vsub.f32 %v1287_v61, %v1295_v45 }
 0xcba   :  { %v4843_v18 = vpop.permute.xlu1 %1323 }
 0xcbb   :  { %v1297_v6 = vmul.f32 %v1296_v4, %v1296_v4 }
 0xcbd   :  { %1299 = vrot.lane.b32.xlu0 %v1297_v6, %s4483_s4 }
 0xd2f   :  { %v1300_v8 = vpop.permute.xlu0 %1299 }
 0xd30   :  { %v1302_v40 = vsel %vm138_vm0, %v1300_v8, 0.0 }
 0xd31   :  { %1303 = vadd.xlane.f32.xlu0 %v1302_v40 }
 0xd47   :  { %1314 = vrot.lane.b32.xlu0 %v3594_v9, %s4484_s3 }
 0xd4b   :  { %1446 = vrot.lane.b32.xlu0 %v3602_v27, %s4484_s3 }
 0xdbe   :  { %v1304_v10 = vpop.xlane.xlu0 %1303 }
 0xdbf   :  { %v1305_v12 = vmul.f32 0.03125, %v1304_v10 }
 0xdc1   :  { %v1306_v14 = vadd.f32 1e-05, %v1305_v12 }
 0xdc2   :  { %v4841_v16 = vpop.permute.xlu0 %1314 }
 0xdc3   :  { %4206 = vrsqrt.f32 %v1306_v14 }
 0xdc6   :  { %v4870_v6 = vpop.permute.xlu0 %1446 }
 0xdcd   :  { %v4207_v15 = vpop.eup %4206 }
 0xdce   :  { %v1308_v17 = vmul.f32 %v4207_v15, %v1296_v4 }
 0xdd0   :  { %v1317_v19 = vmul.f32 %v4841_v16, %v1308_v17 }
 0xdd2   :  { %v1326_v20 = vadd.f32 %v4843_v18, %v1317_v19 }
 0xdd4   :  { %v1327_v21 = vpack.c.bf16 %v1326_v20, %v1326_v20 }
 0xdd6   :  { %1333 = vrot.lane.b32.xlu1 %v1327_v21, %s4483_s4 }
 0xe48   :  { %v1334_v24 = vpop.permute.xlu1 %1333 }
 0xe49   :  { %3825 = vmatmul.mubr.msk.bf16.vlgmr.msra.gmra.mrb[12].mxu0 %vm138_vm0, %v1334_v24 }
 0xe4a   :  { %3829 = vmatpush3.bf16.xpose.msra.mxu0 %v4848_v11  ;;  %3832 = vmatprep.mubr.msk.bf16.mxu0 %vm4481_vm2, %v4480_v39 }
 0xe4b   :  { %3830 = vmatprep.subr.bf16.mxu0 %v4480_v39 }
 0xe52   :  { %3831 = vmatpush3.bf16.xpose.msra.mxu0 %v4855_v25 }
 0xe53   :  { %4024 = vmatprep.subr.bf16.mxu0 %v4482_v22 }
 0xf1c   :  { %v1380_v51 = vpop.f32.mrb[12].mxu0 }
 0xf1d   :  { %v1381_v52 = vadd.f32 %v4859_v26, %v1380_v51  ;;  %v3826_v54 = vpop.f32.mrb[13].mxu0 }
 0xf1e   :  { %v1383_v56 = vpop.f32.mrb[14].mxu0 }
 0xf1f   :  { %v1386_v58 = vmax.f32 %v1381_v52, 0.0  ;;  %v3827_v59 = vpop.f32.mrb[15].mxu0 }
 0xf21   :  { %v1387_v60 = vpack.c.bf16 %v1386_v58, %v1386_v58 }
 0xf23   :  { %3833 = vmatmul.mubr.bf16.vlgmr.msra.gmra.mrb[16].mxu0 %v1387_v60 }
 0xf24   :  { %4027 = vmatpush3.bf16.xpose.msk.msra.mxu0 %vm4659_vm3, %v4665_v44  ;;  %3848 = vmatprep.mubr.msk.f32.mxu0 %vm4481_vm2, %v4480_v39 }
 0xf25   :  { %4028 = vmatprep.subr.bf16.mxu0 %v4482_v22 }
 0xff6   :  { %v1430_v0 = vpop.f32.mrb[16].mxu0 }
 0xff7   :  { %1437 = vrot.lane.b32.xlu1 %v1430_v0, %s4484_s3  ;;  %v3834_v2 = vpop.f32.mrb[17].mxu0 }
 0xff8   :  { %v1433_v3 = vpop.f32.mrb[18].mxu0 }
 0xff9   :  { %v3835_v45 = vpop.f32.mrb[19].mxu0 }
0x1069   :  { %v1438_v4 = vpop.permute.xlu1 %1437 }
0x106a   :  { %v1440_v7 = vadd.f32 %v1438_v4, %v1287_v61 }
0x106c   :  { %v4873_v8 = vadd.f32 %v4870_v6, %v1440_v7 }
0x106e   :  { %1451 = vrot.lane.b32.xlu1 %v4873_v8, %s4483_s4 }
0x10e0   :  { %v1452_v40 = vpop.permute.xlu1 %1451 }
0x10e1   :  { %v1454_v9 = vsel %vm138_vm0, %v1452_v40, 0.0 }
0x10e2   :  { %1455 = vadd.xlane.f32.xlu0 %v1454_v9 }
0x10f8   :  { %1472 = vrot.lane.b32.xlu0 %v4632_v5, %s4484_s3 }
0x116f   :  { %v1456_v10 = vpop.xlane.xlu0 %1455 }
0x1170   :  { %v1457_v12 = vmul.f32 0.03125, %v1456_v10 }
0x1172   :  { %v1458_v14 = vsub.f32 %v4873_v8, %v1457_v12 }
0x1173   :  { %v4885_v5 = vpop.permute.xlu0 %1472 }
0x1174   :  { %v1459_v15 = vmul.f32 %v1458_v14, %v1458_v14 }
0x1176   :  { %1461 = vrot.lane.b32.xlu1 %v1459_v15, %s4483_s4 }
0x11e8   :  { %v1462_v61 = vpop.permute.xlu1 %1461 }
0x11e9   :  { %v1464_v17 = vsel %vm138_vm0, %v1462_v61, 0.0 }
0x11ea   :  { %1465 = vadd.xlane.f32.xlu1 %v1464_v17 }
0x11fb   :  { %1477 = vrot.lane.b32.xlu1 %v4635_v13, %s4484_s3 }
0x1277   :  { %v1466_v19 = vpop.xlane.xlu1 %1465 }
0x1278   :  { %v1467_v20 = vmul.f32 0.03125, %v1466_v19 }
0x127a   :  { %v1468_v21 = vadd.f32 1e-05, %v1467_v20 }
0x127b   :  { %v4887_v52 = vpop.permute.xlu1 %1477 }
0x127c   :  { %4208 = vrsqrt.f32 %v1468_v21 }
0x1286   :  { %v4209_v24 = vpop.eup %4208 }
0x1287   :  { %v1470_v51 = vmul.f32 %v4209_v24, %v1458_v14 }
0x1289   :  { %v1475_v54 = vmul.f32 %v4885_v5, %v1470_v51 }
0x128b   :  { %v1480_v56 = vadd.f32 %v4887_v52, %v1475_v54 }
0x128d   :  { %v1481_v58 = vpack.c.bf16 %v1480_v56, %v1480_v56 }
0x128f   :  { %1483 = vrot.lane.b32.xlu0 %v1481_v58, %s4483_s4 }
0x1301   :  { %v1484_v59 = vpop.permute.xlu0 %1483 }
0x1302   :  { %3841 = vmatmul.mubr.msk.bf16.vlgmr.msra.gmra.mrb[16].mxu1 %vm138_vm0, %v1484_v59 }
0x1303   :  { %4034 = vmatpush3.bf16.xpose.msk.msra.mxu1 %vm4659_vm3, %v4679_v49  ;;  %3862 = vmatprep.mubr.msk.f32.mxu1 %vm4481_vm2, %v4480_v39 }
0x1304   :  { %4038 = vmatprep.subr.bf16.mxu1 %v4482_v22 }
0x13d5   :  { %v1522_v13 = vpop.f32.mrb[16].mxu1 }
0x13d6   :  { %v4900_v60 = vadd.f32 %v4648_v23, %v1522_v13  ;;  %v3842_v27 = vpop.f32.mrb[17].mxu1 }
0x13d7   :  { %v1525_v0 = vpop.f32.mrb[18].mxu1 }
0x13d8   :  { %1699 = vrot.lane.b32.xlu0 %v4900_v60, %s4483_s4  ;;  %v3843_v2 = vpop.f32.mrb[19].mxu1  ;;  %3849 = vmatmul.mubr.msk.f32.vlgmr.msra.gmra.mrb[20].mxu0 %vm138_vm0, %v4900_v60  ;;  %v1876_v23 = vrot.slane %v4900_v60, 4 }
0x13d9   :  { %4030 = vmatpush3.bf16.msra.mxu0 %v4704_v57  ;;  %3855 = vmatprep.mubr.msk.f32.mxu0 %vm4481_vm2, %v4480_v39 }
0x13da   :  { %4035 = vmatprep.subr.bf16.mxu0 %v4482_v22 }
0x144a   :  { %v1700_v3 = vpop.permute.xlu0 %1699 }
0x144b   :  { %3863 = vmatmul.mubr.msk.f32.vlgmr.msra.gmra.mrb[20].mxu1 %vm138_vm0, %v1700_v3 }
0x144c   :  { %4041 = vmatpush3.bf16.xpose.msk.msra.mxu1 %vm4659_vm3, %v4655_v38  ;;  %3876 = vmatprep.mubr.msk.f32.mxu1 %vm4481_vm2, %v4480_v39 }
0x144d   :  { %4049 = vmatprep.subr.bf16.mxu1 %v4482_v22 }
0x1453   :  { %3877 = vmatmul.mubr.msk.f32.vlgmr.msra.gmra.mrb[22].mxu1 %vm138_vm0, %v1876_v23 }
0x1454   :  { %4051 = vmatpush3.bf16.msra.mxu1 %v4739_v47  ;;  %3897 = vmatprep.mubr.msk.f32.mxu1 %vm4481_vm2, %v4480_v39 }
0x1455   :  { %2236 = vmatprep.subr.bf16.mxu1 %v4770_v29 }
0x14ab   :  { %v1597_v45 = vpop.f32.mrb[20].mxu0 }
0x14ac   :  { %v1601_v4 = vsel %vm443_vm4, %v1597_v45, -inf  ;;  %v3850_v7 = vpop.f32.mrb[21].mxu0 }
0x14ad   :  { %v1602_v40 = vrot.slane %v1601_v4, 4 }
0x14af   :  { %v1603_v9 = vmax.f32 %v1601_v4, %v1602_v40 }
0x14b1   :  { %v1604_v10 = vrot.slane %v1603_v9, 2 }
0x14b3   :  { %v1605_v12 = vmax.f32 %v1603_v9, %v1604_v10 }
0x14b5   :  { %v1606_v14 = vrot.slane %v1605_v12, 1 }
0x14b7   :  { %v1607_v15 = vmax.f32 %v1605_v12, %v1606_v14 }
0x14b9   :  { %v1608_v61 = vsub.f32 %v1597_v45, %v1607_v15 }
0x14bb   :  { %v1609_v17 = vmul.f32 1.442695, %v1608_v61 }
0x14bd   :  { %4210 = vpow2.f32 %v1609_v17 }
0x14c7   :  { %v4211_v19 = vpop.eup %4210 }
0x14c8   :  { %v1611_v20 = vsel %vm443_vm4, %v4211_v19, 0.0 }
0x14c9   :  { %v1612_v21 = vrot.slane %v1611_v20, 4 }
0x14cb   :  { %v1613_v24 = vadd.f32 %v1612_v21, %v1611_v20 }
0x14cd   :  { %v1614_v51 = vrot.slane %v1613_v24, 2 }
0x14cf   :  { %v1615_v29 = vadd.f32 %v1614_v51, %v1613_v24 }
0x14d1   :  { %v1616_v54 = vrot.slane %v1615_v29, 1 }
0x14d3   :  { %v1617_v56 = vadd.f32 %v1616_v54, %v1615_v29 }
0x14d5   :  { %4212 = vrcp.f32 %v1617_v56 }
0x14df   :  { %v4213_v58 = vpop.eup %4212 }
0x14e0   :  { %v1619_v59 = vmul.f32 %v4213_v58, %v4211_v19 }
0x14e2   :  { %v1620_v13 = vadd.f32 1e-08, %v1619_v59 }
0x14e4   :  { %v1621_v27 = vsel %vm443_vm4, %v1620_v13, 0.0 }
0x14e5   :  { %1622 = vadd.xlane.f32.xlu1 %v1621_v27 }
0x151e   :  { %v1769_v0 = vpop.f32.mrb[20].mxu1 }
0x151f   :  { %v1773_v2 = vsel %vm443_vm4, %v1769_v0, -inf  ;;  %v3864_v3 = vpop.f32.mrb[21].mxu1 }
0x1520   :  { %v1774_v45 = vrot.slane %v1773_v2, 4 }
0x1522   :  { %v1775_v4 = vmax.f32 %v1773_v2, %v1774_v45 }
0x1524   :  { %v1776_v7 = vrot.slane %v1775_v4, 2 }
0x1526   :  { %v1777_v40 = vmax.f32 %v1775_v4, %v1776_v7  ;;  %v1945_v9 = vpop.f32.mrb[22].mxu1 }
0x1527   :  { %v1949_v10 = vsel %vm443_vm4, %v1945_v9, -inf  ;;  %v3878_v12 = vpop.f32.mrb[23].mxu1 }
0x1528   :  { %v1778_v14 = vrot.slane %v1777_v40, 1  ;;  %v1950_v15 = vrot.slane %v1949_v10, 4 }
0x152a   :  { %v1779_v61 = vmax.f32 %v1777_v40, %v1778_v14  ;;  %v1951_v17 = vmax.f32 %v1949_v10, %v1950_v15 }
0x152c   :  { %v1780_v19 = vsub.f32 %v1769_v0, %v1779_v61  ;;  %v1952_v20 = vrot.slane %v1951_v17, 2 }
0x152e   :  { %v1781_v21 = vmul.f32 1.442695, %v1780_v19  ;;  %v1953_v24 = vmax.f32 %v1951_v17, %v1952_v20 }
0x1530   :  { %4214 = vpow2.f32 %v1781_v21  ;;  %v1954_v51 = vrot.slane %v1953_v24, 1 }
0x1532   :  { %v1955_v29 = vmax.f32 %v1953_v24, %v1954_v51 }
0x1534   :  { %v1956_v54 = vsub.f32 %v1945_v9, %v1955_v29 }
0x1536   :  { %v1957_v56 = vmul.f32 1.442695, %v1956_v54 }
0x1538   :  { %4216 = vpow2.f32 %v1957_v56 }
0x153a   :  { %v4215_v58 = vpop.eup %4214 }
0x153b   :  { %v1783_v59 = vsel %vm443_vm4, %v4215_v58, 0.0 }
0x153c   :  { %v1784_v27 = vrot.slane %v1783_v59, 4 }
0x153e   :  { %v1785_v2 = vadd.f32 %v1784_v27, %v1783_v59 }
0x1540   :  { %v1786_v3 = vrot.slane %v1785_v2, 2 }
0x1542   :  { %v4217_v45 = vpop.eup %4216  ;;  %v1787_v4 = vadd.f32 %v1786_v3, %v1785_v2 }
0x1543   :  { %v1959_v7 = vsel %vm443_vm4, %v4217_v45, 0.0 }
0x1544   :  { %v1960_v0 = vrot.slane %v1959_v7, 4  ;;  %v1788_v40 = vrot.slane %v1787_v4, 1 }
0x1546   :  { %v1961_v10 = vadd.f32 %v1960_v0, %v1959_v7  ;;  %v1789_v12 = vadd.f32 %v1788_v40, %v1787_v4 }
0x1548   :  { %v1962_v14 = vrot.slane %v1961_v10, 2  ;;  %4218 = vrcp.f32 %v1789_v12 }
0x154a   :  { %v1963_v15 = vadd.f32 %v1962_v14, %v1961_v10 }
0x154c   :  { %v1964_v9 = vrot.slane %v1963_v15, 1 }
0x154e   :  { %v1965_v61 = vadd.f32 %v1964_v9, %v1963_v15 }
0x1550   :  { %4220 = vrcp.f32 %v1965_v61 }
0x1552   :  { %v4219_v17 = vpop.eup %4218 }
0x1553   :  { %v1791_v19 = vmul.f32 %v4219_v17, %v4215_v58 }
0x1555   :  { %v1792_v20 = vadd.f32 1e-08, %v1791_v19 }
0x1557   :  { %v1793_v21 = vsel %vm443_vm4, %v1792_v20, 0.0 }
0x1558   :  { %1794 = vadd.xlane.f32.xlu0 %v1793_v21 }
0x155a   :  { %v4221_v24 = vpop.eup %4220 }
0x155b   :  { %v1967_v51 = vmul.f32 %v4221_v24, %v4217_v45 }
0x155d   :  { %v1968_v29 = vadd.f32 1e-08, %v1967_v51 }
0x155f   :  { %v1969_v54 = vsel %vm443_vm4, %v1968_v29, 0.0 }
0x1560   :  { %1970 = vadd.xlane.f32.xlu0 %v1969_v54 }
0x1572   :  { %v1623_v56 = vpop.xlane.xlu1 %1622 }
0x1573   :  { %4222 = vrcp.f32 %v1623_v56 }
0x1576   :  { %2047 = vrot.lane.b32.xlu0 %v1876_v23, %s4483_s4 }
0x157a   :  { %2228 = vrot.lane.b32.xlu0 %v4873_v8, %s4484_s3 }
0x157d   :  { %v4223_v58 = vpop.eup %4222 }
0x157e   :  { %v1625_v59 = vmul.f32 %v4223_v58, %v1620_v13 }
0x1580   :  { %3856 = vmatmul.mubr.msk.f32.vlgmr.msra.gmra.mrb[22].mxu0 %vm475_vm5, %v1625_v59 }
0x1581   :  { %4037 = vmatpush3.bf16.msra.mxu0 %v4708_v62  ;;  %3869 = vmatprep.mubr.msk.f32.mxu0 %vm4481_vm2, %v4480_v39 }
0x1582   :  { %4042 = vmatprep.subr.bf16.mxu0 %v4482_v22 }
0x15e5   :  { %v1795_v27 = vpop.xlane.xlu0 %1794 }
0x15e6   :  { %4224 = vrcp.f32 %v1795_v27 }
0x15ed   :  { %v1971_v2 = vpop.xlane.xlu0 %1970 }
0x15ee   :  { %4226 = vrcp.f32 %v1971_v2 }
0x15f0   :  { %v4225_v60 = vpop.eup %4224 }
0x15f1   :  { %v1797_v23 = vmul.f32 %v4225_v60, %v1792_v20  ;;  %v2048_v45 = vpop.permute.xlu0 %2047 }
0x15f3   :  { %3870 = vmatmul.mubr.msk.f32.vlgmr.msra.gmra.mrb[24].mxu0 %vm475_vm5, %v1797_v23 }
0x15f4   :  { %4044 = vmatpush3.bf16.msra.mxu0 %v4710_v63  ;;  %3883 = vmatprep.mubr.msk.f32.mxu0 %vm4481_vm2, %v4480_v39 }
0x15f5   :  { %4045 = vmatprep.subr.bf16.mxu0 %v4482_v22 }
0x15f8   :  { %v4227_v13 = vpop.eup %4226 }
0x15f9   :  { %v1973_v3 = vmul.f32 %v4227_v13, %v1968_v29 }
0x15fb   :  { %3884 = vmatmul.mubr.msk.f32.vlgmr.msra.gmra.mrb[26].mxu0 %vm475_vm5, %v1973_v3 }
0x15fc   :  { %3890 = vmatprep.mubr.msk.f32.mxu0 %vm4481_vm2, %v4480_v39 }
0x15fd   :  { %4048 = vmatpush3.bf16.xpose.msk.msra.mxu0 %vm4659_vm3, %v4742_v43 }
0x15fe   :  { %3900 = vmatprep.subr.bf16.mxu0 %v4480_v39 }
0x1604   :  { %3891 = vmatmul.mubr.msk.f32.vlgmr.msra.gmra.mrb[28].mxu0 %vm138_vm0, %v2048_v45 }
0x1605   :  { %3901 = vmatpush3.bf16.msra.mxu0 %v4751_v53  ;;  %3904 = vmatprep.mubr.msk.bf16.mxu0 %vm4481_vm2, %v4480_v39 }
0x1606   :  { %3902 = vmatprep.subr.bf16.mxu0 %v4480_v39 }
0x1609   :  { %3903 = vmatpush3.bf16.msra.mxu0 %v4754_v55 }
0x160a   :  { %3908 = vmatprep.subr.bf16.mxu0 %v4480_v39 }
0x1653   :  { %v1695_v4 = vpop.f32.mrb[22].mxu0 }
0x1654   :  { %v3857_v7 = vpop.f32.mrb[23].mxu0 }
0x16c6   :  { %v1867_v0 = vpop.f32.mrb[24].mxu0 }
0x16c7   :  { %v3871_v40 = vpop.f32.mrb[25].mxu0 }
0x16ce   :  { %v2043_v10 = vpop.f32.mrb[26].mxu0 }
0x16cf   :  { %v3885_v12 = vpop.f32.mrb[27].mxu0 }
0x16d0   :  { %v4284_v12 = vld [vmem:[#allocation8 + $0xc] ss:$16 sps:$4 sm:$0xff]  }
0x16d7   :  { %v2117_v14 = vpop.f32.mrb[28].mxu0 }
0x16d8   :  { %v2121_v15 = vsel %vm443_vm4, %v2117_v14, -inf  ;;  %v3892_v9 = vpop.f32.mrb[29].mxu0 }
0x16d9   :  { %v2122_v53 = vrot.slane %v2121_v15, 4 }
0x16db   :  { %v2123_v61 = vmax.f32 %v2121_v15, %v2122_v53 }
0x16dd   :  { %v2124_v17 = vrot.slane %v2123_v61, 2 }
0x16df   :  { %v2125_v19 = vmax.f32 %v2123_v61, %v2124_v17 }
0x16e1   :  { %v2126_v20 = vrot.slane %v2125_v19, 1 }
0x16e3   :  { %v2127_v21 = vmax.f32 %v2125_v19, %v2126_v20 }
0x16e5   :  { %v2128_v24 = vsub.f32 %v2117_v14, %v2127_v21 }
0x16e7   :  { %v2129_v55 = vmul.f32 1.442695, %v2128_v24 }
0x16e9   :  { %4228 = vpow2.f32 %v2129_v55 }
0x16f3   :  { %v4229_v51 = vpop.eup %4228 }
0x16f4   :  { %v2131_v29 = vsel %vm443_vm4, %v4229_v51, 0.0 }
0x16f5   :  { %v2132_v54 = vrot.slane %v2131_v29, 4 }
0x16f7   :  { %v2133_v56 = vadd.f32 %v2132_v54, %v2131_v29 }
0x16f9   :  { %v2134_v58 = vrot.slane %v2133_v56, 2 }
0x16fb   :  { %v2135_v59 = vadd.f32 %v2134_v58, %v2133_v56 }
0x16fd   :  { %v2136_v27 = vrot.slane %v2135_v59, 1 }
0x16ff   :  { %v2137_v2 = vadd.f32 %v2136_v27, %v2135_v59 }
0x1701   :  { %4230 = vrcp.f32 %v2137_v2 }
0x170b   :  { %v4231_v60 = vpop.eup %4230 }
0x170c   :  { %v2139_v23 = vmul.f32 %v4231_v60, %v4229_v51 }
0x170e   :  { %v2140_v13 = vadd.f32 1e-08, %v2139_v23 }
0x1710   :  { %v2141_v3 = vsel %vm443_vm4, %v2140_v13, 0.0 }
0x1711   :  { %2142 = vadd.xlane.f32.xlu1 %v2141_v3 }
0x179e   :  { %v2143_v45 = vpop.xlane.xlu1 %2142 }
0x179f   :  { %4232 = vrcp.f32 %v2143_v45 }
0x17a9   :  { %v4233_v7 = vpop.eup %4232 }
0x17aa   :  { %v2145_v40 = vmul.f32 %v4233_v7, %v2140_v13 }
0x17ac   :  { %3898 = vmatmul.mubr.msk.f32.vlgmr.msra.gmra.mrb[24].mxu1 %vm475_vm5, %v2145_v40 }
0x17ad   :  { %2237 = vmatpush1.bf16.msra.mxu1 %v4768_v28  ;;  %2268 = vmatprep.mubr.bf16.mxu1 %v4485_v50 }
0x17ae   :  { %2238 = vmatprep.subr.bf16.mxu1 %v4772_v30 }
0x17b1   :  { %2239 = vmatpush1.bf16.msra.mxu1 %v4776_v31 }
0x17b2   :  { %2240 = vmatprep.subr.bf16.mxu1 %v4779_v32 }
0x17b5   :  { %2241 = vmatpush1.bf16.msra.mxu1 %v4782_v33 }
0x17b6   :  { %2242 = vmatprep.subr.bf16.mxu1 %v4785_v34 }
0x17b9   :  { %2243 = vmatpush1.bf16.msra.mxu1 %v4788_v35 }
0x17ba   :  { %2244 = vmatprep.subr.bf16.mxu1 %v4791_v36  ;;  %v2229_v36 = vpop.permute.xlu0 %2228 }
0x17bd   :  { %2245 = vmatpush1.bf16.msra.mxu1 %v4794_v37 }
0x17be   :  { %2246 = vmatprep.subr.bf16.mxu1 %v4798_v46 }
0x17c1   :  { %2247 = vmatpush1.bf16.msra.mxu1 %v4800_v48 }
0x17c2   :  { %3916 = vmatprep.subr.bf16.mxu1 %v4480_v39 }
0x187f   :  { %v2215_v28 = vpop.f32.mrb[24].mxu1 }
0x1880   :  { %2220 = vrot.lane.b32.xlu1 %v2215_v28, %s4484_s3  ;;  %v3899_v30 = vpop.f32.mrb[25].mxu1 }
0x1884   :  { %1872 = vrot.lane.b32.xlu1 %v1867_v0, %s4484_s3  ;;  %v4285_v0 = vld [vmem:[#allocation8 + $0x2c] ss:$16 sps:$4 sm:$0xff]  }
0x18f2   :  { %v2221_v31 = vpop.permute.xlu1 %2220 }
0x18f3   :  { %v2223_v32 = vsel %vm138_vm0, %v2043_v10, %v2221_v31 }
0x18f4   :  { %v2225_v33 = vrot.slane %v2223_v32, 4 }
0x18f6   :  { %v1873_v34 = vpop.permute.xlu1 %1872 }
0x18f7   :  { %v1875_v35 = vsel %vm138_vm0, %v1695_v4, %v1873_v34 }
0x18f8   :  { %v2227_v37 = vsel %vm104_vm1, %v1875_v35, %v2225_v33 }
0x18f9   :  { %v2231_v46 = vsel %vm1122_vm6, %v2227_v37, %v2229_v36 }
0x18fa   :  { %v2232_v48 = vpack.c.bf16 %v2231_v46, %v2231_v46 }
0x18fc   :  { %3620 = vmatmul.mubr.msk.bf16.vlgmr.msra.gmra.mrb[28].mxu1 %vm1185_vm7, %v2232_v48 }
0x18fd   :  { %3917 = vmatpush3.bf16.msra.mxu1 %v4284_v12  ;;  %3920 = vmatprep.mubr.msk.bf16.mxu1 %vm4481_vm2, %v4480_v39 }
0x18fe   :  { %3918 = vmatprep.subr.bf16.mxu1 %v4480_v39 }
0x1901   :  { %3919 = vmatpush3.bf16.msra.mxu1 %v4285_v0 }
0x1902   :  { %4059 = vmatprep.subr.bf16.mxu1 %v4482_v22 }
0x19cf   :  { %v2270_v4 = vpop.f32.mrb[28].mxu1 }
0x19d0   :  { %v2278_v10 = vadd.f32 %v2270_v4, %v4821_v1  ;;  %v2272_v14 = vpop.f32.mrb[29].mxu1  ;;  %v2277_v61 = vadd.f32 %v4830_v42, %v2270_v4 }
0x19d1   :  { %v2279_v15 = vadd.f32 %v2272_v14, %v4821_v1  ;;  %v2274_v9 = vpop.f32.mrb[30].mxu1 }
0x19d2   :  { %2281 = vrot.lane.b32.xlu1 %v2278_v10, %s4484_s3  ;;  %v2275_v53 = vpop.f32.mrb[31].mxu1 }
0x19d3   :  { %2302 = vrot.lane.b32.xlu0 %v2279_v15, %s4483_s4 }
0x19d7   :  { %2292 = vrot.lane.b32.xlu0 %v2279_v15, %s4484_s3 }
0x1a44   :  { %v2282_v17 = vpop.permute.xlu1 %2281 }
0x1a45   :  { %v2284_v19 = vadd.f32 %v2282_v17, %v2277_v61  ;;  %v2303_v51 = vpop.permute.xlu0 %2302 }
0x1a47   :  { %v3621_v20 = vmul.f32 -1.442695, %v2284_v19 }
0x1a49   :  { %4234 = vpow2.f32 %v3621_v20  ;;  %v2293_v59 = vpop.permute.xlu0 %2292 }
0x1a4a   :  { %v2295_v42 = vadd.f32 %v2293_v59, %v2277_v61 }
0x1a4c   :  { %v3622_v27 = vmul.f32 -1.442695, %v2295_v42 }
0x1a53   :  { %v4235_v21 = vpop.eup %4234 }
0x1a54   :  { %v2288_v24 = vadd.f32 1.0, %v4235_v21 }
0x1a56   :  { %4236 = vrcp.f32 %v2288_v24 }
0x1a60   :  { %v4237_v55 = vpop.eup %4236 }
0x1a61   :  { %v2305_v29 = vmul.f32 %v4237_v55, %v2303_v51 }
0x1a63   :  { %2307 = vrot.lane.b32.xlu1 %v2305_v29, %s4470_s7 }
0x1ad5   :  { %v2308_v54 = vpop.permute.xlu1 %2307 }
0x1ad6   :  { %v2310_v56 = vadd.f32 %v2308_v54, %v2277_v61 }
0x1ad8   :  { %4238 = vtanh.f32 %v2310_v56 }
0x1ad9   :  { %4240 = vpow2.f32 %v3622_v27 }
0x1ae2   :  { %v4239_v58 = vpop.eup %4238 }
0x1ae3   :  { %2314 = vrot.lane.b32.xlu1 %v4239_v58, %s4483_s4  ;;  %v4241_v2 = vpop.eup %4240 }
0x1ae4   :  { %v2299_v60 = vadd.f32 1.0, %v4241_v2 }
0x1ae6   :  { %4242 = vrcp.f32 %v2299_v60 }
0x1af0   :  { %v4243_v23 = vpop.eup %4242 }
0x1af1   :  { %v2312_v13 = vsub.f32 1.0, %v4243_v23  ;;  %v2318_v7 = vmul.f32 %v4243_v23, %v4873_v8 }
0x1b55   :  { %v2315_v3 = vpop.permute.xlu1 %2314 }
0x1b56   :  { %v2317_v45 = vmul.f32 %v2315_v3, %v2312_v13 }
0x1b58   :  { %v2319_v40 = vadd.f32 %v2318_v7, %v2317_v45 }
0x1b5a   :  { %2321 = vrot.lane.b32.xlu0 %v2319_v40, %s4483_s4 }
0x1bcc   :  { %v2322_v28 = vpop.permute.xlu0 %2321 }
0x1bcd   :  { %v2324_v30 = vsel %vm138_vm0, %v2322_v28, 0.0 }
0x1bce   :  { %2325 = vadd.xlane.f32.xlu1 %v2324_v30 }
0x1c5b   :  { %v2326_v31 = vpop.xlane.xlu1 %2325 }
0x1c5c   :  { %v2327_v32 = vmul.f32 0.03125, %v2326_v31  ;;  %v4286_v31 = vld [vmem:[#allocation7 + $0x6] ss:$0 sm:$0xff] }
0x1c5e   :  { %v2328_v33 = vsub.f32 %v2319_v40, %v2327_v32 }
0x1c60   :  { %v2329_v34 = vmul.f32 %v2328_v33, %v2328_v33 }
0x1c62   :  { %2331 = vrot.lane.b32.xlu0 %v2329_v34, %s4483_s4 }
0x1cd4   :  { %v2332_v35 = vpop.permute.xlu0 %2331 }
0x1cd5   :  { %v2334_v36 = vsel %vm138_vm0, %v2332_v35, 0.0 }
0x1cd6   :  { %2335 = vadd.xlane.f32.xlu0 %v2334_v36 }
0x1d63   :  { %v2336_v37 = vpop.xlane.xlu0 %2335 }
0x1d64   :  { %v2337_v46 = vmul.f32 0.03125, %v2336_v37 }
0x1d66   :  { %v2338_v8 = vadd.f32 1e-05, %v2337_v46 }
0x1d68   :  { %4244 = vrsqrt.f32 %v2338_v8 }
0x1d72   :  { %v4245_v48 = vpop.eup %4244 }
0x1d73   :  { %v2340_v12 = vmul.f32 %v4245_v48, %v2328_v33 }
0x1d75   :  { %v2341_v0 = vmul.f32 %v2340_v12, %v4841_v16 }
0x1d77   :  { %v2342_v4 = vadd.f32 %v2341_v0, %v4843_v18 }
0x1d79   :  { %v2343_v10 = vpack.c.bf16 %v2342_v4, %v2342_v4 }
0x1d7b   :  { %2345 = vrot.lane.b32.xlu0 %v2343_v10, %s4483_s4 }
0x1ded   :  { %v2346_v14 = vpop.permute.xlu0 %2345 }
0x1dee   :  { %3905 = vmatmul.mubr.msk.bf16.vlgmr.msra.gmra.mrb[32].mxu0 %vm138_vm0, %v2346_v14 }
0x1def   :  { %3909 = vmatpush3.bf16.xpose.msra.mxu0 %v4848_v11  ;;  %3912 = vmatprep.mubr.msk.bf16.mxu0 %vm4481_vm2, %v4480_v39 }
0x1df0   :  { %3910 = vmatprep.subr.bf16.mxu0 %v4480_v39 }
0x1df7   :  { %3911 = vmatpush3.bf16.xpose.msra.mxu0 %v4855_v25 }
0x1df8   :  { %4052 = vmatprep.subr.bf16.mxu0 %v4482_v22 }
0x1ec1   :  { %v2384_v15 = vpop.f32.mrb[32].mxu0 }
0x1ec2   :  { %v2385_v9 = vadd.f32 %v4859_v26, %v2384_v15  ;;  %v3906_v53 = vpop.f32.mrb[33].mxu0 }
0x1ec3   :  { %v2387_v61 = vpop.f32.mrb[34].mxu0 }
0x1ec4   :  { %v2390_v17 = vmax.f32 %v2385_v9, 0.0  ;;  %v3907_v19 = vpop.f32.mrb[35].mxu0 }
0x1ec6   :  { %v2391_v20 = vpack.c.bf16 %v2390_v17, %v2390_v17 }
0x1ec8   :  { %3913 = vmatmul.mubr.bf16.vlgmr.msra.gmra.mrb[36].mxu0 %v2391_v20 }
0x1ec9   :  { %4055 = vmatpush3.bf16.xpose.msk.msra.mxu0 %vm4659_vm3, %v4665_v44  ;;  %3928 = vmatprep.mubr.msk.f32.mxu0 %vm4481_vm2, %v4480_v39 }
0x1eca   :  { %4056 = vmatprep.subr.bf16.mxu0 %v4482_v22 }
0x1f9b   :  { %v2426_v11 = vpop.f32.mrb[36].mxu0 }
0x1f9c   :  { %2433 = vrot.lane.b32.xlu1 %v2426_v11, %s4484_s3  ;;  %v3914_v25 = vpop.f32.mrb[37].mxu0 }
0x1f9d   :  { %v2429_v26 = vpop.f32.mrb[38].mxu0 }
0x1f9e   :  { %v3915_v21 = vpop.f32.mrb[39].mxu0 }
0x200e   :  { %v2434_v24 = vpop.permute.xlu1 %2433 }
0x200f   :  { %v2436_v55 = vadd.f32 %v2434_v24, %v2319_v40 }
0x2011   :  { %v5023_v51 = vadd.f32 %v2436_v55, %v4870_v6 }
0x2013   :  { %2439 = vrot.lane.b32.xlu1 %v5023_v51, %s4483_s4 }
0x2085   :  { %v2440_v44 = vpop.permute.xlu1 %2439 }
0x2086   :  { %v2442_v29 = vsel %vm138_vm0, %v2440_v44, 0.0 }
0x2087   :  { %2443 = vadd.xlane.f32.xlu1 %v2442_v29 }
0x2114   :  { %v2444_v54 = vpop.xlane.xlu1 %2443 }
0x2115   :  { %v2445_v56 = vmul.f32 0.03125, %v2444_v54 }
0x2117   :  { %v2446_v58 = vsub.f32 %v5023_v51, %v2445_v56 }
0x2119   :  { %v2447_v59 = vmul.f32 %v2446_v58, %v2446_v58 }
0x211b   :  { %2449 = vrot.lane.b32.xlu0 %v2447_v59, %s4483_s4 }
0x218d   :  { %v2450_v42 = vpop.permute.xlu0 %2449 }
0x218e   :  { %v2452_v27 = vsel %vm138_vm0, %v2450_v42, 0.0 }
0x218f   :  { %2453 = vadd.xlane.f32.xlu0 %v2452_v27 }
0x221c   :  { %v2454_v2 = vpop.xlane.xlu0 %2453 }
0x221d   :  { %v2455_v60 = vmul.f32 0.03125, %v2454_v2 }
0x221f   :  { %v2456_v23 = vadd.f32 1e-05, %v2455_v60 }
0x2221   :  { %4246 = vrsqrt.f32 %v2456_v23 }
0x222b   :  { %v4247_v13 = vpop.eup %4246 }
0x222c   :  { %v2458_v3 = vmul.f32 %v4247_v13, %v2446_v58 }
0x222e   :  { %v2459_v45 = vmul.f32 %v2458_v3, %v4885_v5 }
0x2230   :  { %v2460_v7 = vadd.f32 %v2459_v45, %v4887_v52 }
0x2232   :  { %v2461_v40 = vpack.c.bf16 %v2460_v7, %v2460_v7 }
0x2234   :  { %2463 = vrot.lane.b32.xlu0 %v2461_v40, %s4483_s4 }
0x22a6   :  { %v2464_v28 = vpop.permute.xlu0 %2463 }
0x22a7   :  { %3921 = vmatmul.mubr.msk.bf16.vlgmr.msra.gmra.mrb[32].mxu1 %vm138_vm0, %v2464_v28 }
0x22a8   :  { %4062 = vmatpush3.bf16.xpose.msk.msra.mxu1 %vm4659_vm3, %v4679_v49  ;;  %3942 = vmatprep.mubr.msk.f32.mxu1 %vm4481_vm2, %v4480_v39 }
0x22a9   :  { %4066 = vmatprep.subr.bf16.mxu1 %v4482_v22 }
0x237a   :  { %v2502_v30 = vpop.f32.mrb[32].mxu1 }
0x237b   :  { %v2503_v5 = vadd.f32 %v4286_v31, %v2502_v30  ;;  %v3922_v32 = vpop.f32.mrb[33].mxu1 }
0x237c   :  { %v2505_v52 = vpop.f32.mrb[34].mxu1 }
0x237d   :  { %2679 = vrot.lane.b32.xlu1 %v2503_v5, %s4483_s4  ;;  %v3923_v33 = vpop.f32.mrb[35].mxu1  ;;  %3929 = vmatmul.mubr.msk.f32.vlgmr.msra.gmra.mrb[30].mxu0 %vm138_vm0, %v2503_v5  ;;  %v2856_v34 = vrot.slane %v2503_v5, 4 }
0x237e   :  { %4058 = vmatpush3.bf16.msra.mxu0 %v4704_v57  ;;  %3935 = vmatprep.mubr.msk.f32.mxu0 %vm4481_vm2, %v4480_v39  ;;  %v4287_v57 = vld [vmem:[#allocation10 + $0x4] ss:$8 sps:$4 sm:$0xff]  }
0x237f   :  { %4063 = vmatprep.subr.bf16.mxu0 %v4482_v22 }
0x23ef   :  { %v2680_v49 = vpop.permute.xlu1 %2679 }
0x23f0   :  { %3943 = vmatmul.mubr.msk.f32.vlgmr.msra.gmra.mrb[26].mxu1 %vm138_vm0, %v2680_v49 }
0x23f1   :  { %4069 = vmatpush3.bf16.xpose.msk.msra.mxu1 %vm4659_vm3, %v4655_v38  ;;  %3956 = vmatprep.mubr.msk.f32.mxu1 %vm4481_vm2, %v4480_v39 }
0x23f2   :  { %4077 = vmatprep.subr.bf16.mxu1 %v4482_v22 }
0x23f8   :  { %3957 = vmatmul.mubr.msk.f32.vlgmr.msra.gmra.mrb[36].mxu1 %vm138_vm0, %v2856_v34 }
0x23f9   :  { %4079 = vmatpush3.bf16.msra.mxu1 %v4739_v47  ;;  %3977 = vmatprep.mubr.msk.f32.mxu1 %vm4481_vm2, %v4480_v39 }
0x23fa   :  { %3216 = vmatprep.subr.bf16.mxu1 %v4287_v57 }
0x2450   :  { %v2577_v35 = vpop.f32.mrb[30].mxu0 }
0x2451   :  { %v2581_v36 = vsel %vm443_vm4, %v2577_v35, -inf  ;;  %v3930_v37 = vpop.f32.mrb[31].mxu0 }
0x2452   :  { %v2582_v38 = vrot.slane %v2581_v36, 4 }
0x2454   :  { %v2583_v46 = vmax.f32 %v2581_v36, %v2582_v38 }
0x2456   :  { %v2584_v8 = vrot.slane %v2583_v46, 2 }
0x2458   :  { %v2585_v48 = vmax.f32 %v2583_v46, %v2584_v8 }
0x245a   :  { %v2586_v12 = vrot.slane %v2585_v48, 1 }
0x245c   :  { %v2587_v0 = vmax.f32 %v2585_v48, %v2586_v12 }
0x245e   :  { %v2588_v4 = vsub.f32 %v2577_v35, %v2587_v0 }
0x2460   :  { %v2589_v10 = vmul.f32 1.442695, %v2588_v4 }
0x2462   :  { %4248 = vpow2.f32 %v2589_v10 }
0x246c   :  { %v4249_v14 = vpop.eup %4248 }
0x246d   :  { %v2591_v47 = vsel %vm443_vm4, %v4249_v14, 0.0 }
0x246e   :  { %v2592_v15 = vrot.slane %v2591_v47, 4 }
0x2470   :  { %v2593_v9 = vadd.f32 %v2592_v15, %v2591_v47 }
0x2472   :  { %v2594_v53 = vrot.slane %v2593_v9, 2 }
0x2474   :  { %v2595_v61 = vadd.f32 %v2594_v53, %v2593_v9 }
0x2476   :  { %v2596_v17 = vrot.slane %v2595_v61, 1 }
0x2478   :  { %v2597_v19 = vadd.f32 %v2596_v17, %v2595_v61 }
0x247a   :  { %4250 = vrcp.f32 %v2597_v19 }
0x2484   :  { %v4251_v20 = vpop.eup %4250 }
0x2485   :  { %v2599_v11 = vmul.f32 %v4251_v20, %v4249_v14 }
0x2487   :  { %v2600_v25 = vadd.f32 1e-08, %v2599_v11 }
0x2489   :  { %v2601_v26 = vsel %vm443_vm4, %v2600_v25, 0.0 }
0x248a   :  { %2602 = vadd.xlane.f32.xlu1 %v2601_v26 }
0x249b   :  { %3027 = vrot.lane.b32.xlu1 %v2856_v34, %s4483_s4 }
0x24c3   :  { %v2749_v21 = vpop.f32.mrb[26].mxu1 }
0x24c4   :  { %v2753_v24 = vsel %vm443_vm4, %v2749_v21, -inf  ;;  %v3944_v55 = vpop.f32.mrb[27].mxu1 }
0x24c5   :  { %v2754_v44 = vrot.slane %v2753_v24, 4  ;;  %v4288_v55 = vld [vmem:[#allocation8 + $0x4] ss:$16 sps:$4 sm:$0xff]  }
0x24c7   :  { %v2755_v29 = vmax.f32 %v2753_v24, %v2754_v44 }
0x24c9   :  { %v2756_v54 = vrot.slane %v2755_v29, 2 }
0x24cb   :  { %v2757_v56 = vmax.f32 %v2755_v29, %v2756_v54  ;;  %v2925_v58 = vpop.f32.mrb[36].mxu1 }
0x24cc   :  { %v2929_v59 = vsel %vm443_vm4, %v2925_v58, -inf  ;;  %v3958_v42 = vpop.f32.mrb[37].mxu1 }
0x24cd   :  { %v2758_v27 = vrot.slane %v2757_v56, 1  ;;  %v2930_v2 = vrot.slane %v2929_v59, 4 }
0x24cf   :  { %v2759_v60 = vmax.f32 %v2757_v56, %v2758_v27  ;;  %v2931_v23 = vmax.f32 %v2929_v59, %v2930_v2 }
0x24d1   :  { %v2760_v13 = vsub.f32 %v2749_v21, %v2759_v60  ;;  %v2932_v3 = vrot.slane %v2931_v23, 2 }
0x24d3   :  { %v2761_v45 = vmul.f32 1.442695, %v2760_v13  ;;  %v2933_v7 = vmax.f32 %v2931_v23, %v2932_v3 }
0x24d5   :  { %4252 = vpow2.f32 %v2761_v45  ;;  %v2934_v40 = vrot.slane %v2933_v7, 1 }
0x24d7   :  { %v2935_v28 = vmax.f32 %v2933_v7, %v2934_v40 }
0x24d9   :  { %v2936_v30 = vsub.f32 %v2925_v58, %v2935_v28 }
0x24db   :  { %v2937_v31 = vmul.f32 1.442695, %v2936_v30 }
0x24dd   :  { %4254 = vpow2.f32 %v2937_v31 }
0x24df   :  { %v4253_v5 = vpop.eup %4252 }
0x24e0   :  { %v2763_v32 = vsel %vm443_vm4, %v4253_v5, 0.0 }
0x24e1   :  { %v2764_v52 = vrot.slane %v2763_v32, 4 }
0x24e3   :  { %v2765_v33 = vadd.f32 %v2764_v52, %v2763_v32 }
0x24e5   :  { %v2766_v49 = vrot.slane %v2765_v33, 2 }
0x24e7   :  { %v4255_v34 = vpop.eup %4254  ;;  %v2767_v57 = vadd.f32 %v2766_v49, %v2765_v33 }
0x24e8   :  { %v2939_v35 = vsel %vm443_vm4, %v4255_v34, 0.0 }
0x24e9   :  { %v2940_v36 = vrot.slane %v2939_v35, 4  ;;  %v2768_v37 = vrot.slane %v2767_v57, 1 }
0x24eb   :  { %v2941_v38 = vadd.f32 %v2940_v36, %v2939_v35  ;;  %v2769_v46 = vadd.f32 %v2768_v37, %v2767_v57 }
0x24ed   :  { %v2942_v8 = vrot.slane %v2941_v38, 2  ;;  %4256 = vrcp.f32 %v2769_v46  ;;  %v4290_v46 = vld [vmem:[#allocation10] ss:$8 sps:$4 sm:$0xff]  }
0x24ef   :  { %v2943_v48 = vadd.f32 %v2942_v8, %v2941_v38  ;;  %v4291_v8 = vld [vmem:[#allocation10 + $0x14] ss:$8 sps:$4 sm:$0xff]  }
0x24f1   :  { %v2944_v12 = vrot.slane %v2943_v48, 1 }
0x24f3   :  { %v2945_v0 = vadd.f32 %v2944_v12, %v2943_v48  ;;  %v4292_v48 = vld [vmem:[#allocation10 + $0x10] ss:$8 sps:$4 sm:$0xff]   ;;  %v4293_v12 = vld [vmem:[#allocation10 + $0x24] ss:$8 sps:$4 sm:$0xff]  }
0x24f5   :  { %4258 = vrcp.f32 %v2945_v0  ;;  %v4294_v0 = vld [vmem:[#allocation10 + $0x20] ss:$8 sps:$4 sm:$0xff]  }
0x24f7   :  { %v4257_v4 = vpop.eup %4256 }
0x24f8   :  { %v2771_v10 = vmul.f32 %v4257_v4, %v4253_v5  ;;  %v4295_v4 = vld [vmem:[#allocation10 + $0x34] ss:$8 sps:$4 sm:$0xff]  }
0x24fa   :  { %v2772_v14 = vadd.f32 1e-08, %v2771_v10  ;;  %v4296_v10 = vld [vmem:[#allocation10 + $0x30] ss:$8 sps:$4 sm:$0xff]  }
0x24fc   :  { %v2773_v47 = vsel %vm443_vm4, %v2772_v14, 0.0 }
0x24fd   :  { %2774 = vadd.xlane.f32.xlu0 %v2773_v47  ;;  %v4298_v47 = vld [vmem:[#allocation10 + $0x40] ss:$8 sps:$4 sm:$0xff]  }
0x24ff   :  { %v4259_v15 = vpop.eup %4258 }
0x2500   :  { %v2947_v9 = vmul.f32 %v4259_v15, %v4255_v34  ;;  %v4299_v15 = vld [vmem:[#allocation10 + $0x54] ss:$8 sps:$4 sm:$0xff]  }
0x2502   :  { %v2948_v53 = vadd.f32 1e-08, %v2947_v9  ;;  %v4300_v9 = vld [vmem:[#allocation10 + $0x50] ss:$8 sps:$4 sm:$0xff]  }
0x2504   :  { %v2949_v61 = vsel %vm443_vm4, %v2948_v53, 0.0 }
0x2505   :  { %2950 = vadd.xlane.f32.xlu0 %v2949_v61 }
0x2517   :  { %v2603_v17 = vpop.xlane.xlu1 %2602 }
0x2518   :  { %4260 = vrcp.f32 %v2603_v17 }
0x2522   :  { %v4261_v19 = vpop.eup %4260 }
0x2523   :  { %v5068_v20 = vmul.f32 %v4261_v19, %v2600_v25 }
0x2525   :  { %3936 = vmatmul.mubr.msk.f32.vlgmr.msra.gmra.mrb[40].mxu0 %vm475_vm5, %v5068_v20 }
0x2526   :  { %4065 = vmatpush3.bf16.msra.mxu0 %v4708_v62  ;;  %3949 = vmatprep.mubr.msk.f32.mxu0 %vm4481_vm2, %v4480_v39 }
0x2527   :  { %4070 = vmatprep.subr.bf16.mxu0 %v4482_v22 }
0x258a   :  { %v2775_v11 = vpop.xlane.xlu0 %2774 }
0x258b   :  { %4262 = vrcp.f32 %v2775_v11 }
0x2592   :  { %v2951_v26 = vpop.xlane.xlu0 %2950 }
0x2593   :  { %4264 = vrcp.f32 %v2951_v26 }
0x2595   :  { %v4263_v21 = vpop.eup %4262 }
0x2596   :  { %v5076_v24 = vmul.f32 %v4263_v21, %v2772_v14  ;;  %v4297_v14 = vld [vmem:[#allocation10 + $0x44] ss:$8 sps:$4 sm:$0xff]  }
0x2598   :  { %3950 = vmatmul.mubr.msk.f32.vlgmr.msra.gmra.mrb[42].mxu0 %vm475_vm5, %v5076_v24 }
0x2599   :  { %4072 = vmatpush3.bf16.msra.mxu0 %v4710_v63  ;;  %3963 = vmatprep.mubr.msk.f32.mxu0 %vm4481_vm2, %v4480_v39  ;;  %v3028_v63 = vpop.permute.xlu1 %3027 }
0x259a   :  { %4073 = vmatprep.subr.bf16.mxu0 %v4482_v22  ;;  %v4289_v22 = vld [vmem:[#allocation8 + $0x24] ss:$16 sps:$4 sm:$0xff]  }
0x259d   :  { %v4265_v62 = vpop.eup %4264 }
0x259e   :  { %v5084_v25 = vmul.f32 %v4265_v62, %v2948_v53 }
0x25a0   :  { %3964 = vmatmul.mubr.msk.f32.vlgmr.msra.gmra.mrb[44].mxu0 %vm475_vm5, %v5084_v25 }
0x25a1   :  { %3970 = vmatprep.mubr.msk.f32.mxu0 %vm4481_vm2, %v4480_v39 }
0x25a2   :  { %4076 = vmatpush3.bf16.xpose.msk.msra.mxu0 %vm4659_vm3, %v4742_v43 }
0x25a3   :  { %3980 = vmatprep.subr.bf16.mxu0 %v4480_v39 }
0x25a9   :  { %3971 = vmatmul.mubr.msk.f32.vlgmr.msra.gmra.mrb[46].mxu0 %vm138_vm0, %v3028_v63 }
0x25aa   :  { %3981 = vmatpush3.bf16.msra.mxu0 %v4288_v55  ;;  %3984 = vmatprep.mubr.msk.bf16.mxu0 %vm4481_vm2, %v4480_v39 }
0x25ab   :  { %3982 = vmatprep.subr.bf16.mxu0 %v4480_v39 }
0x25ae   :  { %3983 = vmatpush3.bf16.msra.mxu0 %v4289_v22 }
0x25af   :  { %3988 = vmatprep.subr.bf16.mxu0 %v4480_v39 }
0x25f8   :  { %v5099_v44 = vpop.f32.mrb[40].mxu0 }
0x25f9   :  { %v3937_v41 = vpop.f32.mrb[41].mxu0 }
0x266b   :  { %v2847_v43 = vpop.f32.mrb[42].mxu0 }
0x266c   :  { %2852 = vrot.lane.b32.xlu1 %v2847_v43, %s4484_s3  ;;  %v3951_v29 = vpop.f32.mrb[43].mxu0 }
0x2670   :  { %3208 = vrot.lane.b32.xlu1 %v5023_v51, %s4484_s3 }
0x2673   :  { %v3023_v54 = vpop.f32.mrb[44].mxu0 }
0x2674   :  { %v3965_v56 = vpop.f32.mrb[45].mxu0 }
0x267c   :  { %v3097_v58 = vpop.f32.mrb[46].mxu0 }
0x267d   :  { %v3101_v59 = vsel %vm443_vm4, %v3097_v58, -inf  ;;  %v3972_v42 = vpop.f32.mrb[47].mxu0 }
0x267e   :  { %v3102_v27 = vrot.slane %v3101_v59, 4 }
0x2680   :  { %v3103_v2 = vmax.f32 %v3101_v59, %v3102_v27 }
0x2682   :  { %v3104_v60 = vrot.slane %v3103_v2, 2 }
0x2684   :  { %v3105_v23 = vmax.f32 %v3103_v2, %v3104_v60 }
0x2686   :  { %v3106_v13 = vrot.slane %v3105_v23, 1 }
0x2688   :  { %v3107_v3 = vmax.f32 %v3105_v23, %v3106_v13 }
0x268a   :  { %v3108_v45 = vsub.f32 %v3097_v58, %v3107_v3 }
0x268c   :  { %v3109_v7 = vmul.f32 1.442695, %v3108_v45 }
0x268e   :  { %4266 = vpow2.f32 %v3109_v7 }
0x2698   :  { %v4267_v40 = vpop.eup %4266 }
0x2699   :  { %v3111_v28 = vsel %vm443_vm4, %v4267_v40, 0.0 }
0x269a   :  { %v3112_v30 = vrot.slane %v3111_v28, 4 }
0x269c   :  { %v3113_v31 = vadd.f32 %v3112_v30, %v3111_v28 }
0x269e   :  { %v3114_v5 = vrot.slane %v3113_v31, 2 }
0x26a0   :  { %v3115_v32 = vadd.f32 %v3114_v5, %v3113_v31 }
0x26a2   :  { %v3116_v52 = vrot.slane %v3115_v32, 1 }
0x26a4   :  { %v3117_v33 = vadd.f32 %v3116_v52, %v3115_v32 }
0x26a6   :  { %4268 = vrcp.f32 %v3117_v33 }
0x26b0   :  { %v4269_v49 = vpop.eup %4268 }
0x26b1   :  { %v3119_v34 = vmul.f32 %v4269_v49, %v4267_v40 }
0x26b3   :  { %v3120_v57 = vadd.f32 1e-08, %v3119_v34 }
0x26b5   :  { %v3121_v35 = vsel %vm443_vm4, %v3120_v57, 0.0 }
0x26b6   :  { %3122 = vadd.xlane.f32.xlu0 %v3121_v35 }
0x26de   :  { %v2853_v61 = vpop.permute.xlu1 %2852 }
0x26df   :  { %v2855_v26 = vsel %vm138_vm0, %v5099_v44, %v2853_v61  ;;  %v4301_v44 = vld [vmem:[#allocation7 + $0x8] ss:$0 sm:$0xff]  ;;  %v3449_v61 = vrot.slane %v5068_v20, 3 }
0x26e2   :  { %v3209_v21 = vpop.permute.xlu1 %3208 }
0x2743   :  { %v3123_v36 = vpop.xlane.xlu0 %3122 }
0x2744   :  { %4270 = vrcp.f32 %v3123_v36 }
0x274e   :  { %v4271_v37 = vpop.eup %4270 }
0x274f   :  { %v5107_v38 = vmul.f32 %v4271_v37, %v3120_v57 }
0x2751   :  { %3978 = vmatmul.mubr.msk.f32.vlgmr.msra.gmra.mrb[38].mxu1 %vm475_vm5, %v5107_v38 }
0x2752   :  { %3217 = vmatpush1.bf16.msra.mxu1 %v4290_v46  ;;  %3248 = vmatprep.mubr.bf16.mxu1 %v4485_v50 }
0x2753   :  { %3218 = vmatprep.subr.bf16.mxu1 %v4291_v8 }
0x2756   :  { %3219 = vmatpush1.bf16.msra.mxu1 %v4292_v48 }
0x2757   :  { %3220 = vmatprep.subr.bf16.mxu1 %v4293_v12 }
0x275a   :  { %3221 = vmatpush1.bf16.msra.mxu1 %v4294_v0 }
0x275b   :  { %3222 = vmatprep.subr.bf16.mxu1 %v4295_v4 }
0x275e   :  { %3223 = vmatpush1.bf16.msra.mxu1 %v4296_v10 }
0x275f   :  { %3224 = vmatprep.subr.bf16.mxu1 %v4297_v14 }
0x2762   :  { %3225 = vmatpush1.bf16.msra.mxu1 %v4298_v47 }
0x2763   :  { %3226 = vmatprep.subr.bf16.mxu1 %v4299_v15 }
0x2766   :  { %3227 = vmatpush1.bf16.msra.mxu1 %v4300_v9 }
0x2824   :  { %v3195_v50 = vpop.f32.mrb[38].mxu1 }
0x2825   :  { %3200 = vrot.lane.b32.xlu0 %v3195_v50, %s4484_s3  ;;  %v3979_v53 = vpop.f32.mrb[39].mxu1 }
0x2826   :  { %v3441_v53 = vrot.slane %v5068_v20, 1 }
0x2897   :  { %v3201_v17 = vpop.permute.xlu0 %3200 }
0x2898   :  { %v3203_v19 = vsel %vm138_vm0, %v3023_v54, %v3201_v17  ;;  %v3456_v17 = vrot.slane %v5076_v24, 1 }
0x2899   :  { %v3205_v11 = vrot.slane %v3203_v19, 4 }
0x289b   :  { %v3207_v62 = vsel %vm104_vm1, %v2855_v26, %v3205_v11  ;;  %v4302_v11 = vld [vmem:[#allocation8 + $0x8] ss:$16 sps:$4 sm:$0xff]  }
0x289c   :  { %v3211_v63 = vsel %vm1122_vm6, %v3207_v62, %v3209_v21  ;;  %v4303_v26 = vld [vmem:[#allocation8 + $0x28] ss:$16 sps:$4 sm:$0xff]  }
0x289d   :  { %v3212_v55 = vpack.c.bf16 %v3211_v63, %v3211_v63  ;;  %v4304_v62 = vld [vmem:[#allocation7 + $0xa] ss:$0 sm:$0xff] }
0x289f   :  { %3641 = vmatmul.mubr.msk.bf16.vlgmr.msra.gmra.mrb[40].mxu1 %vm1185_vm7, %v3212_v55 }
0x2972   :  { %v3250_v22 = vpop.f32.mrb[40].mxu1 }
0x2973   :  { %v3258_v41 = vadd.f32 %v3250_v22, %v4821_v1  ;;  %v3252_v43 = vpop.f32.mrb[41].mxu1  ;;  %v3257_v58 = vadd.f32 %v4301_v44, %v3250_v22 }
0x2974   :  { %v3254_v29 = vpop.f32.mrb[42].mxu1  ;;  %v3259_v56 = vadd.f32 %v3252_v43, %v4821_v1 }
0x2975   :  { %3261 = vrot.lane.b32.xlu1 %v3258_v41, %s4484_s3  ;;  %v3255_v54 = vpop.f32.mrb[43].mxu1 }
0x2979   :  { %3282 = vrot.lane.b32.xlu1 %v3259_v56, %s4483_s4 }
0x297d   :  { %3272 = vrot.lane.b32.xlu1 %v3259_v56, %s4484_s3 }
0x29e7   :  { %v3262_v59 = vpop.permute.xlu1 %3261 }
0x29e8   :  { %v3264_v42 = vadd.f32 %v3262_v59, %v3257_v58  ;;  %v3445_v59 = vrot.slane %v5068_v20, 2 }
0x29ea   :  { %v3642_v27 = vmul.f32 -1.442695, %v3264_v42  ;;  %v3478_v42 = vrot.slane %v5084_v25, 1 }
0x29eb   :  { %v3283_v13 = vpop.permute.xlu1 %3282 }
0x29ec   :  { %4272 = vpow2.f32 %v3642_v27  ;;  %v3486_v27 = vrot.slane %v5084_v25, 3 }
0x29ef   :  { %v3273_v40 = vpop.permute.xlu1 %3272 }
0x29f0   :  { %v3275_v28 = vadd.f32 %v3273_v40, %v3257_v58 }
0x29f2   :  { %v3643_v30 = vmul.f32 -1.442695, %v3275_v28 }
0x29f6   :  { %v4273_v2 = vpop.eup %4272 }
0x29f7   :  { %v3268_v60 = vadd.f32 1.0, %v4273_v2  ;;  %v3493_v2 = vrot.slane %v5107_v38, 1 }
0x29f9   :  { %4274 = vrcp.f32 %v3268_v60 }
0x2a03   :  { %v4275_v23 = vpop.eup %4274 }
0x2a04   :  { %v3285_v3 = vmul.f32 %v4275_v23, %v3283_v13 }
0x2a06   :  { %3287 = vrot.lane.b32.xlu0 %v3285_v3, %s4470_s7 }
0x2a78   :  { %v3288_v45 = vpop.permute.xlu0 %3287 }
0x2a79   :  { %v3290_v1 = vadd.f32 %v3288_v45, %v3257_v58  ;;  %v3501_v45 = vrot.slane %v5107_v38, 3 }
0x2a7b   :  { %4276 = vtanh.f32 %v3290_v1  ;;  %v3497_v1 = vrot.slane %v5107_v38, 2 }
0x2a7c   :  { %4278 = vpow2.f32 %v3643_v30 }
0x2a85   :  { %v4277_v7 = vpop.eup %4276 }
0x2a86   :  { %3294 = vrot.lane.b32.xlu0 %v4277_v7, %s4483_s4  ;;  %v4279_v31 = vpop.eup %4278 }
0x2a87   :  { %v3279_v5 = vadd.f32 1.0, %v4279_v31 }
0x2a89   :  { %4280 = vrcp.f32 %v3279_v5 }
0x2a93   :  { %v4281_v32 = vpop.eup %4280 }
0x2a94   :  { %v3292_v52 = vsub.f32 1.0, %v4281_v32  ;;  %v3298_v34 = vmul.f32 %v4281_v32, %v5023_v51 }
0x2af8   :  { %v3295_v33 = vpop.permute.xlu0 %3294 }
0x2af9   :  { %v3297_v49 = vmul.f32 %v3295_v33, %v3292_v52 }
0x2afb   :  { %v5127_v57 = vadd.f32 %v3298_v34, %v3297_v49 }
0x2afd   :  { %3301 = vrot.lane.b32.xlu1 %v5127_v57, %s4483_s4 }
0x2b6f   :  { %v3302_v35 = vpop.permute.xlu1 %3301 }
0x2b70   :  { %v3304_v36 = vsel %vm138_vm0, %v3302_v35, 0.0 }
0x2b71   :  { %3305 = vadd.xlane.f32.xlu0 %v3304_v36 }
0x2bfe   :  { %v3306_v37 = vpop.xlane.xlu0 %3305 }
0x2bff   :  { %v3307_v46 = vmul.f32 0.03125, %v3306_v37 }
0x2c01   :  { %v3308_v8 = vsub.f32 %v5127_v57, %v3307_v46 }
0x2c03   :  { %v3309_v48 = vmul.f32 %v3308_v8, %v3308_v8 }
0x2c05   :  { %3311 = vrot.lane.b32.xlu1 %v3309_v48, %s4483_s4 }
0x2c77   :  { %v3312_v12 = vpop.permute.xlu1 %3311 }
0x2c78   :  { %v3314_v0 = vsel %vm138_vm0, %v3312_v12, 0.0 }
0x2c79   :  { %3315 = vadd.xlane.f32.xlu1 %v3314_v0 }
0x2d06   :  { %v3316_v51 = vpop.xlane.xlu1 %3315 }
0x2d07   :  { %v3317_v4 = vmul.f32 0.03125, %v3316_v51 }
0x2d09   :  { %v3318_v10 = vadd.f32 1e-05, %v3317_v4 }
0x2d0b   :  { %4282 = vrsqrt.f32 %v3318_v10 }
0x2d15   :  { %v4283_v14 = vpop.eup %4282 }
0x2d16   :  { %v3320_v47 = vmul.f32 %v4283_v14, %v3308_v8 }
0x2d18   :  { %v3321_v15 = vmul.f32 %v3320_v47, %v4841_v16  ;;  %v3464_v16 = vrot.slane %v5076_v24, 3 }
0x2d1a   :  { %v3322_v9 = vadd.f32 %v3321_v15, %v4843_v18  ;;  %v3482_v18 = vrot.slane %v5084_v25, 2 }
0x2d1c   :  { %v3323_v50 = vpack.c.bf16 %v3322_v9, %v3322_v9 }
0x2d1e   :  { %3325 = vrot.lane.b32.xlu0 %v3323_v50, %s4483_s4 }
0x2d22   :  { %3442 = vrot.lane.b32.xlu0 %v3441_v53, %s4474_s21 }
0x2d26   :  { %3450 = vrot.lane.b32.xlu0 %v3449_v61, %s4486_s11 }
0x2d2a   :  { %3457 = vrot.lane.b32.xlu0 %v3456_v17, %s4487_s14 }
0x2d2e   :  { %3465 = vrot.lane.b32.xlu0 %v3464_v16, %s4488_s15 }
0x2d32   :  { %3483 = vrot.lane.b32.xlu0 %v3482_v18, %s4484_s3 }
0x2d36   :  { %3490 = vrot.lane.b32.xlu0 %v5107_v38, %s4470_s7 }
0x2d90   :  { %v3326_v19 = vpop.permute.xlu0 %3325 }
0x2d91   :  { %3985 = vmatmul.mubr.msk.bf16.vlgmr.msra.gmra.mrb[48].mxu0 %vm138_vm0, %v3326_v19 }
0x2d92   :  { %3989 = vmatpush3.bf16.xpose.msra.mxu0 %v4302_v11  ;;  %3992 = vmatprep.mubr.msk.bf16.mxu0 %vm4481_vm2, %v4480_v39 }
0x2d93   :  { %3990 = vmatprep.subr.bf16.mxu0 %v4480_v39  ;;  %v3460_v39 = vrot.slane %v5076_v24, 2 }
0x2d94   :  { %v3443_v7 = vpop.permute.xlu0 %3442 }
0x2d98   :  { %v3451_v28 = vpop.permute.xlu0 %3450 }
0x2d9a   :  { %3991 = vmatpush3.bf16.xpose.msra.mxu0 %v4303_v26 }
0x2d9c   :  { %v3458_v30 = vpop.permute.xlu0 %3457 }
0x2da0   :  { %v3466_v5 = vpop.permute.xlu0 %3465 }
0x2da4   :  { %v3484_v52 = vpop.permute.xlu0 %3483 }
0x2da8   :  { %v3491_v49 = vpop.permute.xlu0 %3490 }
0x2e64   :  { %v3364_v21 = vpop.f32.mrb[48].mxu0 }
0x2e65   :  { %v3365_v63 = vadd.f32 %v4304_v62, %v3364_v21  ;;  %v3986_v55 = vpop.f32.mrb[49].mxu0 }
0x2e66   :  { %v3367_v22 = vpop.f32.mrb[50].mxu0 }
0x2e67   :  { %v3370_v41 = vmax.f32 %v3365_v63, 0.0  ;;  %v3987_v43 = vpop.f32.mrb[51].mxu0 }
0x2e69   :  { %v3371_v29 = vpack.c.bf16 %v3370_v41, %v3370_v41 }
0x2e6b   :  { %3993 = vmatmul.mubr.bf16.vlgmr.msra.gmra.mrb[52].mxu0 %v3371_v29 }
0x2f3e   :  { %v3406_v54 = vpop.f32.mrb[52].mxu0 }
0x2f3f   :  { %3413 = vrot.lane.b32.xlu1 %v3406_v54, %s4484_s3  ;;  %v3994_v56 = vpop.f32.mrb[53].mxu0 }
0x2f40   :  { %v3409_v44 = vpop.f32.mrb[54].mxu0 }
0x2f41   :  { %v3995_v58 = vpop.f32.mrb[55].mxu0 }
0x2f43   :  { %3446 = vrot.lane.b32.xlu1 %v3445_v59, %s4484_s3 }
0x2f47   :  { %3453 = vrot.lane.b32.xlu1 %v5076_v24, %s4470_s7 }
0x2f4b   :  { %3461 = vrot.lane.b32.xlu1 %v3460_v39, %s4483_s4 }
0x2f4f   :  { %3479 = vrot.lane.b32.xlu1 %v3478_v42, %s4474_s21 }
0x2f53   :  { %3487 = vrot.lane.b32.xlu1 %v3486_v27, %s4486_s11 }
0x2f57   :  { %3494 = vrot.lane.b32.xlu1 %v3493_v2, %s4487_s14 }
0x2fb1   :  { %v3414_v60 = vpop.permute.xlu1 %3413 }
0x2fb2   :  { %v3416_v23 = vadd.f32 %v3414_v60, %v5127_v57  ;;  %v3468_v57 = vsel %vm475_vm5, %v5068_v20, %v3443_v7 }
0x2fb4   :  { %v3417_v13 = vadd.f32 %v3416_v23, %v4870_v6 }
0x2fb5   :  { %v3447_v40 = vpop.permute.xlu1 %3446 }
0x2fb6   :  { %3419 = vrot.lane.b32.xlu0 %v3417_v13, %s4483_s4  ;;  %v3428_v24 = vrot.slane %v3417_v13, 3  ;;  %v3424_v3 = vrot.slane %v3417_v13, 2  ;;  %v3469_v36 = vsel %vm138_vm0, %v3468_v57, %v3447_v40  ;;  %v3422_v37 = vrot.slane %v3417_v13, 1 }
0x2fb7   :  { %v3471_v48 = vsel %vm3470_vm8, %v3469_v36, %v3451_v28 }
0x2fb8   :  { %3429 = vrot.lane.b32.xlu1 %v3428_v24, %s4470_s7  ;;  %s4489_s7 = smov [#allocation11]  }
0x2fb9   :  { %v3454_v6 = vpop.permute.xlu1 %3453  ;;  %s3523_s21 = sshll.u32 %s4489_s7, 4  ;;  %s3524_s21 = int_to_ptr.vmem [resolvable:$true] %s3523_s21 }
0x2fba   :  { %3425 = vrot.lane.b32.xlu0 %v3424_v3, %s4484_s3  ;;  %v3472_v4 = vsel %vm1122_vm6, %v3471_v48, %v3454_v6  ;;  %s4415_s18 = scalar_lea.vmem %s3524_s21, 32  ;;  %p4420_p13 = scmp.lt.s32.totalorder %s3524_s21, %s3524_s21 }
0x2fbb   :  { %v3474_v47 = vsel %vm3473_vm9, %v3472_v4, %v3458_v30  ;;  %p4416_p12 = scmp.ne.s32.totalorder %s3524_s21, %s4415_s18  ;;  %p4421_p0 = scmp.lt.s32.totalorder %s4415_s18, %s4415_s18 }
0x2fbc   :  { %3502 = vrot.lane.b32.xlu1 %v3501_v45, %s4488_s15 }
0x2fbd   :  { %v3462_v31 = vpop.permute.xlu1 %3461  ;;  %p4422_p1 = por %p4421_p0, %p4420_p13 }
0x2fbe   :  { %3498 = vrot.lane.b32.xlu0 %v3497_v1, %s4483_s4  ;;  %v3475_v50 = vsel %vm1185_vm7, %v3474_v47, %v3462_v31 }
0x2fbf   :  { %p4423_p2 = pnand %p4422_p1, %p4416_p12 }
0x2fc1   :  { %v3480_v32 = vpop.permute.xlu1 %3479 }
0x2fc2   :  { %v3505_v38 = vsel %vm475_vm5, %v5084_v25, %v3480_v32 }
0x2fc3   :  { %v3506_v46 = vsel %vm138_vm0, %v3505_v38, %v3484_v52 }
0x2fc5   :  { %v3488_v33 = vpop.permute.xlu1 %3487 }
0x2fc6   :  { %v3507_v12 = vsel %vm3470_vm8, %v3506_v46, %v3488_v33 }
0x2fc7   :  { %v3508_v10 = vsel %vm1122_vm6, %v3507_v12, %v3491_v49 }
0x2fc9   :  { %v3495_v34 = vpop.permute.xlu1 %3494 }
0x2fca   :  { %v3509_v15 = vsel %vm3473_vm9, %v3508_v10, %v3495_v34 }
0x3028   :  { %v3420_v35 = vpop.permute.xlu0 %3419 }
0x3029   :  { %v3432_v0 = vsel %vm138_vm0, %v3420_v35, %v3422_v37 }
0x302a   :  { %v3430_v8 = vpop.permute.xlu1 %3429 }
0x302c   :  { %v3426_v51 = vpop.permute.xlu0 %3425 }
0x302d   :  { %v3433_v20 = vsel %vm1122_vm6, %v3432_v0, %v3426_v51 }
0x302e   :  { %v3434_v25 = vsel %vm1185_vm7, %v3433_v20, %v3430_v8  ;;  %v3503_v53 = vpop.permute.xlu1 %3502 }
0x302f   :  { %v3436_v14 = vrot.slane %v3434_v25, 3 }
0x3030   :  { %v3499_v9 = vpop.permute.xlu0 %3498 }
0x3031   :  { %v3510_v61 = vsel %vm1185_vm7, %v3509_v15, %v3499_v9  ;;  %v3439_v17 = vsel %vm3438_vm10, %v3434_v25, %v3436_v14 }
0x3032   :  { %v3511_v16 = vsel %vm3476_vm11, %v3510_v61, %v3503_v53  ;;  %3440 = vst [vmem:[#allocation11] sm:$0x3] %v3439_v17 }
0x3033   :  { %v3513_v18 = vrot.slane %v3511_v16, 7 }
0x3034   :  { %4426 = shalt.err (!%p4423_p2)
}
0x3035   :  { %s4427_s1 = scalar_lea.hbm %s5222_s5, 32 }
0x3036   :  { %p4428_p3 = scmp.ne.s32.totalorder %s5222_s5, %s4427_s1  ;;  %p4431_p4 = scmp.lt.u32.totalorder %s4427_s1, %s5222_s5 }
0x3038   :  { %p4433_p5 = pnand %p4431_p4, %p4428_p3 }
0x303a   :  { %4436 = shalt.err (!%p4433_p5)
}
0x303b   :  { %3526 = dma.vmem_to_hbm [thread:$0]  %s3524_s21, 32, %s5222_s5, [#allocation4]   ;;  %v3477_v19 = vsel %vm3476_vm11, %v3475_v50, %v3466_v5 }
0x303c   :  { %v3515_v11 = vsel %vm3438_vm10, %v3477_v19, %v3513_v18  ;;  %s4437_s27 = scalar_lea.vmem %s3534_s17, 32  ;;  %p4442_p7 = scmp.lt.s32.totalorder %s3534_s17, %s3534_s17 }
0x303d   :  { %3516 = vst [vmem:[#allocation12] sm:$0x3] %v3515_v11  ;;  %p4438_p6 = scmp.ne.s32.totalorder %s3534_s17, %s4437_s27  ;;  %p4443_p8 = scmp.lt.s32.totalorder %s4437_s27, %s4437_s27 }
0x303f   :  { %p4444_p9 = por %p4443_p8, %p4442_p7 }
0x3041   :  { %p4445_p10 = pnand %p4444_p9, %p4438_p6 }
0x3043   :  { %4448 = shalt.err (!%p4445_p10)
}
0x3044   :  { %s4449_s30 = scalar_lea.hbm %s5223_s6, 32 }
0x3045   :  { %p4450_p11 = scmp.ne.s32.totalorder %s5223_s6, %s4449_s30  ;;  %p4453_p12 = scmp.lt.u32.totalorder %s4449_s30, %s5223_s6 }
0x3047   :  { %p4455_p13 = pnand %p4453_p12, %p4450_p11 }
0x3049   :  { %4458 = shalt.err (!%p4455_p13)
}
0x304a   :  { %3536 = dma.vmem_to_hbm [thread:$0]  %s3534_s17, 32, %s5223_s6, [#allocation13]  }
0x304b   :  { %4465 = dma.done.wait [#allocation4], 32  }
0x304c   :  { %4466 = vsyncadd [#allocation4], 4294967264 }
0x304d   :  { %4467 = dma.done.wait [#allocation13], 32  }
0x304e   :  { %4468 = vsyncadd [#allocation13], 4294967264 }
0x304f   :  { %3543 = vsyncpa [#allocation3], 1 }
0x3050   :  { %3544 = vsyncpa [#allocation6], 1 }
0x3051   :  { %3545 = vsyncpa [#allocation9], 1 }
0x3052   :  { %3546 = vsyncpa [#allocation4], 1 }
0x3053   :  { %3547 = vsyncpa [#allocation13], 1 }

</bundles_post_ra>
